<compile_context>
chip_gen: v6e
topology: v6e:2x2x1
jax: 0.10.0
libtpu: 0.0.40
codegen_flags: <defaults>
</compile_context>

<pallas_src>
import jax
import jax.numpy as jnp
from jax.experimental import pallas as pl
from jax.experimental.pallas import tpu as pltpu

IN_FEATURES = 784
H1 = 800            # fc1 output features
H2 = 800            # fc2 output features
OUT = 10
OUT_PAD = 128       # lane-dense output tile (avoid masked vst); sliced outside


def fc_net2_kernel(x_ref, w1_ref, b1_ref, w2_ref, b2_ref, w3_ref, b3_ref, o_ref):
    # Everything is resident in VMEM; one kernel invocation computes the whole
    # forward pass.  bf16 MXU inputs, f32 accumulation, f32 biases.
    x = x_ref[...].astype(jnp.bfloat16)
    h1 = jnp.dot(x, w1_ref[...], preferred_element_type=jnp.float32)
    h1 = jnp.maximum(h1 + b1_ref[...], 0.0)
    h2 = jnp.dot(h1.astype(jnp.bfloat16), w2_ref[...],
                 preferred_element_type=jnp.float32)
    h2 = jnp.maximum(h2 + b2_ref[...], 0.0)
    out = jnp.dot(h2.astype(jnp.bfloat16), w3_ref[...],
                  preferred_element_type=jnp.float32)
    o_ref[...] = (out + b3_ref[...]).astype(o_ref.dtype)


def prepare_params(params):
    """Cast weights to bf16 and lane-pad the fc3 output dim. Do this once."""
    w1, b1, w2, b2, w3, b3 = params
    bf = jnp.bfloat16
    w1p = w1.astype(bf)                                   # (784, 800)
    b1p = b1.astype(jnp.float32)                          # (1, 800)
    w2p = w2.astype(bf)                                   # (800, 800)
    b2p = b2.astype(jnp.float32)                          # (1, 800)
    w3p = jnp.zeros((H2, OUT_PAD), bf).at[:, :OUT].set(w3.astype(bf))   # (800, 128)
    b3p = jnp.zeros((1, OUT_PAD), jnp.float32).at[:, :OUT].set(b3)      # (1, 128)
    return (w1p, b1p, w2p, b2p, w3p, b3p)


@jax.jit
def fc_net2_forward(x, prepared):
    """x: (B, C, H, W) with C*H*W == 784. Returns logits (B, 10) in f32."""
    w1, b1, w2, b2, w3p, b3p = prepared
    B = x.shape[0]
    x_flat = x.reshape(B, -1)                    # torch.flatten(x, 1); f32, cast in-kernel
    assert x_flat.shape[1] == IN_FEATURES

    flops = 2 * B * (IN_FEATURES * H1 + H1 * H2 + H2 * OUT_PAD)
    bytes_accessed = (x_flat.size * 4 + w1.size * 2 + b1.size * 4
                      + w2.size * 2 + b2.size * 4 + w3p.size * 2 + b3p.size * 4
                      + B * OUT_PAD * 4)

    out_padded = pl.pallas_call(
        fc_net2_kernel,
        out_shape=jax.ShapeDtypeStruct((B, OUT_PAD), jnp.float32),
        compiler_params=pltpu.CompilerParams(
            vmem_limit_bytes=32 * 1024 * 1024,
        ),
        cost_estimate=pl.CostEstimate(
            flops=flops, transcendentals=0, bytes_accessed=bytes_accessed),
    )(x_flat, w1, b1, w2, b2, w3p, b3p)

    # Drop the lane padding (bias already added in-kernel).
    return out_padded[:, :OUT]


def init_params(key):
    """Deterministic init mimicking nn.Linear's uniform(-1/sqrt(fan_in), +).
    Weights stored as (in_features, out_features)."""
    def linear(k, fan_in, fan_out):
        kw, kb = jax.random.split(k)
        bound = 1.0 / jnp.sqrt(fan_in)
        w = jax.random.uniform(kw, (fan_in, fan_out), jnp.float32, -bound, bound)
        b = jax.random.uniform(kb, (1, fan_out), jnp.float32, -bound, bound)
        return w, b

    k1, k2, k3 = jax.random.split(key, 3)
    w1, b1 = linear(k1, IN_FEATURES, H1)
    w2, b2 = linear(k2, H1, H2)
    w3, b3 = linear(k3, H2, OUT)
    return (w1, b1, w2, b2, w3, b3)


def reference_forward(x, params):
    """Pure-JAX reference matching the kernel's bf16-input / f32-accumulate numerics."""
    w1, b1, w2, b2, w3, b3 = params
    bf = jnp.bfloat16
    xf = x.reshape(x.shape[0], -1)
    h1 = jnp.maximum(jnp.dot(xf.astype(bf), w1.astype(bf),
                             preferred_element_type=jnp.float32) + b1, 0.0)
    h2 = jnp.maximum(jnp.dot(h1.astype(bf), w2.astype(bf),
                             preferred_element_type=jnp.float32) + b2, 0.0)
    return jnp.dot(h2.astype(bf), w3.astype(bf),
                   preferred_element_type=jnp.float32) + b3


if __name__ == "__main__":
    key = jax.random.PRNGKey(0)
    kx, kp = jax.random.split(key)

    # MNIST-like input: batch=8, NCHW (8, 1, 28, 28) -> 784 features after flatten.
    x = jax.random.normal(kx, (8, 1, 28, 28), dtype=jnp.float32)
    params = init_params(kp)
    prepared = prepare_params(params)

    out = fc_net2_forward(x, prepared)
    out = jax.block_until_ready(out)

    ref = reference_forward(x, params)
    assert out.shape == (8, 10)
    assert jnp.allclose(out, ref, atol=1e-2, rtol=1e-2), "mismatch vs JAX reference"

    print("KERNEL_OK")
</pallas_src>

<mosaic_0001>
module attributes {stable_mosaic.version = 11 : i64} {
  func.func @fc_net2_kernel(%arg0: memref<8x784xf32, #tpu.memory_space<vmem>>, %arg1: memref<784x800xbf16, #tpu.memory_space<vmem>>, %arg2: memref<1x800xf32, #tpu.memory_space<vmem>>, %arg3: memref<800x800xbf16, #tpu.memory_space<vmem>>, %arg4: memref<1x800xf32, #tpu.memory_space<vmem>>, %arg5: memref<800x128xbf16, #tpu.memory_space<vmem>>, %arg6: memref<1x128xf32, #tpu.memory_space<vmem>>, %arg7: memref<8x128xf32, #tpu.memory_space<vmem>>) attributes {dimension_semantics = [], scalar_prefetch = 0 : i64, scratch_operands = 0 : i64, tpu.core_type = #tpu.core_type<tc>} {
    %c0 = arith.constant 0 : index
    %c0_0 = arith.constant 0 : index
    %0 = vector.load %arg0[%c0, %c0_0] : memref<8x784xf32, #tpu.memory_space<vmem>>, vector<8x784xf32>
    %1 = arith.truncf %0 : vector<8x784xf32> to vector<8x784xbf16>
    %c0_1 = arith.constant 0 : index
    %c0_2 = arith.constant 0 : index
    %2 = vector.load %arg1[%c0_1, %c0_2] : memref<784x800xbf16, #tpu.memory_space<vmem>>, vector<784x800xbf16>
    %cst = arith.constant dense<0.000000e+00> : vector<8x800xf32>
    %3 = tpu.matmul %1, %2, %cst {dimension_numbers = #tpu.dot_dimension_numbers<[1], [0], [0], [1], [0, 0, 1, 1], [], []>} : vector<8x784xbf16>, vector<784x800xbf16>, vector<8x800xf32> -> vector<8x800xf32>
    %c0_3 = arith.constant 0 : index
    %c0_4 = arith.constant 0 : index
    %4 = vector.load %arg2[%c0_3, %c0_4] : memref<1x800xf32, #tpu.memory_space<vmem>>, vector<1x800xf32>
    %5 = vector.broadcast %4 : vector<1x800xf32> to vector<8x800xf32>
    %6 = arith.addf %3, %5 : vector<8x800xf32>
    %cst_5 = arith.constant 0.000000e+00 : f32
    %7 = vector.broadcast %cst_5 : f32 to vector<8x800xf32>
    %8 = arith.maximumf %6, %7 : vector<8x800xf32>
    %9 = arith.truncf %8 : vector<8x800xf32> to vector<8x800xbf16>
    %c0_6 = arith.constant 0 : index
    %c0_7 = arith.constant 0 : index
    %10 = vector.load %arg3[%c0_6, %c0_7] : memref<800x800xbf16, #tpu.memory_space<vmem>>, vector<800x800xbf16>
    %cst_8 = arith.constant dense<0.000000e+00> : vector<8x800xf32>
    %11 = tpu.matmul %9, %10, %cst_8 {dimension_numbers = #tpu.dot_dimension_numbers<[1], [0], [0], [1], [0, 0, 1, 1], [], []>} : vector<8x800xbf16>, vector<800x800xbf16>, vector<8x800xf32> -> vector<8x800xf32>
    %c0_9 = arith.constant 0 : index
    %c0_10 = arith.constant 0 : index
    %12 = vector.load %arg4[%c0_9, %c0_10] : memref<1x800xf32, #tpu.memory_space<vmem>>, vector<1x800xf32>
    %13 = vector.broadcast %12 : vector<1x800xf32> to vector<8x800xf32>
    %14 = arith.addf %11, %13 : vector<8x800xf32>
    %cst_11 = arith.constant 0.000000e+00 : f32
    %15 = vector.broadcast %cst_11 : f32 to vector<8x800xf32>
    %16 = arith.maximumf %14, %15 : vector<8x800xf32>
    %17 = arith.truncf %16 : vector<8x800xf32> to vector<8x800xbf16>
    %c0_12 = arith.constant 0 : index
    %c0_13 = arith.constant 0 : index
    %18 = vector.load %arg5[%c0_12, %c0_13] : memref<800x128xbf16, #tpu.memory_space<vmem>>, vector<800x128xbf16>
    %cst_14 = arith.constant dense<0.000000e+00> : vector<8x128xf32>
    %19 = tpu.matmul %17, %18, %cst_14 {dimension_numbers = #tpu.dot_dimension_numbers<[1], [0], [0], [1], [0, 0, 1, 1], [], []>} : vector<8x800xbf16>, vector<800x128xbf16>, vector<8x128xf32> -> vector<8x128xf32>
    %c0_15 = arith.constant 0 : index
    %c0_16 = arith.constant 0 : index
    %20 = vector.load %arg6[%c0_15, %c0_16] : memref<1x128xf32, #tpu.memory_space<vmem>>, vector<1x128xf32>
    %21 = vector.broadcast %20 : vector<1x128xf32> to vector<8x128xf32>
    %22 = arith.addf %19, %21 : vector<8x128xf32>
    %c0_17 = arith.constant 0 : index
    %c0_18 = arith.constant 0 : index
    %23 = vector.load %arg7[%c0_17, %c0_18] : memref<8x128xf32, #tpu.memory_space<vmem>>, vector<8x128xf32>
    tpu.vector_store %arg7[%c0_17, %c0_18], %22 {strides = array<i32>} : memref<8x128xf32, #tpu.memory_space<vmem>>, vector<8x128xf32>,
    return
  }
}

</mosaic_0001>

<bundles_post_ra>
// kernel: fc_net2_forward.1
= control target key start
LH: loop header
LB: loop body
LE: loop exit
PB: predicated region body
PF: predicated region fallthrough
CT: control target
= control target key end

     0   :  { %12 = vsyncpa [#allocation3], 0  ;;  %s8984_s0 = inlined_call_operand.vmem [shape: f32[8,784], index: 0, kind: input, shape index: {}]   ;;  %s8985_s1 = inlined_call_operand.hbm [shape: bf16[784,800], index: 1, kind: input, shape index: {}]   ;;  %s8986_s2 = inlined_call_operand.hbm [shape: f32[1,800], index: 2, kind: input, shape index: {}]   ;;  %s8987_s3 = inlined_call_operand.hbm [shape: bf16[800,800], index: 3, kind: input, shape index: {}]   ;;  %s8988_s4 = inlined_call_operand.hbm [shape: f32[1,800], index: 4, kind: input, shape index: {}]   ;;  %s8989_s5 = inlined_call_operand.hbm [shape: bf16[800,128], index: 5, kind: input, shape index: {}]   ;;  %s8990_s6 = inlined_call_operand.hbm [shape: f32[1,128], index: 6, kind: input, shape index: {}]   ;;  %s8991_s7 = inlined_call_operand.hbm [shape: f32[8,128], index: 7, kind: output, shape index: {}]  }
   0x1   :  { %13 = vsyncpa [#allocation6], 0 }
   0x2   :  { %14 = vsyncpa [#allocation9], 0 }
   0x3   :  { %15 = vsyncpa [#allocation12], 0 }
   0x4   :  { %16 = vsyncpa [#allocation4], 0  ;;  %s8664_s24 = smov [#allocation5]   ;;  %s8665_s26 = smov [#allocation8]  }
   0x5   :  { %s37_s25 = sshll.u32 %s8664_s24, 4  ;;  %s59_s27 = sshll.u32 %s8665_s26, 4  ;;  %s38_s25 = int_to_ptr.vmem [resolvable:$true] %s37_s25  ;;  %s60_s27 = int_to_ptr.vmem [resolvable:$true] %s59_s27 }
   0x6   :  { %s8522_s28 = scalar_lea.vmem %s38_s25, 112  ;;  %s8526_s29 = scalar_lea.vmem %s38_s25, 128 }
   0x7   :  { %p8523_p0 = scmp.ne.s32.totalorder %s38_s25, %s8522_s28  ;;  %p8527_p1 = scmp.lt.s32.totalorder %s38_s25, %s38_s25 }
   0x8   :  { %p8528_p2 = scmp.lt.s32.totalorder %s8526_s29, %s8522_s28 }
   0xa   :  { %p8529_p3 = por %p8528_p2, %p8527_p1 }
   0xc   :  { %p8530_p4 = pnand %p8529_p3, %p8523_p0 }
   0xe   :  { %8533 = shalt.err (!%p8530_p4)
}
   0xf   :  { %40 = dma.hbm_to_vmem [thread:$0]  %s8986_s2, 112, %s38_s25, [#allocation6]  }
  0x10   :  { %s8542_s9 = scalar_lea.vmem %s60_s27, 112  ;;  %s8546_s10 = scalar_lea.vmem %s60_s27, 128 }
  0x11   :  { %p8543_p5 = scmp.ne.s32.totalorder %s60_s27, %s8542_s9  ;;  %p8547_p6 = scmp.lt.s32.totalorder %s60_s27, %s60_s27 }
  0x12   :  { %p8548_p7 = scmp.lt.s32.totalorder %s8546_s10, %s8542_s9 }
  0x14   :  { %p8549_p8 = por %p8548_p7, %p8547_p6 }
  0x16   :  { %p8550_p9 = pnand %p8549_p8, %p8543_p5 }
  0x18   :  { %8553 = shalt.err (!%p8550_p9)
}
  0x19   :  { %62 = dma.hbm_to_vmem [thread:$0]  %s8988_s4, 112, %s60_s27, [#allocation9]  }
  0x1a   :  { %s8666_s13 = smov [#allocation2]  }
  0x1b   :  { %s24_s14 = sshll.u32 %s8666_s13, 4  ;;  %s25_s14 = int_to_ptr.vmem [resolvable:$true] %s24_s14 }
  0x1c   :  { %s8562_s15 = scalar_lea.vmem %s25_s14, 43904  ;;  %p8567_p11 = scmp.lt.s32.totalorder %s25_s14, %s25_s14 }
  0x1d   :  { %p8563_p10 = scmp.ne.s32.totalorder %s25_s14, %s8562_s15  ;;  %p8568_p12 = scmp.lt.s32.totalorder %s8562_s15, %s8562_s15 }
  0x1f   :  { %p8569_p13 = por %p8568_p12, %p8567_p11 }
  0x21   :  { %p8570_p0 = pnand %p8569_p13, %p8563_p10 }
  0x23   :  { %8573 = shalt.err (!%p8570_p0)
}
  0x24   :  { %s8667_s2 = smov 448   ;;  %s8668_s16 = smov 28  }
  0x25   :  { %30 = dma.hbm_to_vmem [thread:$0]  %s8985_s1, 43904, %s25_s14, [#allocation3], %s8667_s2, %s8667_s2, %s8668_s16  }
  0x26   :  { %s8669_s19 = smov [#allocation7]   ;;  %s8670_s4 = smov [#allocation10]  }
  0x27   :  { %s46_s20 = sshll.u32 %s8669_s19, 4  ;;  %s68_s21 = sshll.u32 %s8670_s4, 4  ;;  %s47_s20 = int_to_ptr.vmem [resolvable:$true] %s46_s20  ;;  %s69_s21 = int_to_ptr.vmem [resolvable:$true] %s68_s21 }
  0x28   :  { %s8582_s22 = scalar_lea.vmem %s47_s20, 44800  ;;  %p8587_p2 = scmp.lt.s32.totalorder %s47_s20, %s47_s20 }
  0x29   :  { %p8583_p1 = scmp.ne.s32.totalorder %s47_s20, %s8582_s22  ;;  %p8588_p3 = scmp.lt.s32.totalorder %s8582_s22, %s8582_s22 }
  0x2b   :  { %p8589_p4 = por %p8588_p3, %p8587_p2 }
  0x2d   :  { %p8590_p5 = pnand %p8589_p4, %p8583_p1 }
  0x2f   :  { %8593 = shalt.err (!%p8590_p5)
}
  0x30   :  { %52 = dma.hbm_to_vmem [thread:$0]  %s8987_s3, 44800, %s47_s20, [#allocation6], %s8667_s2, %s8667_s2, %s8668_s16  }
  0x31   :  { %s8602_s25 = scalar_lea.vmem %s69_s21, 6400  ;;  %p8607_p7 = scmp.lt.s32.totalorder %s69_s21, %s69_s21 }
  0x32   :  { %p8603_p6 = scmp.ne.s32.totalorder %s69_s21, %s8602_s25  ;;  %p8608_p8 = scmp.lt.s32.totalorder %s8602_s25, %s8602_s25 }
  0x34   :  { %p8609_p9 = por %p8608_p8, %p8607_p7 }
  0x36   :  { %p8610_p10 = pnand %p8609_p9, %p8603_p6 }
  0x38   :  { %8613 = shalt.err (!%p8610_p10)
}
  0x39   :  { %s8671_s1 = smov 64   ;;  %s8672_s26 = smov 4  }
  0x3a   :  { %74 = dma.hbm_to_vmem [thread:$0]  %s8989_s5, 6400, %s69_s21, [#allocation9], %s8671_s1, %s8671_s1, %s8672_s26  }
  0x3b   :  { %s8673_s29 = smov [#allocation11]  }
  0x3c   :  { %s81_s30 = sshll.u32 %s8673_s29, 4  ;;  %s82_s30 = int_to_ptr.vmem [resolvable:$true] %s81_s30 }
  0x3d   :  { %s8622_s8 = scalar_lea.vmem %s82_s30, 16  ;;  %s8626_s3 = scalar_lea.vmem %s82_s30, 32 }
  0x3e   :  { %p8623_p11 = scmp.ne.s32.totalorder %s82_s30, %s8622_s8  ;;  %p8627_p12 = scmp.lt.s32.totalorder %s82_s30, %s82_s30 }
  0x3f   :  { %p8628_p13 = scmp.lt.s32.totalorder %s8626_s3, %s8622_s8 }
  0x41   :  { %p8629_p0 = por %p8628_p13, %p8627_p12 }
  0x43   :  { %p8630_p1 = pnand %p8629_p0, %p8623_p11 }
  0x45   :  { %8633 = shalt.err (!%p8630_p1)
}
  0x46   :  { %84 = dma.hbm_to_vmem [thread:$0]  %s8990_s6, 16, %s82_s30, [#allocation12]  }
  0x47   :  { %8654 = dma.done.wait [#allocation3], 43904  }
  0x48   :  { %8655 = vsyncadd [#allocation3], 4294923392 }
  0x49   :  { %8656 = dma.done.wait [#allocation6], 44912  }
  0x4a   :  { %8657 = vsyncadd [#allocation6], 4294922384 }
  0x4b   :  { %8658 = dma.done.wait [#allocation9], 6512  }
  0x4c   :  { %8659 = vsyncadd [#allocation9], 4294960784 }
  0x4d   :  { %8660 = dma.done.wait [#allocation12], 16  }
  0x4e   :  { %8661 = vsyncadd [#allocation12], 4294967280  ;;  %v7472_v0 = vld [vmem:[#allocation2 + $0x18c] ss:$28 sps:$4 sm:$0xff]   ;;  %v7478_v4 = vld [vmem:[#allocation2 + $0x154] ss:$28 sps:$4 sm:$0xff]  }
  0x4f   :  { %v7474_v1 = vld [vmem:[#allocation2 + $0x50c] ss:$28 sps:$4 sm:$0xff]   ;;  %2315 = vmatprep.subr.bf16.mxu0 %v7472_v0  ;;  %v7480_v5 = vld [vmem:[#allocation2 + $0x4d4] ss:$28 sps:$4 sm:$0xff]   ;;  %v7484_v8 = vld [vmem:[#allocation2 + $0x11c] ss:$28 sps:$4 sm:$0xff]  }
  0x50   :  { %v7476_v2 = vld [vmem:[#allocation2 + $0x188] ss:$28 sps:$4 sm:$0xff]   ;;  %2356 = vmatprep.subr.bf16.mxu1 %v7474_v1  ;;  %v7482_v6 = vld [vmem:[#allocation2 + $0x150] ss:$28 sps:$4 sm:$0xff]   ;;  %v7486_v9 = vld [vmem:[#allocation2 + $0x49c] ss:$28 sps:$4 sm:$0xff]  }
  0x51   :  { %v7477_v3 = vld [vmem:[#allocation2 + $0x508] ss:$28 sps:$4 sm:$0xff]   ;;  %2316 = vmatpush1.bf16.msra.mxu0 %v7476_v2  ;;  %v7483_v7 = vld [vmem:[#allocation2 + $0x4d0] ss:$28 sps:$4 sm:$0xff]   ;;  %v7488_v10 = vld [vmem:[#allocation2 + $0x118] ss:$28 sps:$4 sm:$0xff]  }
  0x52   :  { %2357 = vmatpush1.bf16.msra.mxu1 %v7477_v3  ;;  %2317 = vmatprep.subr.bf16.mxu0 %v7478_v4  ;;  %v7489_v11 = vld [vmem:[#allocation2 + $0x498] ss:$28 sps:$4 sm:$0xff]   ;;  %v7490_v12 = vld [vmem:[#allocation2 + $0xe4] ss:$28 sps:$4 sm:$0xff]   ;;  %v7496_v16 = vld [vmem:[#allocation2 + $0xac] ss:$28 sps:$4 sm:$0xff]  }
  0x53   :  { %2358 = vmatprep.subr.bf16.mxu1 %v7480_v5  ;;  %v7492_v13 = vld [vmem:[#allocation2 + $0x464] ss:$28 sps:$4 sm:$0xff]   ;;  %v7498_v17 = vld [vmem:[#allocation2 + $0x42c] ss:$28 sps:$4 sm:$0xff]   ;;  %v7502_v20 = vld [vmem:[#allocation2 + $0x74] ss:$28 sps:$4 sm:$0xff]  }
  0x54   :  { %v7494_v14 = vld [vmem:[#allocation2 + $0xe0] ss:$28 sps:$4 sm:$0xff]   ;;  %v7500_v18 = vld [vmem:[#allocation2 + $0xa8] ss:$28 sps:$4 sm:$0xff]   ;;  %v7504_v21 = vld [vmem:[#allocation2 + $0x3f4] ss:$28 sps:$4 sm:$0xff]  }
  0x55   :  { %2318 = vmatpush1.bf16.msra.mxu0 %v7482_v6  ;;  %v7495_v15 = vld [vmem:[#allocation2 + $0x460] ss:$28 sps:$4 sm:$0xff]   ;;  %v7501_v19 = vld [vmem:[#allocation2 + $0x428] ss:$28 sps:$4 sm:$0xff]   ;;  %v7506_v22 = vld [vmem:[#allocation2 + $0x70] ss:$28 sps:$4 sm:$0xff]  }
  0x56   :  { %2359 = vmatpush1.bf16.msra.mxu1 %v7483_v7  ;;  %2319 = vmatprep.subr.bf16.mxu0 %v7484_v8  ;;  %v7507_v23 = vld [vmem:[#allocation2 + $0x3f0] ss:$28 sps:$4 sm:$0xff]   ;;  %v7508_v24 = vld [vmem:[#allocation2 + $0x3c] ss:$28 sps:$4 sm:$0xff]   ;;  %v7514_v28 = vld [vmem:[#allocation2 + $0x4] ss:$28 sps:$4 sm:$0xff]  }
  0x57   :  { %2360 = vmatprep.subr.bf16.mxu1 %v7486_v9  ;;  %v7510_v25 = vld [vmem:[#allocation2 + $0x3bc] ss:$28 sps:$4 sm:$0xff]   ;;  %v7516_v29 = vld [vmem:[#allocation2 + $0x384] ss:$28 sps:$4 sm:$0xff]   ;;  %v7520_v32 = vld [vmem:[#allocation2 + $0x34c] ss:$28 sps:$4 sm:$0xff]  }
  0x58   :  { %v7512_v26 = vld [vmem:[#allocation2 + $0x38] ss:$28 sps:$4 sm:$0xff]   ;;  %v7518_v30 = vld [vmem:[#allocation2] ss:$28 sps:$4 sm:$0xff]   ;;  %v7522_v33 = vld [vmem:[#allocation2 + $0x6cc] ss:$28 sps:$4 sm:$0xff]  }
  0x59   :  { %2320 = vmatpush1.bf16.msra.mxu0 %v7488_v10  ;;  %v7513_v27 = vld [vmem:[#allocation2 + $0x3b8] ss:$28 sps:$4 sm:$0xff]   ;;  %v7519_v31 = vld [vmem:[#allocation2 + $0x380] ss:$28 sps:$4 sm:$0xff]   ;;  %v7524_v34 = vld [vmem:[#allocation2 + $0x348] ss:$28 sps:$4 sm:$0xff]  }
  0x5a   :  { %2361 = vmatpush1.bf16.msra.mxu1 %v7489_v11  ;;  %2321 = vmatprep.subr.bf16.mxu0 %v7490_v12  ;;  %v7525_v35 = vld [vmem:[#allocation2 + $0x6c8] ss:$28 sps:$4 sm:$0xff]   ;;  %v7526_v36 = vld [vmem:[#allocation2 + $0x314] ss:$28 sps:$4 sm:$0xff]   ;;  %v7532_v40 = vld [vmem:[#allocation2 + $0x2dc] ss:$28 sps:$4 sm:$0xff]  }
  0x5b   :  { %2362 = vmatprep.subr.bf16.mxu1 %v7492_v13  ;;  %v7528_v37 = vld [vmem:[#allocation2 + $0x694] ss:$28 sps:$4 sm:$0xff]   ;;  %v7534_v41 = vld [vmem:[#allocation2 + $0x65c] ss:$28 sps:$4 sm:$0xff]   ;;  %v7538_v44 = vld [vmem:[#allocation2 + $0x2a4] ss:$28 sps:$4 sm:$0xff]  }
  0x5c   :  { %v7530_v38 = vld [vmem:[#allocation2 + $0x310] ss:$28 sps:$4 sm:$0xff]   ;;  %v7536_v42 = vld [vmem:[#allocation2 + $0x2d8] ss:$28 sps:$4 sm:$0xff]   ;;  %v7540_v45 = vld [vmem:[#allocation2 + $0x624] ss:$28 sps:$4 sm:$0xff]  }
  0x5d   :  { %2322 = vmatpush1.bf16.msra.mxu0 %v7494_v14  ;;  %v7531_v39 = vld [vmem:[#allocation2 + $0x690] ss:$28 sps:$4 sm:$0xff]   ;;  %v7537_v43 = vld [vmem:[#allocation2 + $0x658] ss:$28 sps:$4 sm:$0xff]   ;;  %v7542_v47 = vld [vmem:[#allocation2 + $0x2a0] ss:$28 sps:$4 sm:$0xff]  }
  0x5e   :  { %2363 = vmatpush1.bf16.msra.mxu1 %v7495_v15  ;;  %2323 = vmatprep.subr.bf16.mxu0 %v7496_v16  ;;  %v105_v46 = vld [vmem:[%s8984_s0 + $0x8] sm:$0xff]  ;;  %v7543_v48 = vld [vmem:[#allocation2 + $0x620] ss:$28 sps:$4 sm:$0xff]   ;;  %v7550_v56 = vld [vmem:[#allocation2 + $0x234] ss:$28 sps:$4 sm:$0xff]   ;;  %v8674_v16 = vmov 0  }
  0x5f   :  { %2364 = vmatprep.subr.bf16.mxu1 %v7498_v17  ;;  %v8739_v49 = vpack.c.bf16 %v105_v46, %v105_v46  ;;  %v107_v50 = vld [vmem:[%s8984_s0 + $0x18] sm:$0xff]  ;;  %v7544_v51 = vld [vmem:[#allocation2 + $0x26c] ss:$28 sps:$4 sm:$0xff]   ;;  %v7552_v57 = vld [vmem:[#allocation2 + $0x5b4] ss:$28 sps:$4 sm:$0xff]   ;;  %vm2311_vm0 = vcmask 130048  }
  0x60   :  { %v8744_v52 = vpack.c.bf16 %v107_v50, %v107_v50  ;;  %v7546_v53 = vld [vmem:[#allocation2 + $0x5ec] ss:$28 sps:$4 sm:$0xff]   ;;  %v7556_v60 = vld [vmem:[#allocation2 + $0x1fc] ss:$28 sps:$4 sm:$0xff]   ;;  %v7562_v0 = vld [vmem:[#allocation2 + $0x1c4] ss:$28 sps:$4 sm:$0xff]  }
  0x61   :  { %2324 = vmatpush1.bf16.msra.mxu0 %v7500_v18  ;;  %2347 = vmatprep.mubr.bf16.mxu0 %v8739_v49  ;;  %v7548_v54 = vld [vmem:[#allocation2 + $0x268] ss:$28 sps:$4 sm:$0xff]   ;;  %v7554_v58 = vld [vmem:[#allocation2 + $0x230] ss:$28 sps:$4 sm:$0xff]   ;;  %v7558_v61 = vld [vmem:[#allocation2 + $0x57c] ss:$28 sps:$4 sm:$0xff]  }
  0x62   :  { %2365 = vmatpush1.bf16.msra.mxu1 %v7501_v19  ;;  %2325 = vmatprep.subr.bf16.mxu0 %v7502_v20  ;;  %v7549_v55 = vld [vmem:[#allocation2 + $0x5e8] ss:$28 sps:$4 sm:$0xff]   ;;  %v7555_v59 = vld [vmem:[#allocation2 + $0x5b0] ss:$28 sps:$4 sm:$0xff]   ;;  %v7560_v62 = vld [vmem:[#allocation2 + $0x1f8] ss:$28 sps:$4 sm:$0xff]  }
  0x63   :  { %2366 = vmatprep.subr.bf16.mxu1 %v7504_v21  ;;  %2388 = vmatprep.mubr.bf16.mxu1 %v8744_v52  ;;  %v7561_v63 = vld [vmem:[#allocation2 + $0x578] ss:$28 sps:$4 sm:$0xff]   ;;  %v7564_v1 = vld [vmem:[#allocation2 + $0x544] ss:$28 sps:$4 sm:$0xff]   ;;  %v7570_v6 = vld [vmem:[#allocation2 + $0x88c] ss:$28 sps:$4 sm:$0xff]  }
  0x64   :  { %v7566_v2 = vld [vmem:[#allocation2 + $0x1c0] ss:$28 sps:$4 sm:$0xff]   ;;  %v106_v5 = vld [vmem:[%s8984_s0 + $0x10] sm:$0xff]  ;;  %v7568_v10 = vld [vmem:[#allocation2 + $0x888] ss:$28 sps:$4 sm:$0xff]   ;;  %vm8676_vm1 = vmmov 0  }
  0x65   :  { %2326 = vmatpush1.bf16.msra.mxu0 %v7506_v22  ;;  %v7567_v3 = vld [vmem:[#allocation2 + $0x540] ss:$28 sps:$4 sm:$0xff]   ;;  %v8756_v9 = vpack.c.bf16 %v106_v5, %v106_v5  ;;  %v7576_v12 = vld [vmem:[#allocation2 + $0x854] ss:$28 sps:$4 sm:$0xff]   ;;  %v7616_v46 = vld [vmem:[#allocation2 + $0xa48] ss:$28 sps:$4 sm:$0xff]  }
  0x66   :  { %2367 = vmatpush1.bf16.msra.mxu1 %v7507_v23  ;;  %2327 = vmatprep.subr.bf16.mxu0 %v7508_v24  ;;  %v104_v4 = vld [vmem:[%s8984_s0] sm:$0xff]  ;;  %v7579_v13 = vld [vmem:[#allocation2 + $0x194] ss:$28 sps:$4 sm:$0xff]   ;;  %v7582_v17 = vld [vmem:[#allocation2 + $0x81c] ss:$28 sps:$4 sm:$0xff]   ;;  %vm5218_vm2 = vcmask 261120  }
  0x67   :  { %2368 = vmatprep.subr.bf16.mxu1 %v7510_v25  ;;  %v7573_v7 = vld [vmem:[#allocation2 + $0xa84] ss:$28 sps:$4 sm:$0xff]   ;;  %v8754_v8 = vpack.c.bf16 %v104_v4, %v104_v4  ;;  %v7574_v14 = vld [vmem:[#allocation2 + $0x850] ss:$28 sps:$4 sm:$0xff]   ;;  %v7580_v20 = vld [vmem:[#allocation2 + $0x818] ss:$28 sps:$4 sm:$0xff]  }
  0x68   :  { %v7571_v11 = vld [vmem:[#allocation2 + $0xa80] ss:$28 sps:$4 sm:$0xff]   ;;  %v110_v15 = vld [vmem:[%s8984_s0 + $0x30] sm:$0xff]  ;;  %v7619_v50 = vld [vmem:[#allocation2 + $0x8] ss:$28 sps:$4 sm:$0xff]  }
  0x69   :  { %2328 = vmatpush1.bf16.msra.mxu0 %v7512_v26  ;;  %v7577_v18 = vld [vmem:[#allocation2 + $0x190] ss:$28 sps:$4 sm:$0xff]   ;;  %v8764_v19 = vpack.c.bf16 %v110_v15, %v110_v15  ;;  %v7585_v21 = vld [vmem:[#allocation2 + $0x15c] ss:$28 sps:$4 sm:$0xff]   ;;  %v7588_v22 = vld [vmem:[#allocation2 + $0x7e4] ss:$28 sps:$4 sm:$0xff]  }
  0x6a   :  { %2369 = vmatpush1.bf16.msra.mxu1 %v7513_v27  ;;  %2329 = vmatprep.subr.bf16.mxu0 %v7514_v28  ;;  %v7583_v23 = vld [vmem:[#allocation2 + $0x158] ss:$28 sps:$4 sm:$0xff]   ;;  %v7586_v24 = vld [vmem:[#allocation2 + $0x7e0] ss:$28 sps:$4 sm:$0xff]   ;;  %v7594_v26 = vld [vmem:[#allocation2 + $0x7ac] ss:$28 sps:$4 sm:$0xff]  }
  0x6b   :  { %2370 = vmatprep.subr.bf16.mxu1 %v7516_v29  ;;  %v7591_v25 = vld [vmem:[#allocation2 + $0x124] ss:$28 sps:$4 sm:$0xff]   ;;  %v7597_v29 = vld [vmem:[#allocation2 + $0xec] ss:$28 sps:$4 sm:$0xff]   ;;  %v7651_v5 = vld [vmem:[#allocation2 + $0x274] ss:$28 sps:$4 sm:$0xff]  }
  0x6c   :  { %v7589_v27 = vld [vmem:[#allocation2 + $0x120] ss:$28 sps:$4 sm:$0xff]   ;;  %v7592_v28 = vld [vmem:[#allocation2 + $0x7a8] ss:$28 sps:$4 sm:$0xff]   ;;  %v7646_v4 = vld [vmem:[#allocation2 + $0x930] ss:$28 sps:$4 sm:$0xff]  }
  0x6d   :  { %2330 = vmatpush1.bf16.msra.mxu0 %v7518_v30  ;;  %v7600_v30 = vld [vmem:[#allocation2 + $0x774] ss:$28 sps:$4 sm:$0xff]   ;;  %v7663_v15 = vld [vmem:[#allocation2 + $0x204] ss:$28 sps:$4 sm:$0xff]  }
  0x6e   :  { %2371 = vmatpush1.bf16.msra.mxu1 %v7519_v31  ;;  %2331 = vmatprep.subr.bf16.mxu0 %v7520_v32  ;;  %v7595_v31 = vld [vmem:[#allocation2 + $0xe8] ss:$28 sps:$4 sm:$0xff]   ;;  %v7598_v32 = vld [vmem:[#allocation2 + $0x770] ss:$28 sps:$4 sm:$0xff]  }
  0x6f   :  { %2372 = vmatprep.subr.bf16.mxu1 %v7522_v33  ;;  %v7603_v33 = vld [vmem:[#allocation2 + $0xb4] ss:$28 sps:$4 sm:$0xff]  }
  0x71   :  { %2332 = vmatpush2.bf16.msra.mxu0 %v7524_v34  ;;  %v7606_v34 = vld [vmem:[#allocation2 + $0x73c] ss:$28 sps:$4 sm:$0xff]  }
  0x72   :  { %2373 = vmatpush2.bf16.msra.mxu1 %v7525_v35  ;;  %2333 = vmatprep.subr.bf16.mxu0 %v7526_v36  ;;  %v109_v35 = vld [vmem:[%s8984_s0 + $0x28] sm:$0xff] }
  0x73   :  { %2374 = vmatprep.subr.bf16.mxu1 %v7528_v37  ;;  %v8772_v36 = vpack.c.bf16 %v109_v35, %v109_v35  ;;  %v7601_v37 = vld [vmem:[#allocation2 + $0xb0] ss:$28 sps:$4 sm:$0xff]   ;;  %v7687_v35 = vld [vmem:[#allocation2 + $0x824] ss:$28 sps:$4 sm:$0xff]  }
  0x75   :  { %2334 = vmatpush2.bf16.msra.mxu0 %v7530_v38  ;;  %v7604_v38 = vld [vmem:[#allocation2 + $0x738] ss:$28 sps:$4 sm:$0xff]  }
  0x76   :  { %2375 = vmatpush2.bf16.msra.mxu1 %v7531_v39  ;;  %2335 = vmatprep.subr.bf16.mxu0 %v7532_v40  ;;  %v7609_v39 = vld [vmem:[#allocation2 + $0x7c] ss:$28 sps:$4 sm:$0xff]   ;;  %v7612_v40 = vld [vmem:[#allocation2 + $0x704] ss:$28 sps:$4 sm:$0xff]  }
  0x77   :  { %2376 = vmatprep.subr.bf16.mxu1 %v7534_v41  ;;  %v7607_v41 = vld [vmem:[#allocation2 + $0x78] ss:$28 sps:$4 sm:$0xff]  }
  0x79   :  { %2336 = vmatpush2.bf16.msra.mxu0 %v7536_v42  ;;  %v7610_v42 = vld [vmem:[#allocation2 + $0x700] ss:$28 sps:$4 sm:$0xff]  }
  0x7a   :  { %2377 = vmatpush2.bf16.msra.mxu1 %v7537_v43  ;;  %2337 = vmatprep.subr.bf16.mxu0 %v7538_v44  ;;  %v7615_v43 = vld [vmem:[#allocation2 + $0x44] ss:$28 sps:$4 sm:$0xff]   ;;  %v7618_v44 = vld [vmem:[#allocation2 + $0xa4c] ss:$28 sps:$4 sm:$0xff]  }
  0x7b   :  { %2378 = vmatprep.subr.bf16.mxu1 %v7540_v45  ;;  %v7613_v45 = vld [vmem:[#allocation2 + $0x40] ss:$28 sps:$4 sm:$0xff]  }
  0x7d   :  { %2338 = vmatpush2.bf16.msra.mxu0 %v7542_v47  ;;  %v7621_v47 = vld [vmem:[#allocation2 + $0xc] ss:$28 sps:$4 sm:$0xff]  }
  0x7e   :  { %2379 = vmatpush2.bf16.msra.mxu1 %v7543_v48  ;;  %2339 = vmatprep.subr.bf16.mxu0 %v7544_v51  ;;  %v7624_v48 = vld [vmem:[#allocation2 + $0xa14] ss:$28 sps:$4 sm:$0xff]  }
  0x7f   :  { %2380 = vmatprep.subr.bf16.mxu1 %v7546_v53  ;;  %v7622_v51 = vld [vmem:[#allocation2 + $0xa10] ss:$28 sps:$4 sm:$0xff]  }
  0x80   :  { %v7627_v53 = vld [vmem:[#allocation2 + $0x354] ss:$28 sps:$4 sm:$0xff]  }
  0x81   :  { %2340 = vmatpush2.bf16.msra.mxu0 %v7548_v54  ;;  %v7630_v54 = vld [vmem:[#allocation2 + $0x9dc] ss:$28 sps:$4 sm:$0xff]  }
  0x82   :  { %2381 = vmatpush2.bf16.msra.mxu1 %v7549_v55  ;;  %2341 = vmatprep.subr.bf16.mxu0 %v7550_v56  ;;  %v7625_v55 = vld [vmem:[#allocation2 + $0x350] ss:$28 sps:$4 sm:$0xff]   ;;  %v7628_v56 = vld [vmem:[#allocation2 + $0x9d8] ss:$28 sps:$4 sm:$0xff]  }
  0x83   :  { %2382 = vmatprep.subr.bf16.mxu1 %v7552_v57  ;;  %v7633_v57 = vld [vmem:[#allocation2 + $0x31c] ss:$28 sps:$4 sm:$0xff]  }
  0x85   :  { %2342 = vmatpush2.bf16.msra.mxu0 %v7554_v58  ;;  %v7636_v58 = vld [vmem:[#allocation2 + $0x9a4] ss:$28 sps:$4 sm:$0xff]  }
  0x86   :  { %2383 = vmatpush2.bf16.msra.mxu1 %v7555_v59  ;;  %2343 = vmatprep.subr.bf16.mxu0 %v7556_v60  ;;  %v7631_v59 = vld [vmem:[#allocation2 + $0x318] ss:$28 sps:$4 sm:$0xff]   ;;  %v7634_v60 = vld [vmem:[#allocation2 + $0x9a0] ss:$28 sps:$4 sm:$0xff]  }
  0x87   :  { %2384 = vmatprep.subr.bf16.mxu1 %v7558_v61  ;;  %v7639_v61 = vld [vmem:[#allocation2 + $0x2e4] ss:$28 sps:$4 sm:$0xff]  }
  0x89   :  { %2344 = vmatpush2.bf16.msra.mxu0 %v7560_v62  ;;  %v7642_v62 = vld [vmem:[#allocation2 + $0x96c] ss:$28 sps:$4 sm:$0xff]  }
  0x8a   :  { %2385 = vmatpush2.bf16.msra.mxu1 %v7561_v63  ;;  %2345 = vmatprep.subr.bf16.mxu0 %v7562_v0  ;;  %v7637_v63 = vld [vmem:[#allocation2 + $0x2e0] ss:$28 sps:$4 sm:$0xff]   ;;  %v7640_v0 = vld [vmem:[#allocation2 + $0x968] ss:$28 sps:$4 sm:$0xff]  }
  0x8b   :  { %2386 = vmatprep.subr.bf16.mxu1 %v7564_v1  ;;  %v7645_v1 = vld [vmem:[#allocation2 + $0x2ac] ss:$28 sps:$4 sm:$0xff]  }
  0x8d   :  { %2346 = vmatpush2.bf16.msra.mxu0 %v7566_v2  ;;  %v7648_v2 = vld [vmem:[#allocation2 + $0x934] ss:$28 sps:$4 sm:$0xff]  }
  0x8e   :  { %2387 = vmatpush2.bf16.msra.mxu1 %v7567_v3  ;;  %2397 = vmatprep.subr.bf16.mxu0 %v7570_v6  ;;  %v7643_v3 = vld [vmem:[#allocation2 + $0x2a8] ss:$28 sps:$4 sm:$0xff]   ;;  %v7654_v6 = vld [vmem:[#allocation2 + $0x8fc] ss:$28 sps:$4 sm:$0xff]  }
  0x8f   :  { %2452 = vmatprep.subr.bf16.mxu1 %v7573_v7  ;;  %v7649_v7 = vld [vmem:[#allocation2 + $0x270] ss:$28 sps:$4 sm:$0xff]  }
  0x90   :  { %2348 = vmatmul.mubr.bf16.vlgmr.msra.gmra.mxu0 %v8754_v8 }
  0x91   :  { %2389 = vmatmul.mubr.bf16.vlgmr.msra.gmra.mxu1 %v8756_v9  ;;  %2398 = vmatpush1.bf16.msra.mxu0 %v7568_v10  ;;  %v7652_v10 = vld [vmem:[#allocation2 + $0x8f8] ss:$28 sps:$4 sm:$0xff]  }
  0x92   :  { %2453 = vmatpush1.bf16.msra.mxu1 %v7571_v11  ;;  %2399 = vmatprep.subr.bf16.mxu0 %v7576_v12  ;;  %v7657_v11 = vld [vmem:[#allocation2 + $0x23c] ss:$28 sps:$4 sm:$0xff]   ;;  %v7660_v12 = vld [vmem:[#allocation2 + $0x8c4] ss:$28 sps:$4 sm:$0xff]  }
  0x93   :  { %2470 = vmatprep.mubr.bf16.mxu1 %v8674_v16  ;;  %2479 = vmatprep.subr.bf16.mxu1 %v7579_v13  ;;  %v7655_v13 = vld [vmem:[#allocation2 + $0x238] ss:$28 sps:$4 sm:$0xff]  }
  0x94   :  { %2429 = vmatprep.mubr.bf16.mxu0 %v8772_v36 }
  0x95   :  { %2400 = vmatpush1.bf16.msra.mxu0 %v7574_v14  ;;  %v7658_v14 = vld [vmem:[#allocation2 + $0x8c0] ss:$28 sps:$4 sm:$0xff]  }
  0x96   :  { %2401 = vmatprep.subr.bf16.mxu0 %v7582_v17  ;;  %v108_v17 = vld [vmem:[%s8984_s0 + $0x20] sm:$0xff]  ;;  %s8677_s0 = smov [#allocation13]  }
  0x97   :  { %s6465_s21 = sshll.u32 %s8677_s0, 4  ;;  %s6466_s21 = int_to_ptr.vmem [resolvable:$true] %s6465_s21 }
  0x98   :  { %s8634_s22 = scalar_lea.vmem %s6466_s21, 128  ;;  %p8639_p3 = scmp.lt.s32.totalorder %s6466_s21, %s6466_s21 }
  0x99   :  { %6820 = vmatmul.mubr.msk.bf16.vlgmr.msra.gmra.mxu1 %vm2311_vm0, %v8764_v19  ;;  %2402 = vmatpush1.bf16.msra.mxu0 %v7580_v20  ;;  %v7661_v20 = vld [vmem:[#allocation2 + $0x200] ss:$28 sps:$4 sm:$0xff]   ;;  %p8635_p2 = scmp.ne.s32.totalorder %s6466_s21, %s8634_s22  ;;  %p8640_p4 = scmp.lt.s32.totalorder %s8634_s22, %s8634_s22 }
  0x9a   :  { %2480 = vmatpush1.bf16.msra.mxu1 %v7577_v18  ;;  %2403 = vmatprep.subr.bf16.mxu0 %v7588_v22  ;;  %v7666_v18 = vld [vmem:[#allocation2 + $0x514] ss:$28 sps:$4 sm:$0xff]  }
  0x9b   :  { %2481 = vmatprep.subr.bf16.mxu1 %v7585_v21  ;;  %2511 = vmatprep.mubr.bf16.mxu1 %v8739_v49  ;;  %v8778_v21 = vpack.c.bf16 %v108_v17, %v108_v17  ;;  %v7664_v22 = vld [vmem:[#allocation2 + $0x510] ss:$28 sps:$4 sm:$0xff]   ;;  %p8641_p5 = por %p8640_p4, %p8639_p3 }
  0x9c   :  { %v7747_v17 = vld [vmem:[#allocation2 + $0x974] ss:$28 sps:$4 sm:$0xff]  }
  0x9d   :  { %2404 = vmatpush1.bf16.msra.mxu0 %v7586_v24  ;;  %v7672_v24 = vld [vmem:[#allocation2 + $0x4dc] ss:$28 sps:$4 sm:$0xff]   ;;  %p8642_p6 = pnand %p8641_p5, %p8635_p2 }
  0x9e   :  { %2482 = vmatpush1.bf16.msra.mxu1 %v7583_v23  ;;  %2405 = vmatprep.subr.bf16.mxu0 %v7594_v26  ;;  %v7669_v23 = vld [vmem:[#allocation2 + $0x1cc] ss:$28 sps:$4 sm:$0xff]   ;;  %v7670_v26 = vld [vmem:[#allocation2 + $0x4d8] ss:$28 sps:$4 sm:$0xff]  }
  0x9f   :  { %2483 = vmatprep.subr.bf16.mxu1 %v7591_v25  ;;  %v7667_v25 = vld [vmem:[#allocation2 + $0x1c8] ss:$28 sps:$4 sm:$0xff]  }
  0xa1   :  { %2406 = vmatpush1.bf16.msra.mxu0 %v7592_v28  ;;  %v7678_v28 = vld [vmem:[#allocation2 + $0x4a4] ss:$28 sps:$4 sm:$0xff]  }
  0xa2   :  { %2484 = vmatpush1.bf16.msra.mxu1 %v7589_v27  ;;  %2407 = vmatprep.subr.bf16.mxu0 %v7600_v30  ;;  %v7675_v27 = vld [vmem:[#allocation2 + $0x894] ss:$28 sps:$4 sm:$0xff]   ;;  %v7676_v30 = vld [vmem:[#allocation2 + $0x4a0] ss:$28 sps:$4 sm:$0xff]  }
  0xa3   :  { %2485 = vmatprep.subr.bf16.mxu1 %v7597_v29  ;;  %v7673_v29 = vld [vmem:[#allocation2 + $0x890] ss:$28 sps:$4 sm:$0xff]  }
  0xa5   :  { %2408 = vmatpush1.bf16.msra.mxu0 %v7598_v32  ;;  %v7684_v32 = vld [vmem:[#allocation2 + $0x46c] ss:$28 sps:$4 sm:$0xff]  }
  0xa6   :  { %2486 = vmatpush1.bf16.msra.mxu1 %v7595_v31  ;;  %2409 = vmatprep.subr.bf16.mxu0 %v7606_v34  ;;  %v7681_v31 = vld [vmem:[#allocation2 + $0x85c] ss:$28 sps:$4 sm:$0xff]   ;;  %v7682_v34 = vld [vmem:[#allocation2 + $0x468] ss:$28 sps:$4 sm:$0xff]  }
  0xa7   :  { %2487 = vmatprep.subr.bf16.mxu1 %v7603_v33  ;;  %v7679_v33 = vld [vmem:[#allocation2 + $0x858] ss:$28 sps:$4 sm:$0xff]  }
  0xa9   :  { %2410 = vmatpush1.bf16.msra.mxu0 %v7604_v38  ;;  %v7685_v38 = vld [vmem:[#allocation2 + $0x820] ss:$28 sps:$4 sm:$0xff]  }
  0xaa   :  { %2488 = vmatpush1.bf16.msra.mxu1 %v7601_v37  ;;  %2411 = vmatprep.subr.bf16.mxu0 %v7612_v40  ;;  %v7690_v37 = vld [vmem:[#allocation2 + $0x434] ss:$28 sps:$4 sm:$0xff]   ;;  %v7693_v40 = vld [vmem:[#allocation2 + $0x7ec] ss:$28 sps:$4 sm:$0xff]  }
  0xab   :  { %2489 = vmatprep.subr.bf16.mxu1 %v7609_v39  ;;  %v7688_v39 = vld [vmem:[#allocation2 + $0x430] ss:$28 sps:$4 sm:$0xff]  }
  0xad   :  { %2412 = vmatpush1.bf16.msra.mxu0 %v7610_v42  ;;  %v7691_v42 = vld [vmem:[#allocation2 + $0x7e8] ss:$28 sps:$4 sm:$0xff]  }
  0xae   :  { %2490 = vmatpush1.bf16.msra.mxu1 %v7607_v41  ;;  %2413 = vmatprep.subr.bf16.mxu0 %v7618_v44  ;;  %v7696_v41 = vld [vmem:[#allocation2 + $0x3fc] ss:$28 sps:$4 sm:$0xff]   ;;  %v7699_v44 = vld [vmem:[#allocation2 + $0x7b4] ss:$28 sps:$4 sm:$0xff]  }
  0xaf   :  { %2491 = vmatprep.subr.bf16.mxu1 %v7615_v43  ;;  %v7694_v43 = vld [vmem:[#allocation2 + $0x3f8] ss:$28 sps:$4 sm:$0xff]  }
  0xb1   :  { %2414 = vmatpush2.bf16.msra.mxu0 %v7616_v46  ;;  %v7697_v46 = vld [vmem:[#allocation2 + $0x7b0] ss:$28 sps:$4 sm:$0xff]  }
  0xb2   :  { %2492 = vmatpush1.bf16.msra.mxu1 %v7613_v45  ;;  %2415 = vmatprep.subr.bf16.mxu0 %v7624_v48  ;;  %v7702_v45 = vld [vmem:[#allocation2 + $0x3c4] ss:$28 sps:$4 sm:$0xff]   ;;  %v7705_v48 = vld [vmem:[#allocation2 + $0x77c] ss:$28 sps:$4 sm:$0xff]  }
  0xb3   :  { %2493 = vmatprep.subr.bf16.mxu1 %v7621_v47  ;;  %v7700_v47 = vld [vmem:[#allocation2 + $0x3c0] ss:$28 sps:$4 sm:$0xff]  }
  0xb5   :  { %2416 = vmatpush2.bf16.msra.mxu0 %v7622_v51  ;;  %v7703_v51 = vld [vmem:[#allocation2 + $0x778] ss:$28 sps:$4 sm:$0xff]  }
  0xb6   :  { %2494 = vmatpush1.bf16.msra.mxu1 %v7619_v50  ;;  %2417 = vmatprep.subr.bf16.mxu0 %v7630_v54  ;;  %v7708_v50 = vld [vmem:[#allocation2 + $0x38c] ss:$28 sps:$4 sm:$0xff]   ;;  %v7711_v54 = vld [vmem:[#allocation2 + $0x744] ss:$28 sps:$4 sm:$0xff]  }
  0xb7   :  { %2495 = vmatprep.subr.bf16.mxu1 %v7627_v53  ;;  %v7706_v53 = vld [vmem:[#allocation2 + $0x388] ss:$28 sps:$4 sm:$0xff]  }
  0xb9   :  { %2418 = vmatpush2.bf16.msra.mxu0 %v7628_v56  ;;  %v7709_v56 = vld [vmem:[#allocation2 + $0x740] ss:$28 sps:$4 sm:$0xff]  }
  0xba   :  { %2496 = vmatpush2.bf16.msra.mxu1 %v7625_v55  ;;  %2419 = vmatprep.subr.bf16.mxu0 %v7636_v58  ;;  %v7714_v55 = vld [vmem:[#allocation2 + $0x6d4] ss:$28 sps:$4 sm:$0xff]   ;;  %v7717_v58 = vld [vmem:[#allocation2 + $0x70c] ss:$28 sps:$4 sm:$0xff]  }
  0xbb   :  { %2497 = vmatprep.subr.bf16.mxu1 %v7633_v57  ;;  %v7712_v57 = vld [vmem:[#allocation2 + $0x6d0] ss:$28 sps:$4 sm:$0xff]  }
  0xbd   :  { %2420 = vmatpush2.bf16.msra.mxu0 %v7634_v60  ;;  %v7715_v60 = vld [vmem:[#allocation2 + $0x708] ss:$28 sps:$4 sm:$0xff]  }
  0xbe   :  { %2498 = vmatpush2.bf16.msra.mxu1 %v7631_v59  ;;  %2421 = vmatprep.subr.bf16.mxu0 %v7642_v62  ;;  %v7720_v59 = vld [vmem:[#allocation2 + $0x69c] ss:$28 sps:$4 sm:$0xff]   ;;  %v7723_v62 = vld [vmem:[#allocation2 + $0xa54] ss:$28 sps:$4 sm:$0xff]  }
  0xbf   :  { %2499 = vmatprep.subr.bf16.mxu1 %v7639_v61  ;;  %v7718_v61 = vld [vmem:[#allocation2 + $0x698] ss:$28 sps:$4 sm:$0xff]  }
  0xc1   :  { %2422 = vmatpush2.bf16.msra.mxu0 %v7640_v0  ;;  %v7721_v0 = vld [vmem:[#allocation2 + $0xa50] ss:$28 sps:$4 sm:$0xff]  }
  0xc2   :  { %2500 = vmatpush2.bf16.msra.mxu1 %v7637_v63  ;;  %2423 = vmatprep.subr.bf16.mxu0 %v7648_v2  ;;  %v7726_v63 = vld [vmem:[#allocation2 + $0x664] ss:$28 sps:$4 sm:$0xff]   ;;  %v7729_v2 = vld [vmem:[#allocation2 + $0xa1c] ss:$28 sps:$4 sm:$0xff]  }
  0xc3   :  { %2501 = vmatprep.subr.bf16.mxu1 %v7645_v1  ;;  %v7724_v1 = vld [vmem:[#allocation2 + $0x660] ss:$28 sps:$4 sm:$0xff]  }
  0xc5   :  { %2424 = vmatpush2.bf16.msra.mxu0 %v7646_v4  ;;  %v7727_v4 = vld [vmem:[#allocation2 + $0xa18] ss:$28 sps:$4 sm:$0xff]  }
  0xc6   :  { %2502 = vmatpush2.bf16.msra.mxu1 %v7643_v3  ;;  %2425 = vmatprep.subr.bf16.mxu0 %v7654_v6  ;;  %v7732_v3 = vld [vmem:[#allocation2 + $0x62c] ss:$28 sps:$4 sm:$0xff]   ;;  %v7735_v6 = vld [vmem:[#allocation2 + $0x9e4] ss:$28 sps:$4 sm:$0xff]  }
  0xc7   :  { %2503 = vmatprep.subr.bf16.mxu1 %v7651_v5  ;;  %v7730_v5 = vld [vmem:[#allocation2 + $0x628] ss:$28 sps:$4 sm:$0xff]  }
  0xc9   :  { %2426 = vmatpush2.bf16.msra.mxu0 %v7652_v10  ;;  %v7733_v10 = vld [vmem:[#allocation2 + $0x9e0] ss:$28 sps:$4 sm:$0xff]  }
  0xca   :  { %2504 = vmatpush2.bf16.msra.mxu1 %v7649_v7  ;;  %2427 = vmatprep.subr.bf16.mxu0 %v7660_v12  ;;  %v7738_v7 = vld [vmem:[#allocation2 + $0x5f4] ss:$28 sps:$4 sm:$0xff]   ;;  %v7741_v12 = vld [vmem:[#allocation2 + $0x9ac] ss:$28 sps:$4 sm:$0xff]  }
  0xcb   :  { %2505 = vmatprep.subr.bf16.mxu1 %v7657_v11  ;;  %v7736_v11 = vld [vmem:[#allocation2 + $0x5f0] ss:$28 sps:$4 sm:$0xff]  }
  0xcd   :  { %2428 = vmatpush2.bf16.msra.mxu0 %v7658_v14  ;;  %v7739_v14 = vld [vmem:[#allocation2 + $0x9a8] ss:$28 sps:$4 sm:$0xff]  }
  0xce   :  { %2506 = vmatpush2.bf16.msra.mxu1 %v7655_v13  ;;  %2520 = vmatprep.subr.bf16.mxu0 %v7666_v18  ;;  %v7744_v13 = vld [vmem:[#allocation2 + $0x5bc] ss:$28 sps:$4 sm:$0xff]   ;;  %v7750_v18 = vld [vmem:[#allocation2 + $0x584] ss:$28 sps:$4 sm:$0xff]  }
  0xcf   :  { %2507 = vmatprep.subr.bf16.mxu1 %v7663_v15  ;;  %v7742_v15 = vld [vmem:[#allocation2 + $0x5b8] ss:$28 sps:$4 sm:$0xff]  }
  0xd0   :  { %2430 = vmatmul.mubr.bf16.vlgmr.msra.gmra.mxu0 %v8778_v21 }
  0xd1   :  { %2521 = vmatpush1.bf16.msra.mxu0 %v7664_v22  ;;  %2552 = vmatprep.mubr.bf16.mxu0 %v8744_v52  ;;  %v7748_v22 = vld [vmem:[#allocation2 + $0x580] ss:$28 sps:$4 sm:$0xff]  }
  0xd2   :  { %2508 = vmatpush2.bf16.msra.mxu1 %v7661_v20  ;;  %2522 = vmatprep.subr.bf16.mxu0 %v7672_v24  ;;  %v7745_v20 = vld [vmem:[#allocation2 + $0x970] ss:$28 sps:$4 sm:$0xff]  }
  0xd3   :  { %2509 = vmatprep.subr.bf16.mxu1 %v7669_v23  ;;  %v7753_v23 = vld [vmem:[#allocation2 + $0x93c] ss:$28 sps:$4 sm:$0xff]   ;;  %v7756_v24 = vld [vmem:[#allocation2 + $0x54c] ss:$28 sps:$4 sm:$0xff]  }
  0xd5   :  { %2523 = vmatpush1.bf16.msra.mxu0 %v7670_v26  ;;  %v7754_v26 = vld [vmem:[#allocation2 + $0x548] ss:$28 sps:$4 sm:$0xff]  }
  0xd6   :  { %2510 = vmatpush2.bf16.msra.mxu1 %v7667_v25  ;;  %2524 = vmatprep.subr.bf16.mxu0 %v7678_v28  ;;  %v7751_v25 = vld [vmem:[#allocation2 + $0x938] ss:$28 sps:$4 sm:$0xff]  }
  0xd7   :  { %2561 = vmatprep.subr.bf16.mxu1 %v7675_v27  ;;  %v7759_v27 = vld [vmem:[#allocation2 + $0x904] ss:$28 sps:$4 sm:$0xff]   ;;  %v7762_v28 = vld [vmem:[#allocation2 + $0x19c] ss:$28 sps:$4 sm:$0xff]  }
  0xd9   :  { %2512 = vmatmul.mubr.bf16.vlgmr.msra.gmra.mxu1 %v8754_v8  ;;  %2525 = vmatpush1.bf16.msra.mxu0 %v7676_v30  ;;  %v7760_v30 = vld [vmem:[#allocation2 + $0x198] ss:$28 sps:$4 sm:$0xff]  }
  0xda   :  { %2562 = vmatpush1.bf16.msra.mxu1 %v7673_v29  ;;  %2526 = vmatprep.subr.bf16.mxu0 %v7684_v32  ;;  %v7757_v29 = vld [vmem:[#allocation2 + $0x900] ss:$28 sps:$4 sm:$0xff]  }
  0xdb   :  { %2563 = vmatprep.subr.bf16.mxu1 %v7681_v31  ;;  %2593 = vmatprep.mubr.bf16.mxu1 %v8772_v36  ;;  %v7765_v31 = vld [vmem:[#allocation2 + $0x8cc] ss:$28 sps:$4 sm:$0xff]   ;;  %v7768_v32 = vld [vmem:[#allocation2 + $0x164] ss:$28 sps:$4 sm:$0xff]  }
  0xdd   :  { %2527 = vmatpush1.bf16.msra.mxu0 %v7682_v34  ;;  %v7766_v34 = vld [vmem:[#allocation2 + $0x160] ss:$28 sps:$4 sm:$0xff]  }
  0xde   :  { %2564 = vmatpush1.bf16.msra.mxu1 %v7679_v33  ;;  %2528 = vmatprep.subr.bf16.mxu0 %v7690_v37  ;;  %v7763_v33 = vld [vmem:[#allocation2 + $0x8c8] ss:$28 sps:$4 sm:$0xff]  }
  0xdf   :  { %2565 = vmatprep.subr.bf16.mxu1 %v7687_v35  ;;  %v7771_v35 = vld [vmem:[#allocation2 + $0x12c] ss:$28 sps:$4 sm:$0xff]  }
  0xe0   :  { %v7774_v37 = vld [vmem:[#allocation2 + $0xa8c] ss:$28 sps:$4 sm:$0xff]  }
  0xe1   :  { %2529 = vmatpush1.bf16.msra.mxu0 %v7688_v39  ;;  %v7772_v39 = vld [vmem:[#allocation2 + $0xa88] ss:$28 sps:$4 sm:$0xff]  }
  0xe2   :  { %2566 = vmatpush1.bf16.msra.mxu1 %v7685_v38  ;;  %2530 = vmatprep.subr.bf16.mxu0 %v7696_v41  ;;  %v7769_v38 = vld [vmem:[#allocation2 + $0x128] ss:$28 sps:$4 sm:$0xff]   ;;  %v7780_v41 = vld [vmem:[#allocation2 + $0x51c] ss:$28 sps:$4 sm:$0xff]  }
  0xe3   :  { %2567 = vmatprep.subr.bf16.mxu1 %v7693_v40  ;;  %v7777_v40 = vld [vmem:[#allocation2 + $0xf4] ss:$28 sps:$4 sm:$0xff]  }
  0xe5   :  { %2531 = vmatpush1.bf16.msra.mxu0 %v7694_v43  ;;  %v7783_v43 = vld [vmem:[#allocation2 + $0xbc] ss:$28 sps:$4 sm:$0xff]  }
  0xe6   :  { %2568 = vmatpush1.bf16.msra.mxu1 %v7691_v42  ;;  %2532 = vmatprep.subr.bf16.mxu0 %v7702_v45  ;;  %v7775_v42 = vld [vmem:[#allocation2 + $0xf0] ss:$28 sps:$4 sm:$0xff]   ;;  %v7781_v45 = vld [vmem:[#allocation2 + $0xb8] ss:$28 sps:$4 sm:$0xff]  }
  0xe7   :  { %2569 = vmatprep.subr.bf16.mxu1 %v7699_v44  ;;  %v7778_v44 = vld [vmem:[#allocation2 + $0x518] ss:$28 sps:$4 sm:$0xff]  }
  0xe9   :  { %2533 = vmatpush1.bf16.msra.mxu0 %v7700_v47  ;;  %v7789_v47 = vld [vmem:[#allocation2 + $0x84] ss:$28 sps:$4 sm:$0xff]  }
  0xea   :  { %2570 = vmatpush1.bf16.msra.mxu1 %v7697_v46  ;;  %2534 = vmatprep.subr.bf16.mxu0 %v7708_v50  ;;  %v7786_v46 = vld [vmem:[#allocation2 + $0x4e4] ss:$28 sps:$4 sm:$0xff]  }
  0xeb   :  { %2571 = vmatprep.subr.bf16.mxu1 %v7705_v48  ;;  %v7784_v48 = vld [vmem:[#allocation2 + $0x4e0] ss:$28 sps:$4 sm:$0xff]  }
  0xec   :  { %v7787_v50 = vld [vmem:[#allocation2 + $0x80] ss:$28 sps:$4 sm:$0xff]  }
  0xed   :  { %2535 = vmatpush1.bf16.msra.mxu0 %v7706_v53  ;;  %v7795_v53 = vld [vmem:[#allocation2 + $0x4c] ss:$28 sps:$4 sm:$0xff]  }
  0xee   :  { %2572 = vmatpush1.bf16.msra.mxu1 %v7703_v51  ;;  %2536 = vmatprep.subr.bf16.mxu0 %v7714_v55  ;;  %v7792_v51 = vld [vmem:[#allocation2 + $0x4ac] ss:$28 sps:$4 sm:$0xff]  }
  0xef   :  { %2573 = vmatprep.subr.bf16.mxu1 %v7711_v54  ;;  %v7790_v54 = vld [vmem:[#allocation2 + $0x4a8] ss:$28 sps:$4 sm:$0xff]  }
  0xf0   :  { %v7793_v55 = vld [vmem:[#allocation2 + $0x48] ss:$28 sps:$4 sm:$0xff]  }
  0xf1   :  { %2537 = vmatpush2.bf16.msra.mxu0 %v7712_v57  ;;  %v7801_v57 = vld [vmem:[#allocation2 + $0x14] ss:$28 sps:$4 sm:$0xff]  }
  0xf2   :  { %2574 = vmatpush1.bf16.msra.mxu1 %v7709_v56  ;;  %2538 = vmatprep.subr.bf16.mxu0 %v7720_v59  ;;  %v7798_v56 = vld [vmem:[#allocation2 + $0x474] ss:$28 sps:$4 sm:$0xff]  }
  0xf3   :  { %2575 = vmatprep.subr.bf16.mxu1 %v7717_v58  ;;  %v7796_v58 = vld [vmem:[#allocation2 + $0x470] ss:$28 sps:$4 sm:$0xff]  }
  0xf4   :  { %v7799_v59 = vld [vmem:[#allocation2 + $0x10] ss:$28 sps:$4 sm:$0xff]  }
  0xf5   :  { %2539 = vmatpush2.bf16.msra.mxu0 %v7718_v61  ;;  %v7807_v61 = vld [vmem:[#allocation2 + $0x35c] ss:$28 sps:$4 sm:$0xff]  }
  0xf6   :  { %2576 = vmatpush1.bf16.msra.mxu1 %v7715_v60  ;;  %2540 = vmatprep.subr.bf16.mxu0 %v7726_v63  ;;  %v7804_v60 = vld [vmem:[#allocation2 + $0x43c] ss:$28 sps:$4 sm:$0xff]  }
  0xf7   :  { %2577 = vmatprep.subr.bf16.mxu1 %v7723_v62  ;;  %v7802_v62 = vld [vmem:[#allocation2 + $0x438] ss:$28 sps:$4 sm:$0xff]  }
  0xf8   :  { %v7805_v63 = vld [vmem:[#allocation2 + $0x358] ss:$28 sps:$4 sm:$0xff]  }
  0xf9   :  { %2541 = vmatpush2.bf16.msra.mxu0 %v7724_v1  ;;  %v7813_v1 = vld [vmem:[#allocation2 + $0x324] ss:$28 sps:$4 sm:$0xff]  }
  0xfa   :  { %2578 = vmatpush2.bf16.msra.mxu1 %v7721_v0  ;;  %2542 = vmatprep.subr.bf16.mxu0 %v7732_v3  ;;  %v7810_v0 = vld [vmem:[#allocation2 + $0x404] ss:$28 sps:$4 sm:$0xff]  }
  0xfb   :  { %2579 = vmatprep.subr.bf16.mxu1 %v7729_v2  ;;  %v7808_v2 = vld [vmem:[#allocation2 + $0x400] ss:$28 sps:$4 sm:$0xff]  }
  0xfc   :  { %v7811_v3 = vld [vmem:[#allocation2 + $0x320] ss:$28 sps:$4 sm:$0xff]  }
  0xfd   :  { %2543 = vmatpush2.bf16.msra.mxu0 %v7730_v5  ;;  %v7819_v5 = vld [vmem:[#allocation2 + $0x2ec] ss:$28 sps:$4 sm:$0xff]  }
  0xfe   :  { %2580 = vmatpush2.bf16.msra.mxu1 %v7727_v4  ;;  %2544 = vmatprep.subr.bf16.mxu0 %v7738_v7  ;;  %v7816_v4 = vld [vmem:[#allocation2 + $0x3cc] ss:$28 sps:$4 sm:$0xff]  }
  0xff   :  { %2581 = vmatprep.subr.bf16.mxu1 %v7735_v6  ;;  %v7814_v6 = vld [vmem:[#allocation2 + $0x3c8] ss:$28 sps:$4 sm:$0xff]  }
 0x100   :  { %v7817_v7 = vld [vmem:[#allocation2 + $0x2e8] ss:$28 sps:$4 sm:$0xff]  }
 0x101   :  { %2545 = vmatpush2.bf16.msra.mxu0 %v7736_v11  ;;  %v7825_v11 = vld [vmem:[#allocation2 + $0x2b4] ss:$28 sps:$4 sm:$0xff]  }
 0x102   :  { %2582 = vmatpush2.bf16.msra.mxu1 %v7733_v10  ;;  %2546 = vmatprep.subr.bf16.mxu0 %v7744_v13  ;;  %v7822_v10 = vld [vmem:[#allocation2 + $0x394] ss:$28 sps:$4 sm:$0xff]  }
 0x103   :  { %2583 = vmatprep.subr.bf16.mxu1 %v7741_v12  ;;  %v7820_v12 = vld [vmem:[#allocation2 + $0x390] ss:$28 sps:$4 sm:$0xff]  }
 0x104   :  { %v7823_v13 = vld [vmem:[#allocation2 + $0x2b0] ss:$28 sps:$4 sm:$0xff]  }
 0x105   :  { %2547 = vmatpush2.bf16.msra.mxu0 %v7742_v15  ;;  %v7831_v15 = vld [vmem:[#allocation2 + $0x27c] ss:$28 sps:$4 sm:$0xff]  }
 0x106   :  { %2584 = vmatpush2.bf16.msra.mxu1 %v7739_v14  ;;  %2548 = vmatprep.subr.bf16.mxu0 %v7750_v18  ;;  %v7828_v14 = vld [vmem:[#allocation2 + $0x6dc] ss:$28 sps:$4 sm:$0xff]  }
 0x107   :  { %2585 = vmatprep.subr.bf16.mxu1 %v7747_v17  ;;  %v7826_v17 = vld [vmem:[#allocation2 + $0x6d8] ss:$28 sps:$4 sm:$0xff]  }
 0x108   :  { %v7829_v18 = vld [vmem:[#allocation2 + $0x278] ss:$28 sps:$4 sm:$0xff]  }
 0x109   :  { %2549 = vmatpush2.bf16.msra.mxu0 %v7748_v22  ;;  %v7837_v22 = vld [vmem:[#allocation2 + $0x244] ss:$28 sps:$4 sm:$0xff]  }
 0x10a   :  { %2586 = vmatpush2.bf16.msra.mxu1 %v7745_v20  ;;  %2550 = vmatprep.subr.bf16.mxu0 %v7756_v24  ;;  %v7834_v20 = vld [vmem:[#allocation2 + $0x6a4] ss:$28 sps:$4 sm:$0xff]  }
 0x10b   :  { %2587 = vmatprep.subr.bf16.mxu1 %v7753_v23  ;;  %v7832_v23 = vld [vmem:[#allocation2 + $0x6a0] ss:$28 sps:$4 sm:$0xff]  }
 0x10c   :  { %v7835_v24 = vld [vmem:[#allocation2 + $0x240] ss:$28 sps:$4 sm:$0xff]  }
 0x10d   :  { %2551 = vmatpush2.bf16.msra.mxu0 %v7754_v26  ;;  %v7840_v26 = vld [vmem:[#allocation2 + $0x66c] ss:$28 sps:$4 sm:$0xff]  }
 0x10e   :  { %2588 = vmatpush2.bf16.msra.mxu1 %v7751_v25  ;;  %2643 = vmatprep.subr.bf16.mxu0 %v7762_v28  ;;  %v512_v25 = vlaneseq  ;;  %v7838_v28 = vld [vmem:[#allocation2 + $0x668] ss:$28 sps:$4 sm:$0xff]  }
 0x10f   :  { %2589 = vmatprep.subr.bf16.mxu1 %v7759_v27  ;;  %v7843_v27 = vld [vmem:[#allocation2 + $0x20c] ss:$28 sps:$4 sm:$0xff]  }
 0x110   :  { %2553 = vmatmul.mubr.bf16.vlgmr.msra.gmra.mxu0 %v8756_v9 }
 0x111   :  { %2644 = vmatpush1.bf16.msra.mxu0 %v7760_v30  ;;  %2675 = vmatprep.mubr.bf16.mxu0 %v8739_v49  ;;  %v8791_v30 = vshrl.u32 %v512_v25, 7  ;;  %v7885_v25 = vld [vmem:[#allocation2 + $0x748] ss:$28 sps:$4 sm:$0xff]  }
 0x112   :  { %2590 = vmatpush2.bf16.msra.mxu1 %v7757_v29  ;;  %2645 = vmatprep.subr.bf16.mxu0 %v7768_v32  ;;  %v7841_v29 = vld [vmem:[#allocation2 + $0x208] ss:$28 sps:$4 sm:$0xff]   ;;  %v7849_v32 = vld [vmem:[#allocation2 + $0x1d4] ss:$28 sps:$4 sm:$0xff]  }
 0x113   :  { %2591 = vmatprep.subr.bf16.mxu1 %v7765_v31  ;;  %v7846_v31 = vld [vmem:[#allocation2 + $0x634] ss:$28 sps:$4 sm:$0xff]  }
 0x115   :  { %2646 = vmatpush1.bf16.msra.mxu0 %v7766_v34  ;;  %v7847_v34 = vld [vmem:[#allocation2 + $0x1d0] ss:$28 sps:$4 sm:$0xff]  }
 0x116   :  { %2592 = vmatpush2.bf16.msra.mxu1 %v7763_v33  ;;  %2647 = vmatprep.subr.bf16.mxu0 %v7771_v35  ;;  %v7844_v33 = vld [vmem:[#allocation2 + $0x630] ss:$28 sps:$4 sm:$0xff]   ;;  %v7852_v35 = vld [vmem:[#allocation2 + $0x5fc] ss:$28 sps:$4 sm:$0xff]  }
 0x117   :  { %2616 = vmatprep.subr.bf16.mxu1 %v7774_v37  ;;  %v510_v37 = vld [vmem:[#allocation5] sm:$0x7f] }
 0x119   :  { %2594 = vmatmul.mubr.bf16.vlgmr.msra.gmra.mxu1 %v8778_v21  ;;  %2648 = vmatpush1.bf16.msra.mxu0 %v7769_v38  ;;  %v514_v38 = vsub.s32 0, %v8791_v30 }
 0x11a   :  { %2617 = vmatpush1.bf16.msra.mxu1 %v7772_v39  ;;  %2649 = vmatprep.subr.bf16.mxu0 %v7777_v40  ;;  %v7855_v39 = vld [vmem:[#allocation2 + $0x89c] ss:$28 sps:$4 sm:$0xff]   ;;  %v518_v40 = vsub.s32 1, %v8791_v30 }
 0x11b   :  { %2634 = vmatprep.mubr.bf16.mxu1 %v8674_v16  ;;  %2684 = vmatprep.subr.bf16.mxu1 %v7780_v41  ;;  %v7850_v41 = vld [vmem:[#allocation2 + $0x5f8] ss:$28 sps:$4 sm:$0xff]  }
 0x11d   :  { %2650 = vmatpush1.bf16.msra.mxu0 %v7775_v42  ;;  %v7853_v42 = vld [vmem:[#allocation2 + $0x898] ss:$28 sps:$4 sm:$0xff]  }
 0x11e   :  { %2651 = vmatprep.subr.bf16.mxu0 %v7783_v43  ;;  %v515_v43 = vrot.slane %v510_v37, %v514_v38 }
 0x121   :  { %6821 = vmatmul.mubr.msk.bf16.vlgmr.msra.gmra.mxu1 %vm2311_vm0, %v8764_v19  ;;  %2652 = vmatpush1.bf16.msra.mxu0 %v7781_v45  ;;  %v7861_v45 = vld [vmem:[#allocation2 + $0x864] ss:$28 sps:$4 sm:$0xff]  }
 0x122   :  { %2685 = vmatpush1.bf16.msra.mxu1 %v7778_v44  ;;  %2653 = vmatprep.subr.bf16.mxu0 %v7789_v47  ;;  %v7858_v44 = vld [vmem:[#allocation2 + $0x5c4] ss:$28 sps:$4 sm:$0xff]  }
 0x123   :  { %2686 = vmatprep.subr.bf16.mxu1 %v7786_v46  ;;  %2716 = vmatprep.mubr.bf16.mxu1 %v8744_v52  ;;  %v519_v46 = vrot.slane %v510_v37, %v518_v40  ;;  %v7902_v37 = vld [vmem:[#allocation2 + $0xa24] ss:$28 sps:$4 sm:$0xff]  }
 0x125   :  { %2654 = vmatpush1.bf16.msra.mxu0 %v7787_v50  ;;  %v7856_v50 = vld [vmem:[#allocation2 + $0x5c0] ss:$28 sps:$4 sm:$0xff]  }
 0x126   :  { %2687 = vmatpush1.bf16.msra.mxu1 %v7784_v48  ;;  %2655 = vmatprep.subr.bf16.mxu0 %v7795_v53 }
 0x127   :  { %2688 = vmatprep.subr.bf16.mxu1 %v7792_v51  ;;  %v7859_v51 = vld [vmem:[#allocation2 + $0x860] ss:$28 sps:$4 sm:$0xff]  }
 0x129   :  { %2656 = vmatpush1.bf16.msra.mxu0 %v7793_v55 }
 0x12a   :  { %2689 = vmatpush1.bf16.msra.mxu1 %v7790_v54  ;;  %2657 = vmatprep.subr.bf16.mxu0 %v7801_v57  ;;  %v7864_v54 = vld [vmem:[#allocation2 + $0x58c] ss:$28 sps:$4 sm:$0xff]  }
 0x12b   :  { %2690 = vmatprep.subr.bf16.mxu1 %v7798_v56  ;;  %v7867_v57 = vld [vmem:[#allocation2 + $0x82c] ss:$28 sps:$4 sm:$0xff]  }
 0x12d   :  { %2658 = vmatpush1.bf16.msra.mxu0 %v7799_v59 }
 0x12e   :  { %2691 = vmatpush1.bf16.msra.mxu1 %v7796_v58  ;;  %2659 = vmatprep.subr.bf16.mxu0 %v7807_v61  ;;  %v7862_v61 = vld [vmem:[#allocation2 + $0x588] ss:$28 sps:$4 sm:$0xff]  }
 0x12f   :  { %2692 = vmatprep.subr.bf16.mxu1 %v7804_v60 }
 0x131   :  { %2660 = vmatpush2.bf16.msra.mxu0 %v7805_v63  ;;  %v7865_v63 = vld [vmem:[#allocation2 + $0x828] ss:$28 sps:$4 sm:$0xff]  }
 0x132   :  { %2693 = vmatpush1.bf16.msra.mxu1 %v7802_v62  ;;  %2661 = vmatprep.subr.bf16.mxu0 %v7813_v1  ;;  %v7870_v1 = vld [vmem:[#allocation2 + $0x554] ss:$28 sps:$4 sm:$0xff]  }
 0x133   :  { %2694 = vmatprep.subr.bf16.mxu1 %v7810_v0 }
 0x135   :  { %2662 = vmatpush2.bf16.msra.mxu0 %v7811_v3 }
 0x136   :  { %2695 = vmatpush1.bf16.msra.mxu1 %v7808_v2  ;;  %2663 = vmatprep.subr.bf16.mxu0 %v7819_v5  ;;  %v7868_v5 = vld [vmem:[#allocation2 + $0x550] ss:$28 sps:$4 sm:$0xff]  }
 0x137   :  { %2696 = vmatprep.subr.bf16.mxu1 %v7816_v4  ;;  %v7873_v4 = vld [vmem:[#allocation2 + $0x7f4] ss:$28 sps:$4 sm:$0xff]  }
 0x139   :  { %2664 = vmatpush2.bf16.msra.mxu0 %v7817_v7  ;;  %v7871_v7 = vld [vmem:[#allocation2 + $0x7f0] ss:$28 sps:$4 sm:$0xff]  }
 0x13a   :  { %2697 = vmatpush1.bf16.msra.mxu1 %v7814_v6  ;;  %2665 = vmatprep.subr.bf16.mxu0 %v7825_v11 }
 0x13b   :  { %2698 = vmatprep.subr.bf16.mxu1 %v7822_v10  ;;  %v7876_v10 = vld [vmem:[#allocation2 + $0x7bc] ss:$28 sps:$4 sm:$0xff]  }
 0x13d   :  { %2666 = vmatpush2.bf16.msra.mxu0 %v7823_v13 }
 0x13e   :  { %2699 = vmatpush1.bf16.msra.mxu1 %v7820_v12  ;;  %2667 = vmatprep.subr.bf16.mxu0 %v7831_v15  ;;  %v7879_v12 = vld [vmem:[#allocation2 + $0xa94] ss:$28 sps:$4 sm:$0xff]  }
 0x13f   :  { %2700 = vmatprep.subr.bf16.mxu1 %v7828_v14  ;;  %v7874_v14 = vld [vmem:[#allocation2 + $0x7b8] ss:$28 sps:$4 sm:$0xff]   ;;  %v7877_v15 = vld [vmem:[#allocation2 + $0xa90] ss:$28 sps:$4 sm:$0xff]  }
 0x141   :  { %2668 = vmatpush2.bf16.msra.mxu0 %v7829_v18  ;;  %v7882_v18 = vld [vmem:[#allocation2 + $0x784] ss:$28 sps:$4 sm:$0xff]  }
 0x142   :  { %2701 = vmatpush2.bf16.msra.mxu1 %v7826_v17  ;;  %2669 = vmatprep.subr.bf16.mxu0 %v7837_v22  ;;  %v7880_v22 = vld [vmem:[#allocation2 + $0x780] ss:$28 sps:$4 sm:$0xff]  }
 0x143   :  { %2702 = vmatprep.subr.bf16.mxu1 %v7834_v20  ;;  %v7883_v20 = vld [vmem:[#allocation2 + $0x360] ss:$28 sps:$4 sm:$0xff]  }
 0x145   :  { %2670 = vmatpush2.bf16.msra.mxu0 %v7835_v24  ;;  %v7884_v24 = vld [vmem:[#allocation2 + $0x1a0] ss:$28 sps:$4 sm:$0xff]  }
 0x146   :  { %2703 = vmatpush2.bf16.msra.mxu1 %v7832_v23  ;;  %2671 = vmatprep.subr.bf16.mxu0 %v7843_v27  ;;  %v7887_v23 = vld [vmem:[#allocation2 + $0x74c] ss:$28 sps:$4 sm:$0xff]   ;;  %v7892_v27 = vld [vmem:[#allocation2 + $0x714] ss:$28 sps:$4 sm:$0xff]  }
 0x147   :  { %2704 = vmatprep.subr.bf16.mxu1 %v7840_v26  ;;  %v7888_v26 = vld [vmem:[#allocation2 + $0x328] ss:$28 sps:$4 sm:$0xff]  }
 0x149   :  { %2672 = vmatpush2.bf16.msra.mxu0 %v7841_v29  ;;  %v7890_v29 = vld [vmem:[#allocation2 + $0x710] ss:$28 sps:$4 sm:$0xff]  }
 0x14a   :  { %2705 = vmatpush2.bf16.msra.mxu1 %v7838_v28  ;;  %2673 = vmatprep.subr.bf16.mxu0 %v7849_v32  ;;  %v7889_v28 = vld [vmem:[#allocation2 + $0x168] ss:$28 sps:$4 sm:$0xff]   ;;  %v7897_v32 = vld [vmem:[#allocation2 + $0xa5c] ss:$28 sps:$4 sm:$0xff]  }
 0x14b   :  { %2706 = vmatprep.subr.bf16.mxu1 %v7846_v31  ;;  %v7893_v31 = vld [vmem:[#allocation2 + $0x2f0] ss:$28 sps:$4 sm:$0xff]  }
 0x14d   :  { %2674 = vmatpush2.bf16.msra.mxu0 %v7847_v34  ;;  %v7895_v34 = vld [vmem:[#allocation2 + $0xa58] ss:$28 sps:$4 sm:$0xff]  }
 0x14e   :  { %2707 = vmatpush2.bf16.msra.mxu1 %v7844_v33  ;;  %2725 = vmatprep.subr.bf16.mxu0 %v7855_v39  ;;  %v7894_v33 = vld [vmem:[#allocation2 + $0x130] ss:$28 sps:$4 sm:$0xff]   ;;  %v7899_v39 = vld [vmem:[#allocation2 + $0xf8] ss:$28 sps:$4 sm:$0xff]  }
 0x14f   :  { %2708 = vmatprep.subr.bf16.mxu1 %v7852_v35  ;;  %v7898_v35 = vld [vmem:[#allocation2 + $0x2b8] ss:$28 sps:$4 sm:$0xff]  }
 0x150   :  { %v2349_v47 = vpop.f32.mrf.mxu0  ;;  %2676 = vmatmul.mubr.bf16.vlgmr.msra.gmra.mxu0 %v8754_v8 }
 0x151   :  { %v2390_v48 = vpop.f32.mrf.mxu1  ;;  %v2350_v53 = vadd.f32 %v2349_v47, %v515_v43  ;;  %2726 = vmatpush1.bf16.msra.mxu0 %v7853_v42  ;;  %2757 = vmatprep.mubr.bf16.mxu0 %v8772_v36  ;;  %v7903_v42 = vld [vmem:[#allocation2 + $0x280] ss:$28 sps:$4 sm:$0xff]   ;;  %v7907_v43 = vld [vmem:[#allocation2 + $0x9ec] ss:$28 sps:$4 sm:$0xff]  }
 0x152   :  { %2709 = vmatpush2.bf16.msra.mxu1 %v7850_v41  ;;  %v2351_v55 = vpop.f32.mrf.mxu0  ;;  %2727 = vmatprep.subr.bf16.mxu0 %v7861_v45  ;;  %v7900_v41 = vld [vmem:[#allocation2 + $0xa20] ss:$28 sps:$4 sm:$0xff]   ;;  %v7905_v45 = vld [vmem:[#allocation2 + $0x9e8] ss:$28 sps:$4 sm:$0xff]  }
 0x153   :  { %2710 = vmatprep.subr.bf16.mxu1 %v7858_v44  ;;  %v2392_v56 = vpop.f32.mrf.mxu1  ;;  %v2352_v58 = vadd.f32 %v2351_v55, %v519_v46  ;;  %v8800_v59 = vadd.f32 %v2390_v48, %v2350_v53  ;;  %v7904_v44 = vld [vmem:[#allocation2 + $0xc0] ss:$28 sps:$4 sm:$0xff]   ;;  %v7908_v46 = vld [vmem:[#allocation2 + $0x248] ss:$28 sps:$4 sm:$0xff]   ;;  %v7910_v48 = vld [vmem:[#allocation2 + $0x9b0] ss:$28 sps:$4 sm:$0xff]  }
 0x154   :  { %v2353_v60 = vpop.f32.mrf.mxu0  ;;  %v7909_v47 = vld [vmem:[#allocation2 + $0x88] ss:$28 sps:$4 sm:$0xff]   ;;  %v7914_v53 = vld [vmem:[#allocation2 + $0x50] ss:$28 sps:$4 sm:$0xff]   ;;  %v7918_v55 = vld [vmem:[#allocation2 + $0x1d8] ss:$28 sps:$4 sm:$0xff]  }
 0x155   :  { %v2394_v62 = vpop.f32.mrf.mxu1  ;;  %v8803_v0 = vadd.f32 %v2392_v56, %v2352_v58  ;;  %2728 = vmatpush1.bf16.msra.mxu0 %v7859_v51  ;;  %v7917_v51 = vld [vmem:[#allocation2 + $0x97c] ss:$28 sps:$4 sm:$0xff]   ;;  %v7922_v56 = vld [vmem:[#allocation2 + $0x944] ss:$28 sps:$4 sm:$0xff]  }
 0x156   :  { %2711 = vmatpush2.bf16.msra.mxu1 %v7856_v50  ;;  %v2354_v2 = vpop.f32.mrf.mxu0  ;;  %2729 = vmatprep.subr.bf16.mxu0 %v7867_v57  ;;  %v7913_v50 = vld [vmem:[#allocation2 + $0x210] ss:$28 sps:$4 sm:$0xff]   ;;  %v7919_v57 = vld [vmem:[#allocation2 + $0x18] ss:$28 sps:$4 sm:$0xff]   ;;  %v7920_v58 = vld [vmem:[#allocation2 + $0x940] ss:$28 sps:$4 sm:$0xff]  }
 0x157   :  { %2712 = vmatprep.subr.bf16.mxu1 %v7864_v54  ;;  %v2395_v3 = vpop.f32.mrf.mxu1  ;;  %v7915_v54 = vld [vmem:[#allocation2 + $0x978] ss:$28 sps:$4 sm:$0xff]   ;;  %v7923_v60 = vld [vmem:[#allocation2 + $0x6e0] ss:$28 sps:$4 sm:$0xff]  }
 0x158   :  { %v7924_v62 = vld [vmem:[#allocation2 + $0x520] ss:$28 sps:$4 sm:$0xff]   ;;  %v7932_v2 = vld [vmem:[#allocation2 + $0x8d4] ss:$28 sps:$4 sm:$0xff]   ;;  %v7929_v3 = vld [vmem:[#allocation2 + $0x4e8] ss:$28 sps:$4 sm:$0xff]  }
 0x159   :  { %v8805_v6 = vpop.f32.mrf.mxu1  ;;  %2730 = vmatpush1.bf16.msra.mxu0 %v7865_v63  ;;  %v7925_v63 = vld [vmem:[#allocation2 + $0x908] ss:$28 sps:$4 sm:$0xff]  }
 0x15a   :  { %2713 = vmatpush2.bf16.msra.mxu1 %v7862_v61  ;;  %2731 = vmatprep.subr.bf16.mxu0 %v7873_v4  ;;  %v7927_v61 = vld [vmem:[#allocation2 + $0x90c] ss:$28 sps:$4 sm:$0xff]  }
 0x15b   :  { %2714 = vmatprep.subr.bf16.mxu1 %v7870_v1  ;;  %v8807_v11 = vpop.f32.mrf.mxu1  ;;  %v7928_v1 = vld [vmem:[#allocation2 + $0x6a8] ss:$28 sps:$4 sm:$0xff]   ;;  %v7930_v4 = vld [vmem:[#allocation2 + $0x8d0] ss:$28 sps:$4 sm:$0xff]  }
 0x15d   :  { %v2476_v13 = vpop.f32.mrf.mxu1  ;;  %2732 = vmatpush1.bf16.msra.mxu0 %v7871_v7  ;;  %v7935_v7 = vld [vmem:[#allocation2 + $0xa60] ss:$28 sps:$4 sm:$0xff]  }
 0x15e   :  { %2715 = vmatpush2.bf16.msra.mxu1 %v7868_v5  ;;  %2733 = vmatprep.subr.bf16.mxu0 %v7876_v10  ;;  %v7933_v5 = vld [vmem:[#allocation2 + $0x670] ss:$28 sps:$4 sm:$0xff]   ;;  %v7936_v13 = vld [vmem:[#allocation2 + $0x638] ss:$28 sps:$4 sm:$0xff]  }
 0x15f   :  { %v2477_v17 = vpop.f32.mrf.mxu1  ;;  %2780 = vmatprep.subr.bf16.mxu1 %v7879_v12  ;;  %v7934_v10 = vld [vmem:[#allocation2 + $0x4b0] ss:$28 sps:$4 sm:$0xff]   ;;  %v7937_v12 = vld [vmem:[#allocation2 + $0x8a0] ss:$28 sps:$4 sm:$0xff]  }
 0x160   :  { %v7941_v17 = vld [vmem:[#allocation2 + $0x868] ss:$28 sps:$4 sm:$0xff]  }
 0x161   :  { %2717 = vmatmul.mubr.bf16.vlgmr.msra.gmra.mxu1 %v8756_v9  ;;  %2734 = vmatpush1.bf16.msra.mxu0 %v7874_v14  ;;  %v7939_v14 = vld [vmem:[#allocation2 + $0xa28] ss:$28 sps:$4 sm:$0xff]  }
 0x162   :  { %2781 = vmatpush1.bf16.msra.mxu1 %v7877_v15  ;;  %2735 = vmatprep.subr.bf16.mxu0 %v7882_v18  ;;  %v7938_v15 = vld [vmem:[#allocation2 + $0x478] ss:$28 sps:$4 sm:$0xff]  }
 0x163   :  { %2798 = vmatprep.mubr.bf16.mxu1 %v8674_v16  ;;  %7230 = vmatprep.subr.bf16.mxu1 %v7883_v20  ;;  %v7943_v20 = vld [vmem:[#allocation2 + $0x9f0] ss:$28 sps:$4 sm:$0xff]  }
 0x165   :  { %2736 = vmatpush1.bf16.msra.mxu0 %v7880_v22 }
 0x166   :  { %2737 = vmatprep.subr.bf16.mxu0 %v7887_v23 }
 0x169   :  { %6822 = vmatmul.mubr.msk.bf16.vlgmr.msra.gmra.mxu1 %vm2311_vm0, %v8764_v19  ;;  %2738 = vmatpush1.bf16.msra.mxu0 %v7885_v25  ;;  %v7942_v25 = vld [vmem:[#allocation2 + $0x440] ss:$28 sps:$4 sm:$0xff]  }
 0x16a   :  { %7231 = vmatpush3.bf16.msra.mxu1 %v7884_v24  ;;  %2739 = vmatprep.subr.bf16.mxu0 %v7892_v27 }
 0x16b   :  { %7232 = vmatprep.subr.bf16.mxu1 %v7888_v26  ;;  %2839 = vmatprep.mubr.bf16.mxu1 %v8739_v49  ;;  %v7912_v49 = vld [vmem:[#allocation2 + $0x9b4] ss:$28 sps:$4 sm:$0xff]  }
 0x16c   :  { %v7945_v26 = vld [vmem:[#allocation2 + $0x830] ss:$28 sps:$4 sm:$0xff]  }
 0x16d   :  { %2740 = vmatpush1.bf16.msra.mxu0 %v7890_v29  ;;  %v7944_v29 = vld [vmem:[#allocation2 + $0x5c8] ss:$28 sps:$4 sm:$0xff]  }
 0x16e   :  { %7233 = vmatpush3.bf16.msra.mxu1 %v7889_v28  ;;  %2741 = vmatprep.subr.bf16.mxu0 %v7897_v32  ;;  %v7946_v32 = vld [vmem:[#allocation2 + $0x408] ss:$28 sps:$4 sm:$0xff]  }
 0x16f   :  { %7234 = vmatprep.subr.bf16.mxu1 %v7893_v31  ;;  %v7947_v31 = vld [vmem:[#allocation2 + $0x9b8] ss:$28 sps:$4 sm:$0xff]  }
 0x171   :  { %2742 = vmatpush2.bf16.msra.mxu0 %v7895_v34  ;;  %v7948_v34 = vld [vmem:[#allocation2 + $0x590] ss:$28 sps:$4 sm:$0xff]  }
 0x172   :  { %7235 = vmatpush3.bf16.msra.mxu1 %v7894_v33  ;;  %2743 = vmatprep.subr.bf16.mxu0 %v7902_v37  ;;  %v7949_v33 = vld [vmem:[#allocation2 + $0x7f8] ss:$28 sps:$4 sm:$0xff]  }
 0x173   :  { %7236 = vmatprep.subr.bf16.mxu1 %v7898_v35  ;;  %v7953_v35 = vld [vmem:[#allocation2 + $0x7c0] ss:$28 sps:$4 sm:$0xff]  }
 0x175   :  { %2744 = vmatpush2.bf16.msra.mxu0 %v7900_v41  ;;  %v7955_v41 = vld [vmem:[#allocation2 + $0x948] ss:$28 sps:$4 sm:$0xff]  }
 0x176   :  { %7237 = vmatpush3.bf16.msra.mxu1 %v7899_v39  ;;  %2745 = vmatprep.subr.bf16.mxu0 %v7907_v43  ;;  %v7952_v39 = vld [vmem:[#allocation2 + $0x558] ss:$28 sps:$4 sm:$0xff]  }
 0x177   :  { %7238 = vmatprep.subr.bf16.mxu1 %v7903_v42  ;;  %v7954_v43 = vld [vmem:[#allocation2 + $0x398] ss:$28 sps:$4 sm:$0xff]  }
 0x179   :  { %2746 = vmatpush2.bf16.msra.mxu0 %v7905_v45  ;;  %v7957_v45 = vld [vmem:[#allocation2 + $0x910] ss:$28 sps:$4 sm:$0xff]  }
 0x17a   :  { %7239 = vmatpush3.bf16.msra.mxu1 %v7904_v44  ;;  %2747 = vmatprep.subr.bf16.mxu0 %v7912_v49  ;;  %v7956_v44 = vld [vmem:[#allocation2 + $0x788] ss:$28 sps:$4 sm:$0xff]   ;;  %v7959_v49 = vld [vmem:[#allocation2 + $0xa98] ss:$28 sps:$4 sm:$0xff]  }
 0x17b   :  { %7240 = vmatprep.subr.bf16.mxu1 %v7908_v46  ;;  %v7958_v46 = vld [vmem:[#allocation2 + $0x750] ss:$28 sps:$4 sm:$0xff]  }
 0x17d   :  { %2748 = vmatpush2.bf16.msra.mxu0 %v7910_v48  ;;  %v7960_v48 = vld [vmem:[#allocation2 + $0x8d8] ss:$28 sps:$4 sm:$0xff]  }
 0x17e   :  { %7241 = vmatpush3.bf16.msra.mxu1 %v7909_v47  ;;  %2749 = vmatprep.subr.bf16.mxu0 %v7917_v51  ;;  %v8675_v47 = vmov 0.0   ;;  %v7964_v51 = vld [vmem:[#allocation2 + $0x718] ss:$28 sps:$4 sm:$0xff]  }
 0x17f   :  { %7242 = vmatprep.subr.bf16.mxu1 %v7913_v50  ;;  %v7963_v50 = vld [vmem:[#allocation7 + $0x18c] ss:$28 sps:$4 sm:$0xff]  }
 0x181   :  { %2750 = vmatpush2.bf16.msra.mxu0 %v7915_v54 }
 0x182   :  { %7243 = vmatpush3.bf16.msra.mxu1 %v7914_v53  ;;  %2751 = vmatprep.subr.bf16.mxu0 %v7922_v56  ;;  %v7970_v53 = vld [vmem:[#allocation7 + $0x50c] ss:$28 sps:$4 sm:$0xff]   ;;  %v7967_v56 = vld [vmem:[#allocation7 + $0x154] ss:$28 sps:$4 sm:$0xff]  }
 0x183   :  { %7244 = vmatprep.subr.bf16.mxu1 %v7918_v55  ;;  %v7961_v55 = vld [vmem:[#allocation7 + $0x188] ss:$28 sps:$4 sm:$0xff]  }
 0x185   :  { %2752 = vmatpush2.bf16.msra.mxu0 %v7920_v58 }
 0x186   :  { %7245 = vmatpush3.bf16.msra.mxu1 %v7919_v57  ;;  %2753 = vmatprep.subr.bf16.mxu0 %v7927_v61  ;;  %v7968_v57 = vld [vmem:[#allocation7 + $0x508] ss:$28 sps:$4 sm:$0xff]   ;;  %v7973_v61 = vld [vmem:[#allocation7 + $0x11c] ss:$28 sps:$4 sm:$0xff]  }
 0x187   :  { %7252 = vmatprep.subr.bf16.mxu1 %v7923_v60  ;;  %v7976_v60 = vld [vmem:[#allocation7 + $0x4d4] ss:$28 sps:$4 sm:$0xff]  }
 0x189   :  { %2840 = vmatmul.mubr.bf16.vlgmr.msra.gmra.mxu1 %v8754_v8  ;;  %2754 = vmatpush2.bf16.msra.mxu0 %v7925_v63  ;;  %v7940_v8 = vld [vmem:[#allocation2 + $0x600] ss:$28 sps:$4 sm:$0xff]  }
 0x18a   :  { %7253 = vmatpush3.bf16.msra.mxu1 %v7924_v62  ;;  %2755 = vmatprep.subr.bf16.mxu0 %v7932_v2  ;;  %v7974_v62 = vld [vmem:[#allocation7 + $0x4d0] ss:$28 sps:$4 sm:$0xff]   ;;  %v7982_v63 = vld [vmem:[#allocation7 + $0x49c] ss:$28 sps:$4 sm:$0xff]   ;;  %v7979_v2 = vld [vmem:[#allocation7 + $0xe4] ss:$28 sps:$4 sm:$0xff]  }
 0x18b   :  { %7254 = vmatprep.subr.bf16.mxu1 %v7928_v1  ;;  %2879 = vmatprep.mubr.bf16.mxu1 %v8744_v52  ;;  %v7971_v1 = vld [vmem:[#allocation7 + $0x118] ss:$28 sps:$4 sm:$0xff]  }
 0x18d   :  { %2756 = vmatpush2.bf16.msra.mxu0 %v7930_v4  ;;  %v7988_v4 = vld [vmem:[#allocation7 + $0x464] ss:$28 sps:$4 sm:$0xff]  }
 0x18e   :  { %7255 = vmatpush3.bf16.msra.mxu1 %v7929_v3  ;;  %7274 = vmatprep.subr.bf16.mxu0 %v7935_v7  ;;  %v7980_v3 = vld [vmem:[#allocation7 + $0x498] ss:$28 sps:$4 sm:$0xff]   ;;  %v7994_v7 = vld [vmem:[#allocation7 + $0x42c] ss:$28 sps:$4 sm:$0xff]  }
 0x18f   :  { %7256 = vmatprep.subr.bf16.mxu1 %v7933_v5  ;;  %v7986_v5 = vld [vmem:[#allocation7 + $0x460] ss:$28 sps:$4 sm:$0xff]  }
 0x190   :  { %v2431_v18 = vpop.f32.mrf.mxu0  ;;  %2758 = vmatmul.mubr.bf16.vlgmr.msra.gmra.mxu0 %v8778_v21 }
 0x191   :  { %v2432_v22 = vadd.f32 %v2431_v18, %v8800_v59  ;;  %7275 = vmatpush3.bf16.msra.mxu0 %v7937_v12  ;;  %2919 = vmatprep.mubr.bf16.mxu0 %v8772_v36  ;;  %v7991_v12 = vld [vmem:[#allocation7 + $0x74] ss:$28 sps:$4 sm:$0xff]  }
 0x192   :  { %7257 = vmatpush3.bf16.msra.mxu1 %v7934_v10  ;;  %v2433_v23 = vpop.f32.mrf.mxu0  ;;  %7276 = vmatprep.subr.bf16.mxu0 %v7939_v14  ;;  %v7983_v10 = vld [vmem:[#allocation7 + $0xa8] ss:$28 sps:$4 sm:$0xff]   ;;  %v8000_v14 = vld [vmem:[#allocation7 + $0x3f4] ss:$28 sps:$4 sm:$0xff]  }
 0x193   :  { %7258 = vmatprep.subr.bf16.mxu1 %v7936_v13  ;;  %v8819_v52 = vadd.f32 %v8805_v6, %v2432_v22  ;;  %v2434_v24 = vadd.f32 %v2433_v23, %v8803_v0  ;;  %v7951_v0 = vld [vmem:[#allocation2 + $0x980] ss:$28 sps:$4 sm:$0xff]   ;;  %v7992_v13 = vld [vmem:[#allocation7 + $0x428] ss:$28 sps:$4 sm:$0xff]   ;;  %v7998_v18 = vld [vmem:[#allocation7 + $0x3f0] ss:$28 sps:$4 sm:$0xff]  }
 0x194   :  { %v2435_v27 = vpop.f32.mrf.mxu0  ;;  %v8003_v22 = vld [vmem:[#allocation7 + $0x4] ss:$28 sps:$4 sm:$0xff]   ;;  %v8004_v23 = vld [vmem:[#allocation7 + $0x3b8] ss:$28 sps:$4 sm:$0xff]  }
 0x195   :  { %v2475_v28 = vadd.f32 %v8807_v11, %v2434_v24  ;;  %7277 = vmatpush3.bf16.msra.mxu0 %v7941_v17  ;;  %v7950_v11 = vld [vmem:[#allocation2 + $0x3d0] ss:$28 sps:$4 sm:$0xff]   ;;  %v7997_v17 = vld [vmem:[#allocation7 + $0x3c] ss:$28 sps:$4 sm:$0xff]   ;;  %v8012_v24 = vld [vmem:[#allocation7 + $0x384] ss:$28 sps:$4 sm:$0xff]  }
 0x196   :  { %7259 = vmatpush3.bf16.msra.mxu1 %v7938_v15  ;;  %v2436_v59 = vpop.f32.mrf.mxu0  ;;  %7278 = vmatprep.subr.bf16.mxu0 %v7943_v20  ;;  %v7989_v15 = vld [vmem:[#allocation7 + $0x70] ss:$28 sps:$4 sm:$0xff]   ;;  %v7995_v20 = vld [vmem:[#allocation7 + $0x38] ss:$28 sps:$4 sm:$0xff]   ;;  %v8010_v27 = vld [vmem:[#allocation7 + $0x380] ss:$28 sps:$4 sm:$0xff]  }
 0x197   :  { %7260 = vmatprep.subr.bf16.mxu1 %v7940_v8  ;;  %v2968_v54 = vmax.f32 %v2475_v28, 0.0  ;;  %v8006_v8 = vld [vmem:[#allocation7 + $0x3bc] ss:$28 sps:$4 sm:$0xff]   ;;  %v8018_v28 = vld [vmem:[#allocation7 + $0x6cc] ss:$28 sps:$4 sm:$0xff]  }
 0x198   :  { %v8007_v59 = vld [vmem:[#allocation7 + $0x348] ss:$28 sps:$4 sm:$0xff]  }
 0x199   :  { %v8824_v6 = vpop.f32.mrf.mxu1  ;;  %7279 = vmatpush3.bf16.msra.mxu0 %v7945_v26  ;;  %v8832_v58 = vpack.c.bf16 %v2968_v54, %v2968_v54  ;;  %v8009_v26 = vld [vmem:[#allocation7 + $0x34c] ss:$28 sps:$4 sm:$0xff]  }
 0x19a   :  { %7261 = vmatpush3.bf16.msra.mxu1 %v7942_v25  ;;  %7280 = vmatprep.subr.bf16.mxu0 %v7947_v31  ;;  %v8001_v25 = vld [vmem:[#allocation7] ss:$28 sps:$4 sm:$0xff]   ;;  %v8016_v31 = vld [vmem:[#allocation7 + $0x6c8] ss:$28 sps:$4 sm:$0xff]  }
 0x19b   :  { %7262 = vmatprep.subr.bf16.mxu1 %v7944_v29  ;;  %v8826_v36 = vpop.f32.mrf.mxu1  ;;  %v8015_v29 = vld [vmem:[#allocation7 + $0x314] ss:$28 sps:$4 sm:$0xff]   ;;  %v8033_v54 = vld [vmem:[#allocation7 + $0x26c] ss:$28 sps:$4 sm:$0xff]  }
 0x19d   :  { %v2517_v37 = vpop.f32.mrf.mxu1  ;;  %7281 = vmatpush3.bf16.msra.mxu0 %v7949_v33  ;;  %v8013_v33 = vld [vmem:[#allocation7 + $0x310] ss:$28 sps:$4 sm:$0xff]  }
 0x19e   :  { %7263 = vmatpush3.bf16.msra.mxu1 %v7946_v32  ;;  %7282 = vmatprep.subr.bf16.mxu0 %v7951_v0  ;;  %v8024_v32 = vld [vmem:[#allocation7 + $0x694] ss:$28 sps:$4 sm:$0xff]   ;;  %v8021_v0 = vld [vmem:[#allocation7 + $0x2dc] ss:$28 sps:$4 sm:$0xff]   ;;  %v526_v37 = vsub.s32 3, %v8791_v30 }
 0x19f   :  { %7264 = vmatprep.subr.bf16.mxu1 %v7948_v34  ;;  %v2518_v42 = vpop.f32.mrf.mxu1 }
 0x1a0   :  { %v8019_v42 = vld [vmem:[#allocation7 + $0x2d8] ss:$28 sps:$4 sm:$0xff]  }
 0x1a1   :  { %7283 = vmatpush3.bf16.msra.mxu0 %v7953_v35  ;;  %v522_v35 = vsub.s32 2, %v8791_v30 }
 0x1a2   :  { %7265 = vmatpush3.bf16.msra.mxu1 %v7950_v11  ;;  %7284 = vmatprep.subr.bf16.mxu0 %v7955_v41  ;;  %v8022_v11 = vld [vmem:[#allocation7 + $0x690] ss:$28 sps:$4 sm:$0xff]  }
 0x1a3   :  { %7266 = vmatprep.subr.bf16.mxu1 %v7952_v39  ;;  %v8030_v39 = vld [vmem:[#allocation7 + $0x65c] ss:$28 sps:$4 sm:$0xff]  }
 0x1a5   :  { %7285 = vmatpush3.bf16.msra.mxu0 %v7956_v44  ;;  %v8027_v44 = vld [vmem:[#allocation7 + $0x2a4] ss:$28 sps:$4 sm:$0xff]  }
 0x1a6   :  { %7267 = vmatpush3.bf16.msra.mxu1 %v7954_v43  ;;  %7286 = vmatprep.subr.bf16.mxu0 %v7957_v45  ;;  %v8028_v45 = vld [vmem:[#allocation7 + $0x658] ss:$28 sps:$4 sm:$0xff]  }
 0x1a7   :  { %7436 = vmatprep.subr.bf16.mxu1 %v8675_v47 }
 0x1a9   :  { %2880 = vmatmul.mubr.bf16.vlgmr.msra.gmra.mxu1 %v8756_v9  ;;  %7287 = vmatpush3.bf16.msra.mxu0 %v7958_v46  ;;  %v7965_v9 = vld [vmem:[#allocation7 + $0x150] ss:$28 sps:$4 sm:$0xff]  }
 0x1aa   :  { %7437 = vmatpush3.bf16.msra.mxu1 %v7959_v49  ;;  %7288 = vmatprep.subr.bf16.mxu0 %v7960_v48  ;;  %v8036_v49 = vld [vmem:[#allocation7 + $0x624] ss:$28 sps:$4 sm:$0xff]  }
 0x1ab   :  { %7438 = vmatprep.mubr.msk.bf16.mxu1 %vm8676_vm1, %v8675_v47  ;;  %5222 = vmatprep.subr.bf16.mxu1 %v7963_v50  ;;  %v8025_v48 = vld [vmem:[#allocation7 + $0x2a0] ss:$28 sps:$4 sm:$0xff]  }
 0x1ad   :  { %7289 = vmatpush3.bf16.msra.mxu0 %v7964_v51  ;;  %v8840_v51 = vld [vmem:[#allocation5] sm:$0x7f] }
 0x1ae   :  { %5263 = vmatprep.subr.bf16.mxu0 %v7970_v53  ;;  %v527_v53 = vrot.slane %v8840_v51, %v526_v37 }
 0x1b0   :  { %2920 = vmatmul.mubr.bf16.vlgmr.msra.gmra.mxu0 %v8778_v21  ;;  %v7985_v21 = vld [vmem:[#allocation7 + $0xac] ss:$28 sps:$4 sm:$0xff]  }
 0x1b1   :  { %7439 = vmatmul.mubr.msk.bf16.vlgmr.msra.gmra.mxu1 %vm2311_vm0, %v8764_v19  ;;  %5264 = vmatpush1.bf16.msra.mxu0 %v7968_v57  ;;  %v7977_v19 = vld [vmem:[#allocation7 + $0xe0] ss:$28 sps:$4 sm:$0xff]   ;;  %v8031_v57 = vld [vmem:[#allocation7 + $0x268] ss:$28 sps:$4 sm:$0xff]  }
 0x1b2   :  { %5223 = vmatpush1.bf16.msra.mxu1 %v7961_v55  ;;  %5254 = vmatprep.mubr.bf16.mxu1 %v8832_v58  ;;  %v8034_v55 = vld [vmem:[#allocation7 + $0x620] ss:$28 sps:$4 sm:$0xff]  }
 0x1b3   :  { %5224 = vmatprep.subr.bf16.mxu1 %v7967_v56  ;;  %5265 = vmatprep.subr.bf16.mxu0 %v7976_v60  ;;  %v8042_v60 = vld [vmem:[#allocation7 + $0x5ec] ss:$28 sps:$4 sm:$0xff]  }
 0x1b5   :  { %5266 = vmatpush1.bf16.msra.mxu0 %v7974_v62  ;;  %v8039_v62 = vld [vmem:[#allocation7 + $0x234] ss:$28 sps:$4 sm:$0xff]  }
 0x1b6   :  { %5225 = vmatpush1.bf16.msra.mxu1 %v7965_v9  ;;  %5267 = vmatprep.subr.bf16.mxu0 %v7982_v63  ;;  %v523_v9 = vrot.slane %v8840_v51, %v522_v35  ;;  %v2516_v63 = vadd.f32 %v8826_v36, %v527_v53  ;;  %v8075_v53 = vld [vmem:[#allocation7 + $0x774] ss:$28 sps:$4 sm:$0xff]  }
 0x1b7   :  { %5226 = vmatprep.subr.bf16.mxu1 %v7973_v61 }
 0x1b9   :  { %5268 = vmatpush1.bf16.msra.mxu0 %v7980_v3 }
 0x1ba   :  { %5227 = vmatpush1.bf16.msra.mxu1 %v7971_v1  ;;  %5269 = vmatprep.subr.bf16.mxu0 %v7988_v4  ;;  %v8040_v1 = vld [vmem:[#allocation7 + $0x5e8] ss:$28 sps:$4 sm:$0xff]  }
 0x1bb   :  { %5228 = vmatprep.subr.bf16.mxu1 %v7979_v2  ;;  %v8048_v2 = vld [vmem:[#allocation7 + $0x5b4] ss:$28 sps:$4 sm:$0xff]  }
 0x1bd   :  { %5270 = vmatpush1.bf16.msra.mxu0 %v7986_v5 }
 0x1be   :  { %5229 = vmatpush1.bf16.msra.mxu1 %v7977_v19  ;;  %5271 = vmatprep.subr.bf16.mxu0 %v7994_v7  ;;  %v8037_v19 = vld [vmem:[#allocation7 + $0x230] ss:$28 sps:$4 sm:$0xff]  }
 0x1bf   :  { %5230 = vmatprep.subr.bf16.mxu1 %v7985_v21  ;;  %v2514_v21 = vadd.f32 %v8824_v6, %v523_v9  ;;  %v8057_v6 = vld [vmem:[#allocation7 + $0x544] ss:$28 sps:$4 sm:$0xff]   ;;  %v8084_v9 = vld [vmem:[#allocation7 + $0xa4c] ss:$28 sps:$4 sm:$0xff]  }
 0x1c1   :  { %5272 = vmatpush1.bf16.msra.mxu0 %v7992_v13 }
 0x1c2   :  { %5231 = vmatpush1.bf16.msra.mxu1 %v7983_v10  ;;  %5273 = vmatprep.subr.bf16.mxu0 %v8000_v14  ;;  %v8045_v10 = vld [vmem:[#allocation7 + $0x1fc] ss:$28 sps:$4 sm:$0xff]  }
 0x1c3   :  { %5232 = vmatprep.subr.bf16.mxu1 %v7991_v12  ;;  %v8046_v12 = vld [vmem:[#allocation7 + $0x5b0] ss:$28 sps:$4 sm:$0xff]  }
 0x1c5   :  { %5274 = vmatpush1.bf16.msra.mxu0 %v7998_v18 }
 0x1c6   :  { %5233 = vmatpush1.bf16.msra.mxu1 %v7989_v15  ;;  %5275 = vmatprep.subr.bf16.mxu0 %v8006_v8  ;;  %v8043_v15 = vld [vmem:[#allocation7 + $0x1f8] ss:$28 sps:$4 sm:$0xff]  }
 0x1c7   :  { %5234 = vmatprep.subr.bf16.mxu1 %v7997_v17  ;;  %v8054_v17 = vld [vmem:[#allocation7 + $0x57c] ss:$28 sps:$4 sm:$0xff]  }
 0x1c9   :  { %5276 = vmatpush1.bf16.msra.mxu0 %v8004_v23 }
 0x1ca   :  { %5235 = vmatpush1.bf16.msra.mxu1 %v7995_v20  ;;  %5277 = vmatprep.subr.bf16.mxu0 %v8012_v24  ;;  %v8051_v20 = vld [vmem:[#allocation7 + $0x1c4] ss:$28 sps:$4 sm:$0xff]  }
 0x1cb   :  { %5236 = vmatprep.subr.bf16.mxu1 %v8003_v22  ;;  %v8052_v22 = vld [vmem:[#allocation7 + $0x578] ss:$28 sps:$4 sm:$0xff]  }
 0x1cd   :  { %5278 = vmatpush1.bf16.msra.mxu0 %v8010_v27  ;;  %v8049_v27 = vld [vmem:[#allocation7 + $0x1c0] ss:$28 sps:$4 sm:$0xff]  }
 0x1ce   :  { %5237 = vmatpush1.bf16.msra.mxu1 %v8001_v25  ;;  %5279 = vmatprep.subr.bf16.mxu0 %v8018_v28  ;;  %v8055_v28 = vld [vmem:[#allocation7 + $0x540] ss:$28 sps:$4 sm:$0xff]  }
 0x1cf   :  { %5238 = vmatprep.subr.bf16.mxu1 %v8009_v26 }
 0x1d0   :  { %v2554_v34 = vpop.f32.mrf.mxu0 }
 0x1d1   :  { %5280 = vmatpush2.bf16.msra.mxu0 %v8016_v31  ;;  %v2555_v13 = vadd.f32 %v2554_v34, %v2514_v21  ;;  %v8063_v34 = vld [vmem:[#allocation7 + $0x854] ss:$28 sps:$4 sm:$0xff]  }
 0x1d2   :  { %5239 = vmatpush2.bf16.msra.mxu1 %v8007_v59  ;;  %v2556_v41 = vpop.f32.mrf.mxu0  ;;  %5281 = vmatprep.subr.bf16.mxu0 %v8024_v32  ;;  %v8060_v59 = vld [vmem:[#allocation7 + $0x88c] ss:$28 sps:$4 sm:$0xff]  }
 0x1d3   :  { %5240 = vmatprep.subr.bf16.mxu1 %v8015_v29  ;;  %v2557_v4 = vadd.f32 %v2556_v41, %v2516_v63  ;;  %v2967_v29 = vmax.f32 %v8819_v52, 0.0  ;;  %v8058_v32 = vld [vmem:[#allocation7 + $0x888] ss:$28 sps:$4 sm:$0xff]   ;;  %v8064_v52 = vld [vmem:[#allocation7 + $0x818] ss:$28 sps:$4 sm:$0xff]  }
 0x1d4   :  { %v2558_v43 = vpop.f32.mrf.mxu0  ;;  %v8069_v41 = vld [vmem:[#allocation7 + $0x7e4] ss:$28 sps:$4 sm:$0xff]   ;;  %v8085_v63 = vld [vmem:[#allocation7 + $0xa10] ss:$28 sps:$4 sm:$0xff]  }
 0x1d5   :  { %5282 = vmatpush2.bf16.msra.mxu0 %v8022_v11  ;;  %v8061_v11 = vld [vmem:[#allocation7 + $0x850] ss:$28 sps:$4 sm:$0xff]   ;;  %v8127_v43 = vld [vmem:[#allocation7 + $0xab8] ss:$28 sps:$4 sm:$0xff]  }
 0x1d6   :  { %5241 = vmatpush2.bf16.msra.mxu1 %v8013_v33  ;;  %v2559_v46 = vpop.f32.mrf.mxu0  ;;  %5283 = vmatprep.subr.bf16.mxu0 %v8030_v39  ;;  %v8854_v33 = vpack.c.bf16 %v2967_v29, %v2967_v29  ;;  %v8066_v39 = vld [vmem:[#allocation7 + $0x81c] ss:$28 sps:$4 sm:$0xff]   ;;  %v534_v29 = vsub.s32 5, %v8791_v30 }
 0x1d7   :  { %5242 = vmatprep.subr.bf16.mxu1 %v8021_v0  ;;  %v8135_v46 = vld [vmem:[#allocation7 + $0xa84] ss:$28 sps:$4 sm:$0xff]  }
 0x1d9   :  { %v2595_v50 = vpop.f32.mrf.mxu1  ;;  %5284 = vmatpush2.bf16.msra.mxu0 %v8028_v45  ;;  %v8072_v45 = vld [vmem:[#allocation7 + $0x7ac] ss:$28 sps:$4 sm:$0xff]  }
 0x1da   :  { %5243 = vmatpush2.bf16.msra.mxu1 %v8019_v42  ;;  %5285 = vmatprep.subr.bf16.mxu0 %v8036_v49  ;;  %v2596_v18 = vadd.f32 %v2595_v50, %v2555_v13  ;;  %v8129_v42 = vld [vmem:[#allocation7 + $0xabc] ss:$28 sps:$4 sm:$0xff]   ;;  %v8070_v50 = vld [vmem:[#allocation7 + $0x7a8] ss:$28 sps:$4 sm:$0xff]   ;;  %v8099_v13 = vld [vmem:[#allocation7 + $0x934] ss:$28 sps:$4 sm:$0xff]  }
 0x1db   :  { %5244 = vmatprep.subr.bf16.mxu1 %v8027_v44  ;;  %v2597_v56 = vpop.f32.mrf.mxu1  ;;  %v8067_v44 = vld [vmem:[#allocation7 + $0x7e0] ss:$28 sps:$4 sm:$0xff]  }
 0x1dc   :  { %v2598_v7 = vadd.f32 %v2597_v56, %v2557_v4  ;;  %v8133_v49 = vld [vmem:[#allocation7 + $0xa80] ss:$28 sps:$4 sm:$0xff]   ;;  %v8076_v56 = vld [vmem:[#allocation7 + $0x738] ss:$28 sps:$4 sm:$0xff]  }
 0x1dd   :  { %v2599_v61 = vpop.f32.mrf.mxu1  ;;  %5286 = vmatpush2.bf16.msra.mxu0 %v8034_v55  ;;  %v8078_v55 = vld [vmem:[#allocation7 + $0x73c] ss:$28 sps:$4 sm:$0xff]  }
 0x1de   :  { %5245 = vmatpush2.bf16.msra.mxu1 %v8025_v48  ;;  %5287 = vmatprep.subr.bf16.mxu0 %v8042_v60  ;;  %v8141_v48 = vld [vmem:[#allocation7 + $0x194] ss:$28 sps:$4 sm:$0xff]   ;;  %v8079_v60 = vld [vmem:[#allocation7 + $0x700] ss:$28 sps:$4 sm:$0xff]   ;;  %v8082_v61 = vld [vmem:[#allocation7 + $0xa48] ss:$28 sps:$4 sm:$0xff]  }
 0x1df   :  { %5246 = vmatprep.subr.bf16.mxu1 %v8033_v54  ;;  %v2600_v3 = vpop.f32.mrf.mxu1  ;;  %v8073_v54 = vld [vmem:[#allocation7 + $0x770] ss:$28 sps:$4 sm:$0xff]   ;;  %v8088_v4 = vld [vmem:[#allocation7 + $0x9d8] ss:$28 sps:$4 sm:$0xff]  }
 0x1e0   :  { %v8090_v3 = vld [vmem:[#allocation7 + $0x9dc] ss:$28 sps:$4 sm:$0xff]  }
 0x1e1   :  { %v2636_v5 = vpop.f32.mrf.mxu1  ;;  %5288 = vmatpush2.bf16.msra.mxu0 %v8040_v1 }
 0x1e2   :  { %5247 = vmatpush2.bf16.msra.mxu1 %v8031_v57  ;;  %5289 = vmatprep.subr.bf16.mxu0 %v8048_v2  ;;  %v2637_v24 = vadd.f32 %v2636_v5, %v2596_v18  ;;  %v8081_v57 = vld [vmem:[#allocation7 + $0x704] ss:$28 sps:$4 sm:$0xff]  }
 0x1e3   :  { %5248 = vmatprep.subr.bf16.mxu1 %v8039_v62  ;;  %v2638_v14 = vpop.f32.mrf.mxu1  ;;  %v8087_v62 = vld [vmem:[#allocation7 + $0xa14] ss:$28 sps:$4 sm:$0xff]   ;;  %v8093_v5 = vld [vmem:[#allocation7 + $0x9a4] ss:$28 sps:$4 sm:$0xff]  }
 0x1e4   :  { %v2639_v36 = vadd.f32 %v2638_v14, %v2598_v7  ;;  %v2969_v31 = vmax.f32 %v2637_v24, 0.0  ;;  %v8091_v7 = vld [vmem:[#allocation7 + $0x9a0] ss:$28 sps:$4 sm:$0xff]  }
 0x1e5   :  { %v2640_v8 = vpop.f32.mrf.mxu1  ;;  %5290 = vmatpush2.bf16.msra.mxu0 %v8046_v12  ;;  %v8094_v12 = vld [vmem:[#allocation7 + $0x968] ss:$28 sps:$4 sm:$0xff]  }
 0x1e6   :  { %v2970_v23 = vmax.f32 %v2639_v36, 0.0  ;;  %5249 = vmatpush2.bf16.msra.mxu1 %v8037_v19  ;;  %5291 = vmatprep.subr.bf16.mxu0 %v8054_v17  ;;  %v8856_v0 = vpack.c.bf16 %v2969_v31, %v2969_v31  ;;  %v8097_v36 = vld [vmem:[#allocation7 + $0x930] ss:$28 sps:$4 sm:$0xff]   ;;  %v8102_v17 = vld [vmem:[#allocation7 + $0x8fc] ss:$28 sps:$4 sm:$0xff]  }
 0x1e7   :  { %5250 = vmatprep.subr.bf16.mxu1 %v8045_v10  ;;  %v2641_v25 = vpop.f32.mrf.mxu1  ;;  %v8096_v10 = vld [vmem:[#allocation7 + $0x96c] ss:$28 sps:$4 sm:$0xff]   ;;  %v8100_v8 = vld [vmem:[#allocation7 + $0x8f8] ss:$28 sps:$4 sm:$0xff]  }
 0x1e8   :  { %v8850_v26 = vpack.c.bf16 %v2970_v23, %v2970_v23  ;;  %v8108_v25 = vld [vmem:[#allocation7 + $0x514] ss:$28 sps:$4 sm:$0xff]  }
 0x1e9   :  { %5292 = vmatpush2.bf16.msra.mxu0 %v8052_v22  ;;  %v8105_v22 = vld [vmem:[#allocation7 + $0x8c4] ss:$28 sps:$4 sm:$0xff]  }
 0x1ea   :  { %5251 = vmatpush2.bf16.msra.mxu1 %v8043_v15  ;;  %5295 = vmatprep.mubr.bf16.mxu0 %v8850_v26 }
 0x1eb   :  { %5252 = vmatprep.subr.bf16.mxu1 %v8051_v20  ;;  %5293 = vmatprep.subr.bf16.mxu0 %v8057_v6  ;;  %v8103_v6 = vld [vmem:[#allocation7 + $0x8c0] ss:$28 sps:$4 sm:$0xff]  }
 0x1ed   :  { %5294 = vmatpush2.bf16.msra.mxu0 %v8055_v28 }
 0x1ee   :  { %5253 = vmatpush2.bf16.msra.mxu1 %v8049_v27  ;;  %5357 = vmatprep.subr.bf16.mxu0 %v8129_v42 }
 0x1ef   :  { %5304 = vmatprep.subr.bf16.mxu1 %v8060_v59  ;;  %v530_v59 = vsub.s32 4, %v8791_v30 }
 0x1f0   :  { %5296 = vmatmul.mubr.bf16.vlgmr.msra.gmra.mxu0 %v8856_v0 }
 0x1f1   :  { %5255 = vmatmul.mubr.bf16.vlgmr.msra.gmra.mxu1 %v8854_v33  ;;  %5377 = vmatprep.mubr.bf16.mxu0 %v8674_v16 }
 0x1f2   :  { %5305 = vmatpush1.bf16.msra.mxu1 %v8058_v32  ;;  %5358 = vmatpush1.bf16.msra.mxu0 %v8127_v43  ;;  %v531_v32 = vrot.slane %v8840_v51, %v530_v59 }
 0x1f3   :  { %5306 = vmatprep.subr.bf16.mxu1 %v8063_v34  ;;  %5359 = vmatprep.subr.bf16.mxu0 %v8135_v46 }
 0x1f6   :  { %5307 = vmatpush1.bf16.msra.mxu1 %v8061_v11  ;;  %5360 = vmatpush1.bf16.msra.mxu0 %v8133_v49  ;;  %v535_v11 = vrot.slane %v8840_v51, %v534_v29 }
 0x1f7   :  { %5308 = vmatprep.subr.bf16.mxu1 %v8066_v39  ;;  %5386 = vmatprep.subr.bf16.mxu0 %v8141_v48 }
 0x1fa   :  { %5309 = vmatpush1.bf16.msra.mxu1 %v8064_v52 }
 0x1fb   :  { %5310 = vmatprep.subr.bf16.mxu1 %v8069_v41 }
 0x1fe   :  { %5311 = vmatpush1.bf16.msra.mxu1 %v8067_v44 }
 0x1ff   :  { %5312 = vmatprep.subr.bf16.mxu1 %v8072_v45 }
 0x202   :  { %5313 = vmatpush1.bf16.msra.mxu1 %v8070_v50 }
 0x203   :  { %5314 = vmatprep.subr.bf16.mxu1 %v8075_v53 }
 0x206   :  { %5315 = vmatpush1.bf16.msra.mxu1 %v8073_v54 }
 0x207   :  { %5316 = vmatprep.subr.bf16.mxu1 %v8078_v55 }
 0x20a   :  { %5317 = vmatpush1.bf16.msra.mxu1 %v8076_v56 }
 0x20b   :  { %5318 = vmatprep.subr.bf16.mxu1 %v8081_v57 }
 0x20e   :  { %5319 = vmatpush1.bf16.msra.mxu1 %v8079_v60 }
 0x20f   :  { %5320 = vmatprep.subr.bf16.mxu1 %v8084_v9  ;;  %v8106_v9 = vld [vmem:[#allocation7 + $0x510] ss:$28 sps:$4 sm:$0xff]  }
 0x210   :  { %v2677_v1 = vpop.f32.mrf.mxu0 }
 0x211   :  { %v2678_v52 = vadd.f32 %v2677_v1, %v531_v32  ;;  %v8114_v1 = vld [vmem:[#allocation7 + $0x4a4] ss:$28 sps:$4 sm:$0xff]  }
 0x212   :  { %5321 = vmatpush2.bf16.msra.mxu1 %v8082_v61  ;;  %v2679_v2 = vpop.f32.mrf.mxu0 }
 0x213   :  { %5322 = vmatprep.subr.bf16.mxu1 %v8087_v62  ;;  %v2680_v42 = vadd.f32 %v2679_v2, %v535_v11  ;;  %v8111_v62 = vld [vmem:[#allocation7 + $0x4dc] ss:$28 sps:$4 sm:$0xff]  }
 0x214   :  { %v2681_v19 = vpop.f32.mrf.mxu0  ;;  %v8112_v2 = vld [vmem:[#allocation7 + $0x4a0] ss:$28 sps:$4 sm:$0xff]  }
 0x215   :  { %v8120_v19 = vld [vmem:[#allocation7 + $0x434] ss:$28 sps:$4 sm:$0xff]  }
 0x216   :  { %5323 = vmatpush2.bf16.msra.mxu1 %v8085_v63  ;;  %v2682_v21 = vpop.f32.mrf.mxu0  ;;  %v8109_v63 = vld [vmem:[#allocation7 + $0x4d8] ss:$28 sps:$4 sm:$0xff]  }
 0x217   :  { %5324 = vmatprep.subr.bf16.mxu1 %v8090_v3  ;;  %v8117_v3 = vld [vmem:[#allocation7 + $0x46c] ss:$28 sps:$4 sm:$0xff]  }
 0x21a   :  { %5325 = vmatpush2.bf16.msra.mxu1 %v8088_v4  ;;  %v8115_v4 = vld [vmem:[#allocation7 + $0x468] ss:$28 sps:$4 sm:$0xff]  }
 0x21b   :  { %5326 = vmatprep.subr.bf16.mxu1 %v8093_v5  ;;  %v538_v5 = vsub.s32 6, %v8791_v30 }
 0x21e   :  { %5327 = vmatpush2.bf16.msra.mxu1 %v8091_v7  ;;  %v8118_v7 = vld [vmem:[#allocation7 + $0x430] ss:$28 sps:$4 sm:$0xff]  }
 0x21f   :  { %5328 = vmatprep.subr.bf16.mxu1 %v8096_v10 }
 0x221   :  { %v2718_v14 = vpop.f32.mrf.mxu1 }
 0x222   :  { %5329 = vmatpush2.bf16.msra.mxu1 %v8094_v12  ;;  %v2719_v43 = vadd.f32 %v2718_v14, %v2678_v52  ;;  %v8123_v12 = vld [vmem:[#allocation7 + $0x3fc] ss:$28 sps:$4 sm:$0xff]   ;;  %v539_v14 = vrot.slane %v8840_v51, %v538_v5 }
 0x223   :  { %v2720_v15 = vpop.f32.mrf.mxu1  ;;  %5330 = vmatprep.subr.bf16.mxu1 %v8099_v13 }
 0x224   :  { %v2721_v45 = vadd.f32 %v2720_v15, %v2680_v42  ;;  %v8121_v15 = vld [vmem:[#allocation7 + $0x3f8] ss:$28 sps:$4 sm:$0xff]  }
 0x225   :  { %v2722_v18 = vpop.f32.mrf.mxu1 }
 0x226   :  { %5331 = vmatpush2.bf16.msra.mxu1 %v8097_v36  ;;  %v8126_v18 = vld [vmem:[#allocation7 + $0x3c4] ss:$28 sps:$4 sm:$0xff]  }
 0x227   :  { %v2723_v20 = vpop.f32.mrf.mxu1  ;;  %5332 = vmatprep.subr.bf16.mxu1 %v8102_v17 }
 0x229   :  { %v2800_v23 = vpop.f32.mrf.mxu1 }
 0x22a   :  { %5333 = vmatpush2.bf16.msra.mxu1 %v8100_v8 }
 0x22b   :  { %v2802_v24 = vpop.f32.mrf.mxu1  ;;  %5334 = vmatprep.subr.bf16.mxu1 %v8105_v22 }
 0x22d   :  { %v2804_v27 = vpop.f32.mrf.mxu1 }
 0x22e   :  { %5335 = vmatpush2.bf16.msra.mxu1 %v8103_v6  ;;  %v8124_v6 = vld [vmem:[#allocation7 + $0x3c0] ss:$28 sps:$4 sm:$0xff]   ;;  %v8132_v27 = vld [vmem:[#allocation7 + $0x38c] ss:$28 sps:$4 sm:$0xff]  }
 0x22f   :  { %v2805_v28 = vpop.f32.mrf.mxu1  ;;  %5427 = vmatprep.subr.bf16.mxu1 %v8108_v25 }
 0x249   :  { %v7246_v31 = vpop.f32.mrf.mxu1 }
 0x24b   :  { %v7247_v34 = vpop.f32.mrf.mxu1 }
 0x24c   :  { %v7248_v36 = vadd.f32 %v7247_v34, %v7246_v31  ;;  %v8130_v34 = vld [vmem:[#allocation7 + $0x388] ss:$28 sps:$4 sm:$0xff]  }
 0x24d   :  { %v7249_v39 = vpop.f32.mrf.mxu1 }
 0x24f   :  { %v7250_v41 = vpop.f32.mrf.mxu1 }
 0x250   :  { %v2759_v44 = vpop.f32.mrf.mxu0  ;;  %v8138_v41 = vld [vmem:[#allocation7 + $0x6d4] ss:$28 sps:$4 sm:$0xff]  }
 0x251   :  { %v2760_v46 = vadd.f32 %v2759_v44, %v2719_v43  ;;  %v8136_v44 = vld [vmem:[#allocation7 + $0x6d0] ss:$28 sps:$4 sm:$0xff]  }
 0x252   :  { %v2761_v49 = vpop.f32.mrf.mxu0 }
 0x253   :  { %v2801_v48 = vadd.f32 %v2800_v23, %v2760_v46  ;;  %v2762_v50 = vadd.f32 %v2761_v49, %v2721_v45  ;;  %v2842_v23 = vadd.f32 %v7248_v36, %v539_v14  ;;  %v8139_v45 = vld [vmem:[#allocation7 + $0x190] ss:$28 sps:$4 sm:$0xff]   ;;  %v8144_v49 = vld [vmem:[#allocation7 + $0x69c] ss:$28 sps:$4 sm:$0xff]   ;;  %v8177_v14 = vld [vmem:[#allocation7 + $0x44] ss:$28 sps:$4 sm:$0xff]  }
 0x254   :  { %v2763_v53 = vpop.f32.mrf.mxu0  ;;  %v8172_v36 = vld [vmem:[#allocation7 + $0x580] ss:$28 sps:$4 sm:$0xff]  }
 0x255   :  { %v2803_v54 = vadd.f32 %v2802_v24, %v2762_v50  ;;  %v2971_v55 = vmax.f32 %v2801_v48, 0.0  ;;  %v8147_v48 = vld [vmem:[#allocation7 + $0x15c] ss:$28 sps:$4 sm:$0xff]  }
 0x256   :  { %v2764_v56 = vpop.f32.mrf.mxu0  ;;  %v8142_v50 = vld [vmem:[#allocation7 + $0x698] ss:$28 sps:$4 sm:$0xff]  }
 0x257   :  { %v2972_v57 = vmax.f32 %v2803_v54, 0.0  ;;  %v8871_v61 = vpack.c.bf16 %v2971_v55, %v2971_v55  ;;  %v8145_v53 = vld [vmem:[#allocation7 + $0x158] ss:$28 sps:$4 sm:$0xff]   ;;  %v8150_v54 = vld [vmem:[#allocation7 + $0x664] ss:$28 sps:$4 sm:$0xff]  }
 0x258   :  { %v8153_v55 = vld [vmem:[#allocation7 + $0x124] ss:$28 sps:$4 sm:$0xff]  }
 0x259   :  { %v8869_v60 = vpack.c.bf16 %v2972_v57, %v2972_v57  ;;  %v8148_v56 = vld [vmem:[#allocation7 + $0x660] ss:$28 sps:$4 sm:$0xff]  }
 0x25a   :  { %v8151_v57 = vld [vmem:[#allocation7 + $0x120] ss:$28 sps:$4 sm:$0xff]  }
 0x25b   :  { %5336 = vmatprep.mubr.bf16.mxu1 %v8869_v60 }
 0x25c   :  { %5337 = vmatmul.mubr.bf16.vlgmr.msra.gmra.mxu1 %v8871_v61 }
 0x25d   :  { %5428 = vmatpush1.bf16.msra.mxu1 %v8106_v9  ;;  %5459 = vmatprep.mubr.bf16.mxu1 %v8850_v26  ;;  %v8156_v9 = vld [vmem:[#allocation7 + $0x62c] ss:$28 sps:$4 sm:$0xff]  }
 0x25e   :  { %5429 = vmatprep.subr.bf16.mxu1 %v8111_v62  ;;  %v8159_v62 = vld [vmem:[#allocation7 + $0xec] ss:$28 sps:$4 sm:$0xff]  }
 0x261   :  { %5430 = vmatpush1.bf16.msra.mxu1 %v8109_v63  ;;  %v8154_v63 = vld [vmem:[#allocation7 + $0x628] ss:$28 sps:$4 sm:$0xff]  }
 0x262   :  { %5431 = vmatprep.subr.bf16.mxu1 %v8114_v1  ;;  %v8157_v1 = vld [vmem:[#allocation7 + $0xe8] ss:$28 sps:$4 sm:$0xff]  }
 0x265   :  { %5432 = vmatpush1.bf16.msra.mxu1 %v8112_v2  ;;  %v8162_v2 = vld [vmem:[#allocation7 + $0x5f4] ss:$28 sps:$4 sm:$0xff]  }
 0x266   :  { %5433 = vmatprep.subr.bf16.mxu1 %v8117_v3  ;;  %v8165_v3 = vld [vmem:[#allocation7 + $0xb4] ss:$28 sps:$4 sm:$0xff]  }
 0x269   :  { %v7268_v21 = vpop.f32.mrf.mxu1  ;;  %5434 = vmatpush1.bf16.msra.mxu1 %v8115_v4  ;;  %v8160_v4 = vld [vmem:[#allocation7 + $0x5f0] ss:$28 sps:$4 sm:$0xff]  }
 0x26a   :  { %5435 = vmatprep.subr.bf16.mxu1 %v8120_v19  ;;  %v8163_v19 = vld [vmem:[#allocation7 + $0xb0] ss:$28 sps:$4 sm:$0xff]  }
 0x26b   :  { %v7269_v10 = vpop.f32.mrf.mxu1 }
 0x26c   :  { %v7270_v8 = vadd.f32 %v7269_v10, %v7268_v21  ;;  %v8168_v21 = vld [vmem:[#allocation7 + $0x5bc] ss:$28 sps:$4 sm:$0xff]  }
 0x26d   :  { %v7271_v13 = vpop.f32.mrf.mxu1  ;;  %5436 = vmatpush1.bf16.msra.mxu1 %v8118_v7  ;;  %v8171_v7 = vld [vmem:[#allocation7 + $0x7c] ss:$28 sps:$4 sm:$0xff]  }
 0x26e   :  { %5437 = vmatprep.subr.bf16.mxu1 %v8123_v12  ;;  %v2882_v28 = vadd.f32 %v7270_v8, %v2842_v23  ;;  %v8166_v10 = vld [vmem:[#allocation7 + $0x5b8] ss:$28 sps:$4 sm:$0xff]   ;;  %v8174_v13 = vld [vmem:[#allocation7 + $0x584] ss:$28 sps:$4 sm:$0xff]  }
 0x26f   :  { %v7272_v17 = vpop.f32.mrf.mxu1  ;;  %v8169_v12 = vld [vmem:[#allocation7 + $0x78] ss:$28 sps:$4 sm:$0xff]   ;;  %v8178_v8 = vld [vmem:[#allocation7 + $0x548] ss:$28 sps:$4 sm:$0xff]  }
 0x270   :  { %v7290_v20 = vpop.f32.mrf.mxu0  ;;  %v8180_v17 = vld [vmem:[#allocation7 + $0x54c] ss:$28 sps:$4 sm:$0xff]   ;;  %v8189_v23 = vld [vmem:[#allocation7 + $0x354] ss:$28 sps:$4 sm:$0xff]  }
 0x271   :  { %v2961_v22 = vpop.f32.mrf.mxu1  ;;  %5438 = vmatpush1.bf16.msra.mxu1 %v8121_v15  ;;  %v8175_v15 = vld [vmem:[#allocation7 + $0x40] ss:$28 sps:$4 sm:$0xff]  }
 0x272   :  { %v7291_v24 = vpop.f32.mrf.mxu0  ;;  %5439 = vmatprep.subr.bf16.mxu1 %v8126_v18  ;;  %v8183_v18 = vld [vmem:[#allocation7 + $0xc] ss:$28 sps:$4 sm:$0xff]  }
 0x273   :  { %v7440_v25 = vpop.f32.mrf.mxu1  ;;  %v7292_v32 = vadd.f32 %v7291_v24, %v7290_v20  ;;  %v8181_v20 = vld [vmem:[#allocation7 + $0x8] ss:$28 sps:$4 sm:$0xff]   ;;  %v8187_v24 = vld [vmem:[#allocation7 + $0x350] ss:$28 sps:$4 sm:$0xff]  }
 0x274   :  { %v7293_v11 = vpop.f32.mrf.mxu0  ;;  %v8192_v25 = vld [vmem:[#allocation7 + $0xa8c] ss:$28 sps:$4 sm:$0xff]  }
 0x275   :  { %v2964_v51 = vpop.f32.mrf.mxu1  ;;  %v2922_v31 = vadd.f32 %v7292_v32, %v2882_v28  ;;  %5440 = vmatpush1.bf16.msra.mxu1 %v8124_v6  ;;  %v8184_v6 = vld [vmem:[#allocation7 + $0xac0] ss:$28 sps:$4 sm:$0xff]   ;;  %v8190_v28 = vld [vmem:[#allocation7 + $0xa88] ss:$28 sps:$4 sm:$0xff]   ;;  %v8193_v32 = vld [vmem:[#allocation7 + $0x318] ss:$28 sps:$4 sm:$0xff]  }
 0x276   :  { %v7294_v39 = vpop.f32.mrf.mxu0  ;;  %5441 = vmatprep.subr.bf16.mxu1 %v8132_v27  ;;  %v8195_v27 = vld [vmem:[#allocation7 + $0x31c] ss:$28 sps:$4 sm:$0xff]   ;;  %v8201_v51 = vld [vmem:[#allocation7 + $0x2e4] ss:$28 sps:$4 sm:$0xff]  }
 0x277   :  { %v7441_v52 = vpop.f32.mrf.mxu1  ;;  %v2962_v42 = vadd.f32 %v2961_v22, %v2922_v31  ;;  %v8186_v22 = vld [vmem:[#allocation7 + $0xac4] ss:$28 sps:$4 sm:$0xff]   ;;  %v8198_v11 = vld [vmem:[#allocation7 + $0x19c] ss:$28 sps:$4 sm:$0xff]  }
 0x278   :  { %v8196_v31 = vld [vmem:[#allocation7 + $0x198] ss:$28 sps:$4 sm:$0xff]   ;;  %v8204_v39 = vld [vmem:[#allocation7 + $0x164] ss:$28 sps:$4 sm:$0xff]   ;;  %v8207_v52 = vld [vmem:[#allocation7 + $0x2ac] ss:$28 sps:$4 sm:$0xff]  }
 0x279   :  { %v2973_v43 = vmax.f32 %v2962_v42, 0.0  ;;  %5442 = vmatpush1.bf16.msra.mxu1 %v8130_v34  ;;  %v8199_v34 = vld [vmem:[#allocation7 + $0x2e0] ss:$28 sps:$4 sm:$0xff]   ;;  %v8205_v42 = vld [vmem:[#allocation7 + $0x2a8] ss:$28 sps:$4 sm:$0xff]  }
 0x27a   :  { %5443 = vmatprep.subr.bf16.mxu1 %v8138_v41  ;;  %v8202_v41 = vld [vmem:[#allocation7 + $0x160] ss:$28 sps:$4 sm:$0xff]  }
 0x27b   :  { %v8880_v46 = vpack.c.bf16 %v2973_v43, %v2973_v43  ;;  %v8210_v43 = vld [vmem:[#allocation7 + $0x12c] ss:$28 sps:$4 sm:$0xff]  }
 0x27d   :  { %5444 = vmatpush2.bf16.msra.mxu1 %v8136_v44  ;;  %7174 = vmatmul.mubr.msk.bf16.vlgmr.msra.gmra.mxu0 %vm5218_vm2, %v8880_v46  ;;  %v8213_v44 = vld [vmem:[#allocation7 + $0x274] ss:$28 sps:$4 sm:$0xff]  }
 0x27e   :  { %5387 = vmatpush1.bf16.msra.mxu0 %v8139_v45  ;;  %5418 = vmatprep.mubr.bf16.mxu0 %v8832_v58  ;;  %v8208_v45 = vld [vmem:[#allocation7 + $0x128] ss:$28 sps:$4 sm:$0xff]  }
 0x27f   :  { %5445 = vmatprep.subr.bf16.mxu1 %v8144_v49  ;;  %5388 = vmatprep.subr.bf16.mxu0 %v8147_v48  ;;  %v3381_v49 = vld [vmem:[#allocation8] sm:$0x7f] }
 0x280   :  { %v8211_v48 = vld [vmem:[#allocation7 + $0x270] ss:$28 sps:$4 sm:$0xff]  }
 0x281   :  { %5446 = vmatpush2.bf16.msra.mxu1 %v8142_v50  ;;  %v8216_v50 = vld [vmem:[#allocation7 + $0xf4] ss:$28 sps:$4 sm:$0xff]  }
 0x282   :  { %5389 = vmatpush1.bf16.msra.mxu0 %v8145_v53  ;;  %5447 = vmatprep.subr.bf16.mxu1 %v8150_v54  ;;  %v8219_v53 = vld [vmem:[#allocation7 + $0x23c] ss:$28 sps:$4 sm:$0xff]   ;;  %v3386_v54 = vrot.slane %v3381_v49, %v514_v38 }
 0x283   :  { %5390 = vmatprep.subr.bf16.mxu0 %v8153_v55  ;;  %v8214_v55 = vld [vmem:[#allocation7 + $0xf0] ss:$28 sps:$4 sm:$0xff]   ;;  %v8223_v38 = vld [vmem:[#allocation7 + $0x200] ss:$28 sps:$4 sm:$0xff]  }
 0x285   :  { %5448 = vmatpush2.bf16.msra.mxu1 %v8148_v56  ;;  %v8217_v56 = vld [vmem:[#allocation7 + $0x238] ss:$28 sps:$4 sm:$0xff]  }
 0x286   :  { %5391 = vmatpush1.bf16.msra.mxu0 %v8151_v57  ;;  %5449 = vmatprep.subr.bf16.mxu1 %v8156_v9  ;;  %v8222_v57 = vld [vmem:[#allocation7 + $0xbc] ss:$28 sps:$4 sm:$0xff]   ;;  %v3390_v9 = vrot.slane %v3381_v49, %v518_v40 }
 0x287   :  { %5392 = vmatprep.subr.bf16.mxu0 %v8159_v62  ;;  %v8225_v62 = vld [vmem:[#allocation7 + $0x204] ss:$28 sps:$4 sm:$0xff]   ;;  %v8267_v49 = vld [vmem:[#allocation7 + $0x77c] ss:$28 sps:$4 sm:$0xff]  }
 0x289   :  { %5450 = vmatpush2.bf16.msra.mxu1 %v8154_v63 }
 0x28a   :  { %5393 = vmatpush1.bf16.msra.mxu0 %v8157_v1  ;;  %5451 = vmatprep.subr.bf16.mxu1 %v8162_v2 }
 0x28b   :  { %5394 = vmatprep.subr.bf16.mxu0 %v8165_v3  ;;  %v8220_v3 = vld [vmem:[#allocation7 + $0xb8] ss:$28 sps:$4 sm:$0xff]  }
 0x28d   :  { %5452 = vmatpush2.bf16.msra.mxu1 %v8160_v4 }
 0x28e   :  { %5395 = vmatpush1.bf16.msra.mxu0 %v8163_v19  ;;  %5453 = vmatprep.subr.bf16.mxu1 %v8168_v21  ;;  %v8228_v19 = vld [vmem:[#allocation7 + $0x84] ss:$28 sps:$4 sm:$0xff]  }
 0x28f   :  { %5396 = vmatprep.subr.bf16.mxu0 %v8171_v7 }
 0x291   :  { %5454 = vmatpush2.bf16.msra.mxu1 %v8166_v10 }
 0x292   :  { %5397 = vmatpush1.bf16.msra.mxu0 %v8169_v12  ;;  %5455 = vmatprep.subr.bf16.mxu1 %v8174_v13  ;;  %v8231_v12 = vld [vmem:[#allocation7 + $0x1cc] ss:$28 sps:$4 sm:$0xff]  }
 0x293   :  { %5398 = vmatprep.subr.bf16.mxu0 %v8177_v14 }
 0x295   :  { %5456 = vmatpush2.bf16.msra.mxu1 %v8172_v36  ;;  %v8226_v36 = vld [vmem:[#allocation7 + $0x80] ss:$28 sps:$4 sm:$0xff]  }
 0x296   :  { %5399 = vmatpush1.bf16.msra.mxu0 %v8175_v15  ;;  %5457 = vmatprep.subr.bf16.mxu1 %v8180_v17  ;;  %v8229_v17 = vld [vmem:[#allocation7 + $0x1c8] ss:$28 sps:$4 sm:$0xff]  }
 0x297   :  { %5400 = vmatprep.subr.bf16.mxu0 %v8183_v18  ;;  %v8234_v18 = vld [vmem:[#allocation7 + $0x4c] ss:$28 sps:$4 sm:$0xff]  }
 0x299   :  { %5458 = vmatpush2.bf16.msra.mxu1 %v8178_v8 }
 0x29a   :  { %5401 = vmatpush1.bf16.msra.mxu0 %v8181_v20  ;;  %5521 = vmatprep.subr.bf16.mxu1 %v8186_v22  ;;  %v8237_v20 = vld [vmem:[#allocation7 + $0x894] ss:$28 sps:$4 sm:$0xff]   ;;  %v8232_v22 = vld [vmem:[#allocation7 + $0x48] ss:$28 sps:$4 sm:$0xff]  }
 0x29b   :  { %5402 = vmatprep.subr.bf16.mxu0 %v8189_v23  ;;  %v8235_v23 = vld [vmem:[#allocation7 + $0x890] ss:$28 sps:$4 sm:$0xff]  }
 0x29c   :  { %5460 = vmatmul.mubr.bf16.vlgmr.msra.gmra.mxu1 %v8856_v0 }
 0x29d   :  { %5522 = vmatpush1.bf16.msra.mxu1 %v8184_v6  ;;  %5541 = vmatprep.mubr.bf16.mxu1 %v8674_v16  ;;  %v8240_v6 = vld [vmem:[#allocation7 + $0x14] ss:$28 sps:$4 sm:$0xff]  }
 0x29e   :  { %5403 = vmatpush2.bf16.msra.mxu0 %v8187_v24  ;;  %5523 = vmatprep.subr.bf16.mxu1 %v8192_v25  ;;  %v8243_v24 = vld [vmem:[#allocation7 + $0x85c] ss:$28 sps:$4 sm:$0xff]   ;;  %v8238_v25 = vld [vmem:[#allocation7 + $0x10] ss:$28 sps:$4 sm:$0xff]  }
 0x29f   :  { %5404 = vmatprep.subr.bf16.mxu0 %v8195_v27  ;;  %v8241_v27 = vld [vmem:[#allocation7 + $0x858] ss:$28 sps:$4 sm:$0xff]  }
 0x2a1   :  { %5524 = vmatpush1.bf16.msra.mxu1 %v8190_v28  ;;  %v8246_v28 = vld [vmem:[#allocation7 + $0x35c] ss:$28 sps:$4 sm:$0xff]  }
 0x2a2   :  { %5405 = vmatpush2.bf16.msra.mxu0 %v8193_v32  ;;  %5550 = vmatprep.subr.bf16.mxu1 %v8198_v11  ;;  %v8249_v32 = vld [vmem:[#allocation7 + $0x824] ss:$28 sps:$4 sm:$0xff]   ;;  %v8244_v11 = vld [vmem:[#allocation7 + $0x358] ss:$28 sps:$4 sm:$0xff]  }
 0x2a3   :  { %5406 = vmatprep.subr.bf16.mxu0 %v8201_v51  ;;  %v8247_v51 = vld [vmem:[#allocation7 + $0x820] ss:$28 sps:$4 sm:$0xff]  }
 0x2a4   :  { %7175 = vmatmul.mubr.msk.bf16.vlgmr.msra.gmra.mxu1 %vm5218_vm2, %v8880_v46 }
 0x2a5   :  { %5551 = vmatpush1.bf16.msra.mxu1 %v8196_v31  ;;  %5582 = vmatprep.mubr.bf16.mxu1 %v8832_v58  ;;  %v8252_v31 = vld [vmem:[#allocation7 + $0x324] ss:$28 sps:$4 sm:$0xff]  }
 0x2a6   :  { %5407 = vmatpush2.bf16.msra.mxu0 %v8199_v34  ;;  %5552 = vmatprep.subr.bf16.mxu1 %v8204_v39  ;;  %v8255_v34 = vld [vmem:[#allocation7 + $0x7ec] ss:$28 sps:$4 sm:$0xff]   ;;  %v8250_v39 = vld [vmem:[#allocation7 + $0x320] ss:$28 sps:$4 sm:$0xff]  }
 0x2a7   :  { %5408 = vmatprep.subr.bf16.mxu0 %v8207_v52  ;;  %v8253_v52 = vld [vmem:[#allocation7 + $0x7e8] ss:$28 sps:$4 sm:$0xff]  }
 0x2a9   :  { %5553 = vmatpush1.bf16.msra.mxu1 %v8202_v41  ;;  %v8258_v41 = vld [vmem:[#allocation7 + $0x2ec] ss:$28 sps:$4 sm:$0xff]  }
 0x2aa   :  { %5409 = vmatpush2.bf16.msra.mxu0 %v8205_v42  ;;  %5554 = vmatprep.subr.bf16.mxu1 %v8210_v43  ;;  %v8261_v42 = vld [vmem:[#allocation7 + $0x7b4] ss:$28 sps:$4 sm:$0xff]   ;;  %v8256_v43 = vld [vmem:[#allocation7 + $0x2e8] ss:$28 sps:$4 sm:$0xff]  }
 0x2ab   :  { %5410 = vmatprep.subr.bf16.mxu0 %v8213_v44  ;;  %v8259_v44 = vld [vmem:[#allocation7 + $0x7b0] ss:$28 sps:$4 sm:$0xff]  }
 0x2ad   :  { %5555 = vmatpush1.bf16.msra.mxu1 %v8208_v45  ;;  %v8264_v45 = vld [vmem:[#allocation7 + $0x2b4] ss:$28 sps:$4 sm:$0xff]  }
 0x2ae   :  { %5411 = vmatpush2.bf16.msra.mxu0 %v8211_v48  ;;  %5556 = vmatprep.subr.bf16.mxu1 %v8216_v50  ;;  %v8262_v48 = vld [vmem:[#allocation7 + $0x2b0] ss:$28 sps:$4 sm:$0xff]   ;;  %v8265_v50 = vld [vmem:[#allocation7 + $0x778] ss:$28 sps:$4 sm:$0xff]  }
 0x2af   :  { %5412 = vmatprep.subr.bf16.mxu0 %v8219_v53  ;;  %v8270_v53 = vld [vmem:[#allocation7 + $0x27c] ss:$28 sps:$4 sm:$0xff]  }
 0x2b0   :  { %v5297_v2 = vpop.f32.mrf.mxu0 }
 0x2b1   :  { %v5256_v63 = vpop.f32.mrf.mxu1  ;;  %5557 = vmatpush1.bf16.msra.mxu1 %v8214_v55  ;;  %v8268_v55 = vld [vmem:[#allocation7 + $0x278] ss:$28 sps:$4 sm:$0xff]  }
 0x2b2   :  { %v5257_v1 = vadd.f32 %v5256_v63, %v3386_v54  ;;  %5413 = vmatpush2.bf16.msra.mxu0 %v8217_v56  ;;  %5558 = vmatprep.subr.bf16.mxu1 %v8222_v57  ;;  %v5299_v10 = vpop.f32.mrf.mxu0  ;;  %v8273_v54 = vld [vmem:[#allocation7 + $0x744] ss:$28 sps:$4 sm:$0xff]  }
 0x2b3   :  { %v5258_v4 = vpop.f32.mrf.mxu1  ;;  %5414 = vmatprep.subr.bf16.mxu0 %v8225_v62  ;;  %v8271_v56 = vld [vmem:[#allocation7 + $0x740] ss:$28 sps:$4 sm:$0xff]   ;;  %v8277_v63 = vld [vmem:[#allocation7 + $0x708] ss:$28 sps:$4 sm:$0xff]  }
 0x2b4   :  { %v5259_v21 = vadd.f32 %v5258_v4, %v3390_v9  ;;  %v8894_v7 = vadd.f32 %v5297_v2, %v5257_v1  ;;  %v5301_v14 = vpop.f32.mrf.mxu0  ;;  %v8276_v57 = vld [vmem:[#allocation7 + $0x244] ss:$28 sps:$4 sm:$0xff]   ;;  %v8279_v9 = vld [vmem:[#allocation7 + $0x70c] ss:$28 sps:$4 sm:$0xff]   ;;  %v8285_v2 = vld [vmem:[#allocation7 + $0xa54] ss:$28 sps:$4 sm:$0xff]  }
 0x2b5   :  { %v5260_v13 = vpop.f32.mrf.mxu1  ;;  %5559 = vmatpush1.bf16.msra.mxu1 %v8220_v3  ;;  %v8274_v62 = vld [vmem:[#allocation7 + $0x240] ss:$28 sps:$4 sm:$0xff]   ;;  %v8282_v1 = vld [vmem:[#allocation7 + $0x20c] ss:$28 sps:$4 sm:$0xff]   ;;  %v8292_v14 = vld [vmem:[#allocation7 + $0x898] ss:$28 sps:$4 sm:$0xff]  }
 0x2b6   :  { %v8896_v40 = vadd.f32 %v5299_v10, %v5259_v21  ;;  %5415 = vmatpush2.bf16.msra.mxu0 %v8223_v38  ;;  %5560 = vmatprep.subr.bf16.mxu1 %v8228_v19  ;;  %v5302_v8 = vpop.f32.mrf.mxu0  ;;  %v8280_v3 = vld [vmem:[#allocation7 + $0x208] ss:$28 sps:$4 sm:$0xff]   ;;  %v8283_v4 = vld [vmem:[#allocation7 + $0xa50] ss:$28 sps:$4 sm:$0xff]   ;;  %v8291_v19 = vld [vmem:[#allocation7 + $0xa1c] ss:$28 sps:$4 sm:$0xff]  }
 0x2b7   :  { %v5261_v15 = vpop.f32.mrf.mxu1  ;;  %5416 = vmatprep.subr.bf16.mxu0 %v8231_v12  ;;  %v8288_v38 = vld [vmem:[#allocation7 + $0x1d4] ss:$28 sps:$4 sm:$0xff]   ;;  %v8294_v12 = vld [vmem:[#allocation7 + $0x89c] ss:$28 sps:$4 sm:$0xff]   ;;  %v8297_v13 = vld [vmem:[#allocation7 + $0x9e4] ss:$28 sps:$4 sm:$0xff]  }
 0x2b8   :  { %v8286_v21 = vld [vmem:[#allocation7 + $0x1d0] ss:$28 sps:$4 sm:$0xff]   ;;  %v8289_v10 = vld [vmem:[#allocation7 + $0xa18] ss:$28 sps:$4 sm:$0xff]   ;;  %v8300_v15 = vld [vmem:[#allocation7 + $0x864] ss:$28 sps:$4 sm:$0xff]  }
 0x2b9   :  { %5561 = vmatpush1.bf16.msra.mxu1 %v8226_v36  ;;  %v8295_v36 = vld [vmem:[#allocation7 + $0x9e0] ss:$28 sps:$4 sm:$0xff]   ;;  %v8301_v8 = vld [vmem:[#allocation7 + $0x9a8] ss:$28 sps:$4 sm:$0xff]  }
 0x2ba   :  { %5417 = vmatpush2.bf16.msra.mxu0 %v8229_v17  ;;  %5562 = vmatprep.subr.bf16.mxu1 %v8234_v18  ;;  %v8303_v17 = vld [vmem:[#allocation7 + $0x9ac] ss:$28 sps:$4 sm:$0xff]   ;;  %v8298_v18 = vld [vmem:[#allocation7 + $0x860] ss:$28 sps:$4 sm:$0xff]  }
 0x2bb   :  { %5468 = vmatprep.subr.bf16.mxu0 %v8237_v20  ;;  %v8306_v20 = vld [vmem:[#allocation7 + $0x82c] ss:$28 sps:$4 sm:$0xff]  }
 0x2bd   :  { %5419 = vmatmul.mubr.bf16.vlgmr.msra.gmra.mxu0 %v8854_v33  ;;  %5563 = vmatpush1.bf16.msra.mxu1 %v8232_v22  ;;  %v8309_v22 = vld [vmem:[#allocation7 + $0x974] ss:$28 sps:$4 sm:$0xff]  }
 0x2be   :  { %5469 = vmatpush1.bf16.msra.mxu0 %v8235_v23  ;;  %5500 = vmatprep.mubr.bf16.mxu0 %v8869_v60  ;;  %v8304_v23 = vld [vmem:[#allocation7 + $0x828] ss:$28 sps:$4 sm:$0xff]  }
 0x2bf   :  { %5564 = vmatprep.subr.bf16.mxu1 %v8240_v6  ;;  %5470 = vmatprep.subr.bf16.mxu0 %v8243_v24  ;;  %v8307_v6 = vld [vmem:[#allocation7 + $0x970] ss:$28 sps:$4 sm:$0xff]  }
 0x2c0   :  { %v8312_v24 = vld [vmem:[#allocation7 + $0x7f4] ss:$28 sps:$4 sm:$0xff]  }
 0x2c1   :  { %5565 = vmatpush1.bf16.msra.mxu1 %v8238_v25  ;;  %v8315_v25 = vld [vmem:[#allocation7 + $0x93c] ss:$28 sps:$4 sm:$0xff]  }
 0x2c2   :  { %5471 = vmatpush1.bf16.msra.mxu0 %v8241_v27  ;;  %5566 = vmatprep.subr.bf16.mxu1 %v8246_v28  ;;  %v8310_v27 = vld [vmem:[#allocation7 + $0x7f0] ss:$28 sps:$4 sm:$0xff]   ;;  %v8313_v28 = vld [vmem:[#allocation7 + $0x938] ss:$28 sps:$4 sm:$0xff]  }
 0x2c3   :  { %5472 = vmatprep.subr.bf16.mxu0 %v8249_v32  ;;  %v8318_v32 = vld [vmem:[#allocation7 + $0x7bc] ss:$28 sps:$4 sm:$0xff]  }
 0x2c5   :  { %5567 = vmatpush2.bf16.msra.mxu1 %v8244_v11  ;;  %v8321_v11 = vld [vmem:[#allocation7 + $0x904] ss:$28 sps:$4 sm:$0xff]  }
 0x2c6   :  { %5473 = vmatpush1.bf16.msra.mxu0 %v8247_v51  ;;  %5568 = vmatprep.subr.bf16.mxu1 %v8252_v31  ;;  %v8316_v51 = vld [vmem:[#allocation7 + $0x7b8] ss:$28 sps:$4 sm:$0xff]   ;;  %v8319_v31 = vld [vmem:[#allocation7 + $0x900] ss:$28 sps:$4 sm:$0xff]  }
 0x2c7   :  { %5474 = vmatprep.subr.bf16.mxu0 %v8255_v34  ;;  %v8324_v34 = vld [vmem:[#allocation7 + $0x784] ss:$28 sps:$4 sm:$0xff]  }
 0x2c9   :  { %5569 = vmatpush2.bf16.msra.mxu1 %v8250_v39  ;;  %v8327_v39 = vld [vmem:[#allocation7 + $0x8cc] ss:$28 sps:$4 sm:$0xff]  }
 0x2ca   :  { %5475 = vmatpush1.bf16.msra.mxu0 %v8253_v52  ;;  %5570 = vmatprep.subr.bf16.mxu1 %v8258_v41  ;;  %v8322_v52 = vld [vmem:[#allocation7 + $0x780] ss:$28 sps:$4 sm:$0xff]   ;;  %v8325_v41 = vld [vmem:[#allocation7 + $0x8c8] ss:$28 sps:$4 sm:$0xff]  }
 0x2cb   :  { %5476 = vmatprep.subr.bf16.mxu0 %v8261_v42  ;;  %v8330_v42 = vld [vmem:[#allocation7 + $0x74c] ss:$28 sps:$4 sm:$0xff]  }
 0x2cd   :  { %5571 = vmatpush2.bf16.msra.mxu1 %v8256_v43  ;;  %v8333_v43 = vld [vmem:[#allocation7 + $0x51c] ss:$28 sps:$4 sm:$0xff]  }
 0x2ce   :  { %5477 = vmatpush1.bf16.msra.mxu0 %v8259_v44  ;;  %5572 = vmatprep.subr.bf16.mxu1 %v8264_v45  ;;  %v8328_v44 = vld [vmem:[#allocation7 + $0x748] ss:$28 sps:$4 sm:$0xff]   ;;  %v8331_v45 = vld [vmem:[#allocation7 + $0x518] ss:$28 sps:$4 sm:$0xff]  }
 0x2cf   :  { %5478 = vmatprep.subr.bf16.mxu0 %v8267_v49  ;;  %v8336_v49 = vld [vmem:[#allocation7 + $0x714] ss:$28 sps:$4 sm:$0xff]  }
 0x2d1   :  { %5573 = vmatpush2.bf16.msra.mxu1 %v8262_v48  ;;  %v8339_v48 = vld [vmem:[#allocation7 + $0x4e4] ss:$28 sps:$4 sm:$0xff]  }
 0x2d2   :  { %5479 = vmatpush1.bf16.msra.mxu0 %v8265_v50  ;;  %5574 = vmatprep.subr.bf16.mxu1 %v8270_v53  ;;  %v8334_v50 = vld [vmem:[#allocation7 + $0x710] ss:$28 sps:$4 sm:$0xff]   ;;  %v8337_v53 = vld [vmem:[#allocation7 + $0x4e0] ss:$28 sps:$4 sm:$0xff]  }
 0x2d3   :  { %5480 = vmatprep.subr.bf16.mxu0 %v8273_v54  ;;  %v8342_v54 = vld [vmem:[#allocation7 + $0xa5c] ss:$28 sps:$4 sm:$0xff]  }
 0x2d5   :  { %5575 = vmatpush2.bf16.msra.mxu1 %v8268_v55  ;;  %v8345_v55 = vld [vmem:[#allocation7 + $0x4ac] ss:$28 sps:$4 sm:$0xff]  }
 0x2d6   :  { %5481 = vmatpush1.bf16.msra.mxu0 %v8271_v56  ;;  %5576 = vmatprep.subr.bf16.mxu1 %v8276_v57  ;;  %v8340_v56 = vld [vmem:[#allocation7 + $0xa58] ss:$28 sps:$4 sm:$0xff]   ;;  %v8343_v57 = vld [vmem:[#allocation7 + $0x4a8] ss:$28 sps:$4 sm:$0xff]  }
 0x2d7   :  { %5482 = vmatprep.subr.bf16.mxu0 %v8279_v9  ;;  %v8348_v9 = vld [vmem:[#allocation7 + $0xa24] ss:$28 sps:$4 sm:$0xff]  }
 0x2d9   :  { %5577 = vmatpush2.bf16.msra.mxu1 %v8274_v62  ;;  %v8351_v62 = vld [vmem:[#allocation7 + $0x474] ss:$28 sps:$4 sm:$0xff]  }
 0x2da   :  { %5483 = vmatpush1.bf16.msra.mxu0 %v8277_v63  ;;  %5578 = vmatprep.subr.bf16.mxu1 %v8282_v1  ;;  %v8346_v63 = vld [vmem:[#allocation7 + $0xa20] ss:$28 sps:$4 sm:$0xff]   ;;  %v8349_v1 = vld [vmem:[#allocation7 + $0x470] ss:$28 sps:$4 sm:$0xff]  }
 0x2db   :  { %5484 = vmatprep.subr.bf16.mxu0 %v8285_v2  ;;  %v8354_v2 = vld [vmem:[#allocation7 + $0x9ec] ss:$28 sps:$4 sm:$0xff]  }
 0x2dd   :  { %5579 = vmatpush2.bf16.msra.mxu1 %v8280_v3  ;;  %v8357_v3 = vld [vmem:[#allocation7 + $0x43c] ss:$28 sps:$4 sm:$0xff]  }
 0x2de   :  { %5485 = vmatpush2.bf16.msra.mxu0 %v8283_v4  ;;  %5580 = vmatprep.subr.bf16.mxu1 %v8288_v38  ;;  %v8352_v4 = vld [vmem:[#allocation7 + $0x9e8] ss:$28 sps:$4 sm:$0xff]   ;;  %v8355_v38 = vld [vmem:[#allocation7 + $0x438] ss:$28 sps:$4 sm:$0xff]  }
 0x2df   :  { %5486 = vmatprep.subr.bf16.mxu0 %v8291_v19  ;;  %v8360_v19 = vld [vmem:[#allocation7 + $0x9b4] ss:$28 sps:$4 sm:$0xff]  }
 0x2e1   :  { %5581 = vmatpush2.bf16.msra.mxu1 %v8286_v21  ;;  %v8363_v21 = vld [vmem:[#allocation7 + $0x404] ss:$28 sps:$4 sm:$0xff]  }
 0x2e2   :  { %5487 = vmatpush2.bf16.msra.mxu0 %v8289_v10  ;;  %5632 = vmatprep.subr.bf16.mxu1 %v8294_v12  ;;  %v8358_v10 = vld [vmem:[#allocation7 + $0x9b0] ss:$28 sps:$4 sm:$0xff]   ;;  %v8361_v12 = vld [vmem:[#allocation7 + $0x400] ss:$28 sps:$4 sm:$0xff]  }
 0x2e3   :  { %5488 = vmatprep.subr.bf16.mxu0 %v8297_v13  ;;  %v8366_v13 = vld [vmem:[#allocation7 + $0x97c] ss:$28 sps:$4 sm:$0xff]  }
 0x2e4   :  { %5583 = vmatmul.mubr.bf16.vlgmr.msra.gmra.mxu1 %v8854_v33 }
 0x2e5   :  { %5633 = vmatpush1.bf16.msra.mxu1 %v8292_v14  ;;  %5664 = vmatprep.mubr.bf16.mxu1 %v8869_v60  ;;  %v8369_v14 = vld [vmem:[#allocation7 + $0x3cc] ss:$28 sps:$4 sm:$0xff]  }
 0x2e6   :  { %5489 = vmatpush2.bf16.msra.mxu0 %v8295_v36  ;;  %5634 = vmatprep.subr.bf16.mxu1 %v8300_v15  ;;  %v8364_v36 = vld [vmem:[#allocation7 + $0x978] ss:$28 sps:$4 sm:$0xff]   ;;  %v8367_v15 = vld [vmem:[#allocation7 + $0x3c8] ss:$28 sps:$4 sm:$0xff]  }
 0x2e7   :  { %5490 = vmatprep.subr.bf16.mxu0 %v8303_v17  ;;  %v8372_v17 = vld [vmem:[#allocation7 + $0x944] ss:$28 sps:$4 sm:$0xff]  }
 0x2e9   :  { %5635 = vmatpush1.bf16.msra.mxu1 %v8298_v18  ;;  %v8375_v18 = vld [vmem:[#allocation7 + $0x394] ss:$28 sps:$4 sm:$0xff]  }
 0x2ea   :  { %5491 = vmatpush2.bf16.msra.mxu0 %v8301_v8  ;;  %5636 = vmatprep.subr.bf16.mxu1 %v8306_v20  ;;  %v8370_v8 = vld [vmem:[#allocation7 + $0x940] ss:$28 sps:$4 sm:$0xff]   ;;  %v8373_v20 = vld [vmem:[#allocation7 + $0x390] ss:$28 sps:$4 sm:$0xff]  }
 0x2eb   :  { %5492 = vmatprep.subr.bf16.mxu0 %v8309_v22  ;;  %v8378_v22 = vld [vmem:[#allocation7 + $0x90c] ss:$28 sps:$4 sm:$0xff]  }
 0x2ed   :  { %5637 = vmatpush1.bf16.msra.mxu1 %v8304_v23  ;;  %v8381_v23 = vld [vmem:[#allocation7 + $0x6dc] ss:$28 sps:$4 sm:$0xff]  }
 0x2ee   :  { %5493 = vmatpush2.bf16.msra.mxu0 %v8307_v6  ;;  %5638 = vmatprep.subr.bf16.mxu1 %v8312_v24  ;;  %v8376_v6 = vld [vmem:[#allocation7 + $0x908] ss:$28 sps:$4 sm:$0xff]   ;;  %v8379_v24 = vld [vmem:[#allocation7 + $0x6d8] ss:$28 sps:$4 sm:$0xff]  }
 0x2ef   :  { %5494 = vmatprep.subr.bf16.mxu0 %v8315_v25  ;;  %v8384_v25 = vld [vmem:[#allocation7 + $0x8d4] ss:$28 sps:$4 sm:$0xff]  }
 0x2f1   :  { %5639 = vmatpush1.bf16.msra.mxu1 %v8310_v27  ;;  %v8387_v27 = vld [vmem:[#allocation7 + $0x6a4] ss:$28 sps:$4 sm:$0xff]  }
 0x2f2   :  { %5495 = vmatpush2.bf16.msra.mxu0 %v8313_v28  ;;  %5640 = vmatprep.subr.bf16.mxu1 %v8318_v32 }
 0x2f3   :  { %5496 = vmatprep.subr.bf16.mxu0 %v8321_v11  ;;  %v8382_v11 = vld [vmem:[#allocation7 + $0x8d0] ss:$28 sps:$4 sm:$0xff]  }
 0x2f5   :  { %5641 = vmatpush1.bf16.msra.mxu1 %v8316_v51 }
 0x2f6   :  { %5497 = vmatpush2.bf16.msra.mxu0 %v8319_v31  ;;  %5642 = vmatprep.subr.bf16.mxu1 %v8324_v34  ;;  %v8385_v31 = vld [vmem:[#allocation7 + $0x6a0] ss:$28 sps:$4 sm:$0xff]  }
 0x2f7   :  { %5498 = vmatprep.subr.bf16.mxu0 %v8327_v39  ;;  %v8388_v34 = vld [vmem:[#allocation7 + $0xa60] ss:$28 sps:$4 sm:$0xff]  }
 0x2f9   :  { %5643 = vmatpush1.bf16.msra.mxu1 %v8322_v52  ;;  %v8391_v52 = vld [vmem:[#allocation7 + $0x66c] ss:$28 sps:$4 sm:$0xff]  }
 0x2fa   :  { %5499 = vmatpush2.bf16.msra.mxu0 %v8325_v41  ;;  %5644 = vmatprep.subr.bf16.mxu1 %v8330_v42  ;;  %v8392_v42 = vld [vmem:[#allocation7 + $0x8a0] ss:$28 sps:$4 sm:$0xff]  }
 0x2fb   :  { %5591 = vmatprep.subr.bf16.mxu0 %v8333_v43 }
 0x2fd   :  { %5501 = vmatmul.mubr.bf16.vlgmr.msra.gmra.mxu0 %v8871_v61  ;;  %5645 = vmatpush1.bf16.msra.mxu1 %v8328_v44  ;;  %v8393_v44 = vld [vmem:[#allocation7 + $0xa28] ss:$28 sps:$4 sm:$0xff]  }
 0x2fe   :  { %5592 = vmatpush1.bf16.msra.mxu0 %v8331_v45  ;;  %5623 = vmatprep.mubr.bf16.mxu0 %v8850_v26  ;;  %v8396_v45 = vld [vmem:[#allocation7 + $0x634] ss:$28 sps:$4 sm:$0xff]  }
 0x2ff   :  { %5646 = vmatprep.subr.bf16.mxu1 %v8336_v49  ;;  %5593 = vmatprep.subr.bf16.mxu0 %v8339_v48  ;;  %v8397_v49 = vld [vmem:[#allocation7 + $0x868] ss:$28 sps:$4 sm:$0xff]   ;;  %v8398_v48 = vld [vmem:[#allocation7 + $0x9f0] ss:$28 sps:$4 sm:$0xff]  }
 0x301   :  { %5647 = vmatpush1.bf16.msra.mxu1 %v8334_v50  ;;  %v8401_v50 = vld [vmem:[#allocation7 + $0x5fc] ss:$28 sps:$4 sm:$0xff]  }
 0x302   :  { %5594 = vmatpush1.bf16.msra.mxu0 %v8337_v53  ;;  %5648 = vmatprep.subr.bf16.mxu1 %v8342_v54  ;;  %v8402_v53 = vld [vmem:[#allocation7 + $0x830] ss:$28 sps:$4 sm:$0xff]   ;;  %v8399_v54 = vld [vmem:[#allocation7 + $0x5f8] ss:$28 sps:$4 sm:$0xff]  }
 0x303   :  { %5595 = vmatprep.subr.bf16.mxu0 %v8345_v55  ;;  %v8403_v55 = vld [vmem:[#allocation7 + $0x9b8] ss:$28 sps:$4 sm:$0xff]  }
 0x305   :  { %5649 = vmatpush2.bf16.msra.mxu1 %v8340_v56  ;;  %v8406_v56 = vld [vmem:[#allocation7 + $0x5c4] ss:$28 sps:$4 sm:$0xff]  }
 0x306   :  { %5596 = vmatpush1.bf16.msra.mxu0 %v8343_v57  ;;  %5650 = vmatprep.subr.bf16.mxu1 %v8348_v9  ;;  %v8407_v57 = vld [vmem:[#allocation7 + $0x7f8] ss:$28 sps:$4 sm:$0xff]   ;;  %v8408_v9 = vld [vmem:[#allocation7 + $0x980] ss:$28 sps:$4 sm:$0xff]  }
 0x307   :  { %5597 = vmatprep.subr.bf16.mxu0 %v8351_v62  ;;  %v8411_v62 = vld [vmem:[#allocation7 + $0x58c] ss:$28 sps:$4 sm:$0xff]  }
 0x309   :  { %5651 = vmatpush2.bf16.msra.mxu1 %v8346_v63  ;;  %v8412_v63 = vld [vmem:[#allocation7 + $0x7c0] ss:$28 sps:$4 sm:$0xff]  }
 0x30a   :  { %5598 = vmatpush1.bf16.msra.mxu0 %v8349_v1  ;;  %5652 = vmatprep.subr.bf16.mxu1 %v8354_v2  ;;  %v8409_v1 = vld [vmem:[#allocation7 + $0x588] ss:$28 sps:$4 sm:$0xff]  }
 0x30b   :  { %5599 = vmatprep.subr.bf16.mxu0 %v8357_v3  ;;  %v8413_v2 = vld [vmem:[#allocation7 + $0x948] ss:$28 sps:$4 sm:$0xff]   ;;  %v8416_v3 = vld [vmem:[#allocation7 + $0x554] ss:$28 sps:$4 sm:$0xff]  }
 0x30d   :  { %5653 = vmatpush2.bf16.msra.mxu1 %v8352_v4  ;;  %v8417_v4 = vld [vmem:[#allocation7 + $0x788] ss:$28 sps:$4 sm:$0xff]  }
 0x30e   :  { %5600 = vmatpush1.bf16.msra.mxu0 %v8355_v38  ;;  %5654 = vmatprep.subr.bf16.mxu1 %v8360_v19  ;;  %v8414_v38 = vld [vmem:[#allocation7 + $0x550] ss:$28 sps:$4 sm:$0xff]  }
 0x30f   :  { %5601 = vmatprep.subr.bf16.mxu0 %v8363_v21  ;;  %v8418_v19 = vld [vmem:[#allocation7 + $0x910] ss:$28 sps:$4 sm:$0xff]  }
 0x310   :  { %v8421_v21 = vld [vmem:[#allocation7 + $0xacc] ss:$28 sps:$4 sm:$0xff]  }
 0x311   :  { %5655 = vmatpush2.bf16.msra.mxu1 %v8358_v10  ;;  %v8422_v10 = vld [vmem:[#allocation7 + $0x750] ss:$28 sps:$4 sm:$0xff]  }
 0x312   :  { %5602 = vmatpush1.bf16.msra.mxu0 %v8361_v12  ;;  %5656 = vmatprep.subr.bf16.mxu1 %v8366_v13  ;;  %v8419_v12 = vld [vmem:[#allocation7 + $0xac8] ss:$28 sps:$4 sm:$0xff]   ;;  %v8423_v13 = vld [vmem:[#allocation7 + $0x8d8] ss:$28 sps:$4 sm:$0xff]  }
 0x313   :  { %5603 = vmatprep.subr.bf16.mxu0 %v8369_v14  ;;  %v8426_v14 = vld [vmem:[#allocation7 + $0xa94] ss:$28 sps:$4 sm:$0xff]  }
 0x315   :  { %5657 = vmatpush2.bf16.msra.mxu1 %v8364_v36 }
 0x316   :  { %5604 = vmatpush1.bf16.msra.mxu0 %v8367_v15  ;;  %5658 = vmatprep.subr.bf16.mxu1 %v8372_v17  ;;  %v8427_v15 = vld [vmem:[#allocation7 + $0x718] ss:$28 sps:$4 sm:$0xff]  }
 0x317   :  { %5605 = vmatprep.subr.bf16.mxu0 %v8375_v18  ;;  %v8424_v18 = vld [vmem:[#allocation7 + $0xa90] ss:$28 sps:$4 sm:$0xff]  }
 0x319   :  { %5659 = vmatpush2.bf16.msra.mxu1 %v8370_v8  ;;  %v8477_v8 = vld [vmem:[#allocation10 + $0xf8] sm:$0xff]  }
 0x31a   :  { %5606 = vmatpush1.bf16.msra.mxu0 %v8373_v20  ;;  %5660 = vmatprep.subr.bf16.mxu1 %v8378_v22  ;;  %v8428_v22 = vld [vmem:[#allocation7 + $0x360] ss:$28 sps:$4 sm:$0xff]  }
 0x31b   :  { %5607 = vmatprep.subr.bf16.mxu0 %v8381_v23 }
 0x31c   :  { %v5338_v28 = vpop.f32.mrf.mxu1 }
 0x31d   :  { %v8905_v32 = vadd.f32 %v5338_v28, %v8894_v7  ;;  %5661 = vmatpush2.bf16.msra.mxu1 %v8376_v6  ;;  %v8389_v7 = vld [vmem:[#allocation7 + $0x668] ss:$28 sps:$4 sm:$0xff]  }
 0x31e   :  { %5608 = vmatpush2.bf16.msra.mxu0 %v8379_v24  ;;  %v5340_v51 = vpop.f32.mrf.mxu1  ;;  %5662 = vmatprep.subr.bf16.mxu1 %v8384_v25  ;;  %v8479_v24 = vld [vmem:[#allocation10 + $0xb8] sm:$0xff]   ;;  %v8429_v25 = vld [vmem:[#allocation7 + $0x1a0] ss:$28 sps:$4 sm:$0xff]   ;;  %v8430_v28 = vld [vmem:[#allocation7 + $0x328] ss:$28 sps:$4 sm:$0xff]  }
 0x31f   :  { %v8908_v39 = vadd.f32 %v5340_v51, %v8896_v40  ;;  %5609 = vmatprep.subr.bf16.mxu0 %v8387_v27  ;;  %v8394_v40 = vld [vmem:[#allocation7 + $0x630] ss:$28 sps:$4 sm:$0xff]   ;;  %v8482_v51 = vld [vmem:[#allocation10 + $0xe8] sm:$0xff]  }
 0x320   :  { %v5342_v41 = vpop.f32.mrf.mxu1 }
 0x321   :  { %5663 = vmatpush2.bf16.msra.mxu1 %v8382_v11  ;;  %v8431_v11 = vld [vmem:[#allocation7 + $0x168] ss:$28 sps:$4 sm:$0xff]   ;;  %v8485_v41 = vld [vmem:[#allocation10 + $0xa0] sm:$0xff]  }
 0x322   :  { %5610 = vmatpush2.bf16.msra.mxu0 %v8385_v31  ;;  %v5343_v43 = vpop.f32.mrf.mxu1  ;;  %7342 = vmatprep.subr.bf16.mxu1 %v8388_v34  ;;  %v8432_v31 = vld [vmem:[#allocation7 + $0x2f0] ss:$28 sps:$4 sm:$0xff]   ;;  %v8483_v34 = vld [vmem:[#allocation10 + $0xa8] sm:$0xff]  }
 0x323   :  { %5611 = vmatprep.subr.bf16.mxu0 %v8391_v52  ;;  %v8484_v52 = vld [vmem:[#allocation10 + $0xe0] sm:$0xff]   ;;  %v8486_v43 = vld [vmem:[#allocation10 + $0xd8] sm:$0xff]  }
 0x324   :  { %5665 = vmatmul.mubr.bf16.vlgmr.msra.gmra.mxu1 %v8871_v61 }
 0x325   :  { %7343 = vmatpush3.bf16.msra.mxu1 %v8392_v42  ;;  %5826 = vmatprep.mubr.bf16.mxu1 %v8869_v60  ;;  %v8404_v60 = vld [vmem:[#allocation7 + $0x5c0] ss:$28 sps:$4 sm:$0xff]   ;;  %v8435_v42 = vld [vmem:[#allocation7 + $0xf8] ss:$28 sps:$4 sm:$0xff]  }
 0x326   :  { %5612 = vmatpush2.bf16.msra.mxu0 %v8389_v7  ;;  %7344 = vmatprep.subr.bf16.mxu1 %v8393_v44  ;;  %v8487_v7 = vld [vmem:[#allocation10 + $0x98] sm:$0xff]   ;;  %v8437_v44 = vld [vmem:[#allocation7 + $0xc0] ss:$28 sps:$4 sm:$0xff]  }
 0x327   :  { %5613 = vmatprep.subr.bf16.mxu0 %v8396_v45  ;;  %v8488_v45 = vld [vmem:[#allocation10 + $0xd0] sm:$0xff]  }
 0x329   :  { %7345 = vmatpush3.bf16.msra.mxu1 %v8397_v49  ;;  %v8438_v49 = vld [vmem:[#allocation7 + $0x248] ss:$28 sps:$4 sm:$0xff]  }
 0x32a   :  { %5614 = vmatpush2.bf16.msra.mxu0 %v8394_v40  ;;  %7346 = vmatprep.subr.bf16.mxu1 %v8398_v48  ;;  %v8489_v40 = vld [vmem:[#allocation10 + $0x90] sm:$0xff]  }
 0x32b   :  { %5615 = vmatprep.subr.bf16.mxu0 %v8401_v50  ;;  %v8439_v48 = vld [vmem:[#allocation7 + $0x88] ss:$28 sps:$4 sm:$0xff]  }
 0x32c   :  { %v8490_v50 = vld [vmem:[#allocation10 + $0xc8] sm:$0xff]  }
 0x32d   :  { %7347 = vmatpush3.bf16.msra.mxu1 %v8402_v53  ;;  %v8440_v53 = vld [vmem:[#allocation7 + $0x210] ss:$28 sps:$4 sm:$0xff]  }
 0x32e   :  { %5616 = vmatpush2.bf16.msra.mxu0 %v8399_v54  ;;  %7348 = vmatprep.subr.bf16.mxu1 %v8403_v55  ;;  %v8491_v54 = vld [vmem:[#allocation10 + $0x88] sm:$0xff]   ;;  %v8441_v55 = vld [vmem:[#allocation7 + $0x50] ss:$28 sps:$4 sm:$0xff]  }
 0x32f   :  { %5617 = vmatprep.subr.bf16.mxu0 %v8406_v56  ;;  %v8492_v56 = vld [vmem:[#allocation10 + $0xc0] sm:$0xff]  }
 0x331   :  { %7349 = vmatpush3.bf16.msra.mxu1 %v8407_v57  ;;  %v8442_v57 = vld [vmem:[#allocation7 + $0x1d8] ss:$28 sps:$4 sm:$0xff]  }
 0x332   :  { %5618 = vmatpush2.bf16.msra.mxu0 %v8404_v60  ;;  %7350 = vmatprep.subr.bf16.mxu1 %v8408_v9  ;;  %v8493_v9 = vld [vmem:[#allocation10 + $0x80] sm:$0xff]  }
 0x333   :  { %5619 = vmatprep.subr.bf16.mxu0 %v8411_v62 }
 0x335   :  { %7351 = vmatpush3.bf16.msra.mxu1 %v8412_v63  ;;  %v8443_v63 = vld [vmem:[#allocation7 + $0x18] ss:$28 sps:$4 sm:$0xff]  }
 0x336   :  { %5620 = vmatpush2.bf16.msra.mxu0 %v8409_v1  ;;  %7352 = vmatprep.subr.bf16.mxu1 %v8413_v2  ;;  %v8444_v1 = vld [vmem:[#allocation7 + $0x6e0] ss:$28 sps:$4 sm:$0xff]  }
 0x337   :  { %5621 = vmatprep.subr.bf16.mxu0 %v8416_v3 }
 0x339   :  { %7353 = vmatpush3.bf16.msra.mxu1 %v8417_v4  ;;  %v8445_v4 = vld [vmem:[#allocation7 + $0x520] ss:$28 sps:$4 sm:$0xff]  }
 0x33a   :  { %5622 = vmatpush2.bf16.msra.mxu0 %v8414_v38  ;;  %7354 = vmatprep.subr.bf16.mxu1 %v8418_v19  ;;  %v8446_v38 = vld [vmem:[#allocation7 + $0x6a8] ss:$28 sps:$4 sm:$0xff]  }
 0x33b   :  { %5685 = vmatprep.subr.bf16.mxu0 %v8421_v21 }
 0x33d   :  { %5624 = vmatmul.mubr.bf16.vlgmr.msra.gmra.mxu0 %v8856_v0  ;;  %7355 = vmatpush3.bf16.msra.mxu1 %v8422_v10  ;;  %v5379_v36 = vpop.f32.mrf.mxu0  ;;  %v8447_v10 = vld [vmem:[#allocation7 + $0x4e8] ss:$28 sps:$4 sm:$0xff]  }
 0x33e   :  { %v8914_v17 = vadd.f32 %v5379_v36, %v8905_v32  ;;  %5686 = vmatpush1.bf16.msra.mxu0 %v8419_v12  ;;  %7356 = vmatprep.subr.bf16.mxu1 %v8423_v13  ;;  %v8480_v32 = vld [vmem:[#allocation10 + $0xf0] sm:$0xff]  }
 0x33f   :  { %v5381_v20 = vpop.f32.mrf.mxu0  ;;  %5687 = vmatprep.subr.bf16.mxu0 %v8426_v14  ;;  %5705 = vmatprep.mubr.bf16.mxu0 %v8674_v16  ;;  %v8481_v16 = vld [vmem:[#allocation10 + $0xb0] sm:$0xff]  }
 0x340   :  { %v8918_v23 = vadd.f32 %v5381_v20, %v8908_v39  ;;  %v8433_v39 = vld [vmem:[#allocation7 + $0x130] ss:$28 sps:$4 sm:$0xff]   ;;  %v8454_v20 = vld [vmem:[#allocation7 + $0x5c8] ss:$28 sps:$4 sm:$0xff]  }
 0x341   :  { %7357 = vmatpush3.bf16.msra.mxu1 %v8427_v15  ;;  %v5383_v6 = vpop.f32.mrf.mxu0  ;;  %v8448_v12 = vld [vmem:[#allocation7 + $0x670] ss:$28 sps:$4 sm:$0xff]   ;;  %v8450_v15 = vld [vmem:[#allocation7 + $0x638] ss:$28 sps:$4 sm:$0xff]  }
 0x342   :  { %5688 = vmatpush1.bf16.msra.mxu0 %v8424_v18  ;;  %7389 = vmatprep.subr.bf16.mxu1 %v8477_v8  ;;  %v8449_v36 = vld [vmem:[#allocation7 + $0x4b0] ss:$28 sps:$4 sm:$0xff]   ;;  %v8451_v18 = vld [vmem:[#allocation7 + $0x478] ss:$28 sps:$4 sm:$0xff]   ;;  %v8452_v8 = vld [vmem:[#allocation7 + $0x600] ss:$28 sps:$4 sm:$0xff]  }
 0x343   :  { %v5384_v27 = vpop.f32.mrf.mxu0  ;;  %7298 = vmatprep.subr.bf16.mxu0 %v8428_v22  ;;  %v8455_v22 = vld [vmem:[#allocation7 + $0x408] ss:$28 sps:$4 sm:$0xff]   ;;  %v8457_v6 = vld [vmem:[#allocation7 + $0x3d0] ss:$28 sps:$4 sm:$0xff]  }
 0x344   :  { %5827 = vmatmul.mubr.bf16.vlgmr.msra.gmra.mxu1 %v8871_v61  ;;  %v8434_v61 = vld [vmem:[#allocation7 + $0x2b8] ss:$28 sps:$4 sm:$0xff]  }
 0x345   :  { %7176 = vmatmul.mubr.msk.bf16.vlgmr.msra.gmra.mxu0 %vm5218_vm2, %v8880_v46  ;;  %7390 = vmatpush3.bf16.msra.mxu1 %v8479_v24  ;;  %v8458_v24 = vld [vmem:[#allocation7 + $0x558] ss:$28 sps:$4 sm:$0xff]  }
 0x346   :  { %7299 = vmatpush3.bf16.msra.mxu0 %v8429_v25  ;;  %5746 = vmatprep.mubr.bf16.mxu0 %v8832_v58  ;;  %v8436_v58 = vld [vmem:[#allocation7 + $0x280] ss:$28 sps:$4 sm:$0xff]   ;;  %v8459_v27 = vld [vmem:[#allocation7 + $0x398] ss:$28 sps:$4 sm:$0xff]  }
 0x347   :  { %7300 = vmatprep.subr.bf16.mxu0 %v8430_v28  ;;  %7391 = vmatprep.subr.bf16.mxu1 %v8480_v32 }
 0x349   :  { %7392 = vmatpush3.bf16.msra.mxu1 %v8481_v16  ;;  %v8460_v16 = vld [vmem:[#allocation7 + $0xad0] ss:$28 sps:$4 sm:$0xff]  }
 0x34a   :  { %7301 = vmatpush3.bf16.msra.mxu0 %v8431_v11  ;;  %7393 = vmatprep.subr.bf16.mxu1 %v8482_v51  ;;  %v8461_v51 = vld [vmem:[#allocation7 + $0xa98] ss:$28 sps:$4 sm:$0xff]  }
 0x34b   :  { %7302 = vmatprep.subr.bf16.mxu0 %v8432_v31  ;;  %v8462_v31 = vld [vmem:[#allocation10 + $0x78] sm:$0xff]  }
 0x34d   :  { %7394 = vmatpush3.bf16.msra.mxu1 %v8483_v34  ;;  %v5875_v34 = vmax.f32 %v8918_v23, 0.0  ;;  %v8470_v23 = vld [vmem:[#allocation10 + $0x58] sm:$0xff]  }
 0x34e   :  { %7303 = vmatpush3.bf16.msra.mxu0 %v8433_v39  ;;  %7395 = vmatprep.subr.bf16.mxu1 %v8484_v52  ;;  %v8463_v39 = vld [vmem:[#allocation10 + $0x38] sm:$0xff]   ;;  %v8464_v52 = vld [vmem:[#allocation10 + $0x70] sm:$0xff]  }
 0x34f   :  { %7304 = vmatprep.subr.bf16.mxu0 %v8434_v61  ;;  %v5882_v61 = vpack.c.bf16 %v5875_v34, %v5875_v34 }
 0x351   :  { %7396 = vmatpush3.bf16.msra.mxu1 %v8485_v41  ;;  %v8466_v41 = vld [vmem:[#allocation10 + $0x68] sm:$0xff]  }
 0x352   :  { %7305 = vmatpush3.bf16.msra.mxu0 %v8435_v42  ;;  %7397 = vmatprep.subr.bf16.mxu1 %v8486_v43  ;;  %v8467_v42 = vld [vmem:[#allocation10 + $0x28] sm:$0xff]   ;;  %v8468_v43 = vld [vmem:[#allocation10 + $0x60] sm:$0xff]  }
 0x353   :  { %7306 = vmatprep.subr.bf16.mxu0 %v8436_v58  ;;  %v8469_v58 = vld [vmem:[#allocation10 + $0x20] sm:$0xff]  }
 0x355   :  { %7398 = vmatpush3.bf16.msra.mxu1 %v8487_v7  ;;  %v8471_v7 = vld [vmem:[#allocation10 + $0x18] sm:$0xff]  }
 0x356   :  { %7307 = vmatpush3.bf16.msra.mxu0 %v8437_v44  ;;  %7399 = vmatprep.subr.bf16.mxu1 %v8488_v45  ;;  %v8472_v44 = vld [vmem:[#allocation10 + $0x50] sm:$0xff]  }
 0x357   :  { %7308 = vmatprep.subr.bf16.mxu0 %v8438_v49  ;;  %v8473_v45 = vld [vmem:[#allocation10 + $0x10] sm:$0xff]   ;;  %v8475_v49 = vld [vmem:[#allocation10 + $0x8] sm:$0xff]  }
 0x359   :  { %7400 = vmatpush3.bf16.msra.mxu1 %v8489_v40  ;;  %v8476_v40 = vld [vmem:[#allocation10 + $0x40] sm:$0xff]  }
 0x35a   :  { %7309 = vmatpush3.bf16.msra.mxu0 %v8439_v48  ;;  %7401 = vmatprep.subr.bf16.mxu1 %v8490_v50 }
 0x35b   :  { %7310 = vmatprep.subr.bf16.mxu0 %v8440_v53  ;;  %v8478_v53 = vld [vmem:[#allocation10] sm:$0xff]  }
 0x35c   :  { %v8924_v60 = vpop.f32.mrf.mxu1 }
 0x35d   :  { %7402 = vmatpush3.bf16.msra.mxu1 %v8491_v54  ;;  %v5874_v54 = vmax.f32 %v8914_v17, 0.0 }
 0x35e   :  { %v8926_v62 = vpop.f32.mrf.mxu1  ;;  %7311 = vmatpush3.bf16.msra.mxu0 %v8441_v55  ;;  %7403 = vmatprep.subr.bf16.mxu1 %v8492_v56  ;;  %v8494_v55 = vld [vmem:[#allocation10 + $0x178] sm:$0xff]  }
 0x35f   :  { %7312 = vmatprep.subr.bf16.mxu0 %v8442_v57 }
 0x360   :  { %v5465_v2 = vpop.f32.mrf.mxu1 }
 0x361   :  { %7404 = vmatpush3.bf16.msra.mxu1 %v8493_v9  ;;  %v8495_v9 = vld [vmem:[#allocation10 + $0x138] sm:$0xff]   ;;  %v8497_v2 = vld [vmem:[#allocation10 + $0x130] sm:$0xff]  }
 0x362   :  { %v5466_v3 = vpop.f32.mrf.mxu1  ;;  %7313 = vmatpush3.bf16.msra.mxu0 %v8443_v63  ;;  %7450 = vmatprep.subr.bf16.mxu1 %v8675_v47  ;;  %v5881_v63 = vpack.c.bf16 %v5874_v54, %v5874_v54 }
 0x363   :  { %7320 = vmatprep.subr.bf16.mxu0 %v8444_v1  ;;  %v8496_v1 = vld [vmem:[#allocation10 + $0x170] sm:$0xff]   ;;  %v8498_v3 = vld [vmem:[#allocation10 + $0x168] sm:$0xff]  }
 0x364   :  { %v8929_v19 = vpop.f32.mrf.mxu1 }
 0x365   :  { %5747 = vmatmul.mubr.bf16.vlgmr.msra.gmra.mxu0 %v8854_v33  ;;  %v8453_v33 = vld [vmem:[#allocation7 + $0x440] ss:$28 sps:$4 sm:$0xff]  }
 0x366   :  { %v8932_v21 = vpop.f32.mrf.mxu1  ;;  %7321 = vmatpush3.bf16.msra.mxu0 %v8445_v4  ;;  %5786 = vmatprep.mubr.bf16.mxu0 %v8850_v26  ;;  %v8456_v26 = vld [vmem:[#allocation7 + $0x590] ss:$28 sps:$4 sm:$0xff]   ;;  %v8499_v4 = vld [vmem:[#allocation10 + $0x128] sm:$0xff]  }
 0x367   :  { %7322 = vmatprep.subr.bf16.mxu0 %v8446_v38  ;;  %v8500_v38 = vld [vmem:[#allocation10 + $0x160] sm:$0xff]  }
 0x368   :  { %v5547_v13 = vpop.f32.mrf.mxu1 }
 0x369   :  { %v8501_v13 = vld [vmem:[#allocation10 + $0x120] sm:$0xff]  }
 0x36a   :  { %v5548_v14 = vpop.f32.mrf.mxu1  ;;  %7323 = vmatpush3.bf16.msra.mxu0 %v8447_v10  ;;  %v8952_v10 = vld [vmem:[#allocation8] sm:$0x7f] }
 0x36b   :  { %7324 = vmatprep.subr.bf16.mxu0 %v8448_v12  ;;  %v3394_v17 = vrot.slane %v8952_v10, %v522_v35  ;;  %v3398_v12 = vrot.slane %v8952_v10, %v526_v37  ;;  %v8502_v14 = vld [vmem:[#allocation10 + $0x158] sm:$0xff]   ;;  %v8505_v37 = vld [vmem:[#allocation10 + $0x110] sm:$0xff]  }
 0x36e   :  { %7325 = vmatpush3.bf16.msra.mxu0 %v8449_v36 }
 0x36f   :  { %7326 = vmatprep.subr.bf16.mxu0 %v8450_v15 }
 0x372   :  { %7327 = vmatpush3.bf16.msra.mxu0 %v8451_v18  ;;  %v8503_v18 = vld [vmem:[#allocation10 + $0x118] sm:$0xff]  }
 0x373   :  { %7328 = vmatprep.subr.bf16.mxu0 %v8452_v8  ;;  %v8504_v8 = vld [vmem:[#allocation10 + $0x150] sm:$0xff]  }
 0x376   :  { %7329 = vmatpush3.bf16.msra.mxu0 %v8453_v33 }
 0x377   :  { %7330 = vmatprep.subr.bf16.mxu0 %v8454_v20 }
 0x37a   :  { %7331 = vmatpush3.bf16.msra.mxu0 %v8455_v22 }
 0x37b   :  { %7332 = vmatprep.subr.bf16.mxu0 %v8456_v26 }
 0x37d   :  { %v8935_v25 = vpop.f32.mrf.mxu0 }
 0x37e   :  { %7333 = vmatpush3.bf16.msra.mxu0 %v8457_v6  ;;  %v5421_v36 = vadd.f32 %v8935_v25, %v3394_v17  ;;  %v8506_v6 = vld [vmem:[#allocation10 + $0x148] sm:$0xff]  }
 0x37f   :  { %v8937_v28 = vpop.f32.mrf.mxu0  ;;  %7334 = vmatprep.subr.bf16.mxu0 %v8458_v24 }
 0x380   :  { %v5423_v15 = vadd.f32 %v8937_v28, %v3398_v12  ;;  %v5462_v33 = vadd.f32 %v8924_v60, %v5421_v36  ;;  %v8508_v60 = vld [vmem:[#allocation10 + $0x140] sm:$0xff]  }
 0x381   :  { %v5424_v32 = vpop.f32.mrf.mxu0 }
 0x382   :  { %7335 = vmatpush3.bf16.msra.mxu0 %v8459_v27  ;;  %v5464_v22 = vadd.f32 %v8926_v62, %v5423_v15  ;;  %v8507_v32 = vld [vmem:[#allocation10 + $0x108] sm:$0xff]   ;;  %v8509_v62 = vld [vmem:[#allocation10 + $0x100] sm:$0xff]  }
 0x383   :  { %v5425_v11 = vpop.f32.mrf.mxu0  ;;  %7442 = vmatprep.subr.bf16.mxu0 %v8675_v47 }
 0x385   :  { %5787 = vmatmul.mubr.bf16.vlgmr.msra.gmra.mxu0 %v8856_v0  ;;  %v8465_v0 = vld [vmem:[#allocation10 + $0x30] sm:$0xff]  }
 0x386   :  { %7443 = vmatpush3.bf16.msra.mxu0 %v8460_v16  ;;  %7446 = vmatprep.mubr.msk.bf16.mxu0 %vm8676_vm1, %v8675_v47 }
 0x387   :  { %7444 = vmatprep.subr.bf16.mxu0 %v8675_v47 }
 0x38a   :  { %7445 = vmatpush3.bf16.msra.mxu0 %v8461_v51 }
 0x38b   :  { %7367 = vmatprep.subr.bf16.mxu0 %v8462_v31 }
 0x38d   :  { %7447 = vmatmul.mubr.msk.bf16.vlgmr.msra.gmra.mxu0 %vm5218_vm2, %v8880_v46  ;;  %v8474_v46 = vld [vmem:[#allocation10 + $0x48] sm:$0xff]  }
 0x38e   :  { %7368 = vmatpush3.bf16.msra.mxu0 %v8463_v39  ;;  %6330 = vmatprep.mubr.bf16.mxu0 %v5882_v61 }
 0x38f   :  { %7369 = vmatprep.subr.bf16.mxu0 %v8464_v52 }
 0x392   :  { %7370 = vmatpush3.bf16.msra.mxu0 %v8465_v0 }
 0x393   :  { %7371 = vmatprep.subr.bf16.mxu0 %v8466_v41  ;;  %v3402_v41 = vrot.slane %v8952_v10, %v530_v59 }
 0x396   :  { %7372 = vmatpush3.bf16.msra.mxu0 %v8467_v42  ;;  %v3406_v42 = vrot.slane %v8952_v10, %v534_v29 }
 0x397   :  { %7373 = vmatprep.subr.bf16.mxu0 %v8468_v43 }
 0x39a   :  { %7374 = vmatpush3.bf16.msra.mxu0 %v8469_v58 }
 0x39b   :  { %7375 = vmatprep.subr.bf16.mxu0 %v8470_v23 }
 0x39e   :  { %7376 = vmatpush3.bf16.msra.mxu0 %v8471_v7 }
 0x39f   :  { %7377 = vmatprep.subr.bf16.mxu0 %v8472_v44 }
 0x3a2   :  { %7378 = vmatpush3.bf16.msra.mxu0 %v8473_v45 }
 0x3a3   :  { %7379 = vmatprep.subr.bf16.mxu0 %v8474_v46 }
 0x3a4   :  { %v8947_v48 = vpop.f32.mrf.mxu1 }
 0x3a5   :  { %v5585_v58 = vadd.f32 %v8947_v48, %v3402_v41 }
 0x3a6   :  { %v8949_v50 = vpop.f32.mrf.mxu1  ;;  %7380 = vmatpush3.bf16.msra.mxu0 %v8475_v49 }
 0x3a7   :  { %7381 = vmatprep.subr.bf16.mxu0 %v8476_v40 }
 0x3a8   :  { %v5588_v56 = vpop.f32.mrf.mxu1 }
 0x3aa   :  { %v5589_v57 = vpop.f32.mrf.mxu1  ;;  %7382 = vmatpush3.bf16.msra.mxu0 %v8478_v53 }
 0x3ab   :  { %7411 = vmatprep.subr.bf16.mxu0 %v8494_v55 }
 0x3ad   :  { %6331 = vmatmul.mubr.bf16.vlgmr.msra.gmra.mxu0 %v5881_v63 }
 0x3ae   :  { %7412 = vmatpush3.bf16.msra.mxu0 %v8495_v9 }
 0x3af   :  { %7413 = vmatprep.subr.bf16.mxu0 %v8496_v1 }
 0x3b2   :  { %7414 = vmatpush3.bf16.msra.mxu0 %v8497_v2 }
 0x3b3   :  { %7415 = vmatprep.subr.bf16.mxu0 %v8498_v3 }
 0x3b6   :  { %7416 = vmatpush3.bf16.msra.mxu0 %v8499_v4 }
 0x3b7   :  { %7417 = vmatprep.subr.bf16.mxu0 %v8500_v38 }
 0x3ba   :  { %7418 = vmatpush3.bf16.msra.mxu0 %v8501_v13 }
 0x3bb   :  { %7419 = vmatprep.subr.bf16.mxu0 %v8502_v14  ;;  %v3410_v14 = vrot.slane %v8952_v10, %v538_v5 }
 0x3bd   :  { %v5502_v20 = vpop.f32.mrf.mxu0 }
 0x3be   :  { %v5503_v35 = vadd.f32 %v5502_v20, %v5462_v33  ;;  %7420 = vmatpush3.bf16.msra.mxu0 %v8503_v18 }
 0x3bf   :  { %v5504_v26 = vpop.f32.mrf.mxu0  ;;  %7421 = vmatprep.subr.bf16.mxu0 %v8504_v8 }
 0x3c0   :  { %v5544_v24 = vadd.f32 %v8929_v19, %v5503_v35  ;;  %v5505_v25 = vadd.f32 %v5504_v26, %v5464_v22  ;;  %v8510_v19 = vld [vmem:[#allocation10 + $0x188] sm:$0xff]  }
 0x3c1   :  { %v5506_v27 = vpop.f32.mrf.mxu0 }
 0x3c2   :  { %v5546_v28 = vadd.f32 %v8932_v21, %v5505_v25  ;;  %7422 = vmatpush3.bf16.msra.mxu0 %v8505_v37  ;;  %v5876_v16 = vmax.f32 %v5544_v24, 0.0  ;;  %v8511_v21 = vld [vmem:[#allocation10 + $0x180] sm:$0xff]  }
 0x3c3   :  { %v5507_v11 = vpop.f32.mrf.mxu0  ;;  %7423 = vmatprep.subr.bf16.mxu0 %v8506_v6 }
 0x3c4   :  { %v5877_v51 = vmax.f32 %v5546_v28, 0.0  ;;  %v5883_v34 = vpack.c.bf16 %v5876_v16, %v5876_v16 }
 0x3c6   :  { %v5884_v31 = vpack.c.bf16 %v5877_v51, %v5877_v51  ;;  %7424 = vmatpush3.bf16.msra.mxu0 %v8507_v32 }
 0x3c7   :  { %7425 = vmatprep.subr.bf16.mxu0 %v8508_v60  ;;  %v7178_v60 = vld [vmem:[#allocation11] ss:$0 sm:$0xff] }
 0x3c8   :  { %6370 = vmatprep.mubr.bf16.mxu1 %v5884_v31 }
 0x3c9   :  { %6371 = vmatmul.mubr.bf16.vlgmr.msra.gmra.mxu1 %v5883_v34 }
 0x3ca   :  { %7426 = vmatpush3.bf16.msra.mxu0 %v8509_v62  ;;  %7454 = vmatprep.mubr.msk.bf16.mxu1 %vm8676_vm1, %v8675_v47 }
 0x3cb   :  { %7451 = vmatpush3.bf16.msra.mxu1 %v8510_v19 }
 0x3cc   :  { %7452 = vmatprep.subr.bf16.mxu1 %v8675_v47  ;;  %v5587_v47 = vadd.f32 %v8949_v50, %v3406_v42 }
 0x3cf   :  { %7453 = vmatpush3.bf16.msra.mxu1 %v8511_v21 }
 0x3e4   :  { %v5666_v39 = vpop.f32.mrf.mxu1 }
 0x3e6   :  { %v5668_v52 = vpop.f32.mrf.mxu1 }
 0x3e8   :  { %v5670_v61 = vpop.f32.mrf.mxu1 }
 0x3ea   :  { %v5671_v0 = vpop.f32.mrf.mxu1 }
 0x3fd   :  { %v5625_v43 = vpop.f32.mrf.mxu0 }
 0x3fe   :  { %v5626_v7 = vadd.f32 %v5625_v43, %v5585_v58 }
 0x3ff   :  { %v5627_v23 = vpop.f32.mrf.mxu0 }
 0x400   :  { %v5628_v45 = vadd.f32 %v5627_v23, %v5587_v47  ;;  %v5667_v40 = vadd.f32 %v5666_v39, %v5626_v7 }
 0x401   :  { %v5629_v44 = vpop.f32.mrf.mxu0 }
 0x402   :  { %v5669_v59 = vadd.f32 %v5668_v52, %v5628_v45 }
 0x403   :  { %v5630_v46 = vpop.f32.mrf.mxu0 }
 0x404   :  { %v7358_v49 = vpop.f32.mrf.mxu1 }
 0x405   :  { %v5707_v53 = vpop.f32.mrf.mxu0 }
 0x406   :  { %v5708_v54 = vadd.f32 %v5707_v53, %v5667_v40  ;;  %v7359_v55 = vpop.f32.mrf.mxu1 }
 0x407   :  { %v7360_v56 = vadd.f32 %v7359_v55, %v7358_v49  ;;  %v5709_v57 = vpop.f32.mrf.mxu0 }
 0x408   :  { %v5710_v9 = vadd.f32 %v5709_v57, %v5669_v59  ;;  %v7361_v29 = vpop.f32.mrf.mxu1  ;;  %v5878_v63 = vmax.f32 %v5708_v54, 0.0 }
 0x409   :  { %v5711_v1 = vpop.f32.mrf.mxu0 }
 0x40a   :  { %v5879_v48 = vmax.f32 %v5710_v9, 0.0  ;;  %v7362_v2 = vpop.f32.mrf.mxu1  ;;  %v5885_v4 = vpack.c.bf16 %v5878_v63, %v5878_v63 }
 0x40b   :  { %v5712_v3 = vpop.f32.mrf.mxu0 }
 0x40c   :  { %v5886_v50 = vpack.c.bf16 %v5879_v48, %v5879_v48 }
 0x40e   :  { %6410 = vmatprep.mubr.bf16.mxu0 %v5886_v50 }
 0x40f   :  { %6411 = vmatmul.mubr.bf16.vlgmr.msra.gmra.mxu0 %v5885_v4 }
 0x425   :  { %v7314_v38 = vpop.f32.mrf.mxu0 }
 0x427   :  { %v7315_v17 = vpop.f32.mrf.mxu0 }
 0x428   :  { %v7316_v36 = vadd.f32 %v7315_v17, %v7314_v38 }
 0x429   :  { %v7317_v12 = vpop.f32.mrf.mxu0 }
 0x42a   :  { %v5749_v8 = vadd.f32 %v7316_v36, %v3410_v14 }
 0x42b   :  { %v7318_v13 = vpop.f32.mrf.mxu0 }
 0x445   :  { %v7336_v15 = vpop.f32.mrf.mxu0 }
 0x447   :  { %v7337_v18 = vpop.f32.mrf.mxu0 }
 0x448   :  { %v7338_v33 = vadd.f32 %v7337_v18, %v7336_v15 }
 0x449   :  { %v7339_v20 = vpop.f32.mrf.mxu0 }
 0x44a   :  { %v5789_v35 = vadd.f32 %v7338_v33, %v5749_v8 }
 0x44b   :  { %v7340_v22 = vpop.f32.mrf.mxu0 }
 0x44c   :  { %v5829_v37 = vadd.f32 %v7360_v56, %v5789_v35 }
 0x44d   :  { %v5868_v26 = vpop.f32.mrf.mxu0 }
 0x44e   :  { %v5869_v6 = vadd.f32 %v5868_v26, %v5829_v37 }
 0x44f   :  { %v7448_v24 = vpop.f32.mrf.mxu0 }
 0x450   :  { %v5880_v25 = vmax.f32 %v5869_v6, 0.0 }
 0x451   :  { %v5871_v27 = vpop.f32.mrf.mxu0 }
 0x452   :  { %v5887_v28 = vpack.c.bf16 %v5880_v25, %v5880_v25 }
 0x453   :  { %v7449_v32 = vpop.f32.mrf.mxu0 }
 0x454   :  { %7455 = vmatmul.mubr.msk.bf16.vlgmr.msra.gmra.mxu1 %vm5218_vm2, %v5887_v28 }
 0x46d   :  { %v7383_v30 = vpop.f32.mrf.mxu0 }
 0x46f   :  { %v7384_v5 = vpop.f32.mrf.mxu0 }
 0x470   :  { %v7385_v10 = vadd.f32 %v7384_v5, %v7383_v30 }
 0x471   :  { %v7386_v16 = vpop.f32.mrf.mxu0 }
 0x472   :  { %v6333_v62 = vadd.f32 %v7385_v10, %v7178_v60 }
 0x473   :  { %v7387_v11 = vpop.f32.mrf.mxu0 }
 0x489   :  { %v7405_v51 = vpop.f32.mrf.mxu1 }
 0x48b   :  { %v7406_v31 = vpop.f32.mrf.mxu1 }
 0x48c   :  { %v7407_v34 = vadd.f32 %v7406_v31, %v7405_v51 }
 0x48d   :  { %v7408_v19 = vpop.f32.mrf.mxu1 }
 0x48e   :  { %v6373_v21 = vadd.f32 %v7407_v34, %v6333_v62 }
 0x48f   :  { %v7409_v39 = vpop.f32.mrf.mxu1 }
 0x4cf   :  { %v7427_v52 = vpop.f32.mrf.mxu0 }
 0x4d1   :  { %v7428_v61 = vpop.f32.mrf.mxu0 }
 0x4d2   :  { %v7429_v0 = vadd.f32 %v7428_v61, %v7427_v52 }
 0x4d3   :  { %v7430_v41 = vpop.f32.mrf.mxu0 }
 0x4d4   :  { %v6413_v42 = vadd.f32 %v7429_v0, %v6373_v21 }
 0x4d5   :  { %v7431_v43 = vpop.f32.mrf.mxu0 }
 0x514   :  { %v6452_v58 = vpop.f32.mrf.mxu1 }
 0x515   :  { %v6453_v23 = vadd.f32 %v6452_v58, %v6413_v42 }
 0x516   :  { %v7456_v47 = vpop.f32.mrf.mxu1 }
 0x517   :  { %6458 = vst [vmem:[#allocation13] sm:$0xff] %v6453_v23 }
 0x518   :  { %v6455_v7 = vpop.f32.mrf.mxu1 }
 0x519   :  { %8645 = shalt.err (!%p8642_p6)
}
 0x51a   :  { %6468 = dma.vmem_to_hbm [thread:$0]  %s6466_s21, 128, %s8991_s7, [#allocation4]   ;;  %v7457_v44 = vpop.f32.mrf.mxu1 }
 0x51b   :  { %8662 = dma.done.wait [#allocation4], 128  }
 0x51c   :  { %8663 = vsyncadd [#allocation4], 4294967168 }
 0x51d   :  { %6472 = vsyncpa [#allocation3], 1 }
 0x51e   :  { %6473 = vsyncpa [#allocation6], 1 }
 0x51f   :  { %6474 = vsyncpa [#allocation9], 1 }
 0x520   :  { %6475 = vsyncpa [#allocation12], 1 }
 0x521   :  { %6476 = vsyncpa [#allocation4], 1 }

</bundles_post_ra>
